<compile_context>
chip_gen: v5e
topology: v5e:2x2
jax: 0.10.0
libtpu: 0.0.40
codegen_flags: <defaults>
</compile_context>

<pallas_src>
import numpy as np
import jax
import jax.numpy as jnp
from jax.experimental import pallas as pl
from jax.experimental.pallas import tpu as pltpu


# --------------------------------------------------------------------------
# Fused kernel (one grid step == one sample)
# --------------------------------------------------------------------------

def convnet2_kernel(p1_ref, w1_ref, b1_ref, s1_ref, t1_ref,
                    g_ref, w2_ref, b2_ref, s2_ref, t2_ref, o_ref):
    """conv1 + ReLU + BN1 + MaxPool(2,2) + conv2 + ReLU + BN2 for one sample.

    p1_ref : (4*M2, 800) bf16  conv1 im2col patches, rows = parity*M2 + pooled_pixel
    w1_ref : (800, 64)   bf16  conv1 weight, rows ordered (dy, dx, cin)
    b1/s1/t1: (1, 64)    f32   conv1 bias, BN1 scale, BN1 shift (eval-mode fold)
    g_ref  : (9*M2, M2)  bf16  one-hot gather of reflect-padded 3x3 taps of the pooled map
    w2_ref : (9, 64, 64) bf16  conv2 weight per tap (dy*3+dx, cin, cout)
    b2/s2/t2: (1, 64)    f32
    o_ref  : (M2, 64)    f32   output rows = pooled pixel (ho*Wo + wo)
    """
    m2 = o_ref.shape[0]
    cout = o_ref.shape[1]

    # ---- Conv1: single wide-K matmul, then bias + ReLU + BN1 affine (module order) ----
    y1 = jnp.dot(p1_ref[...], w1_ref[...], preferred_element_type=jnp.float32)
    y1 = jnp.maximum(y1 + b1_ref[...], 0.0) * s1_ref[...] + t1_ref[...]   # (4*M2, 64)

    # ---- MaxPool2d(2,2): rows are (parity, pooled-pixel) -> max over the 4 parity blocks ----
    pooled = y1[0:m2]
    for p in range(1, 4):
        pooled = jnp.maximum(pooled, y1[p * m2:(p + 1) * m2])             # (M2, 64)

    # ---- Conv2: gather the 9 reflect-padded taps with one one-hot matmul (stays in VMEM) ----
    taps = jnp.dot(g_ref[...], pooled.astype(jnp.bfloat16),
                   preferred_element_type=jnp.float32)                    # (9*M2, 64)
    taps = taps.astype(jnp.bfloat16)

    acc = jnp.zeros((m2, cout), jnp.float32)
    for k in range(9):                                                    # accumulating K=64 dots
        acc += jnp.dot(taps[k * m2:(k + 1) * m2], w2_ref[k],
                       preferred_element_type=jnp.float32)

    # ---- bias + ReLU + BN2 affine ----
    o_ref[...] = jnp.maximum(acc + b2_ref[...], 0.0) * s2_ref[...] + t2_ref[...]


# --------------------------------------------------------------------------
# Glue helpers (all static / trace-time or cheap XLA ops)
# --------------------------------------------------------------------------

def _reflect(i, n):
    if i < 0:
        return -i
    if i >= n:
        return 2 * n - 2 - i
    return i


def build_conv2_gather(ho_dim, wo_dim):
    """(9*M2, M2) one-hot matrix: row (k*M2 + m) selects the reflect-padded
    3x3 tap k of pooled pixel m (row-gather form of conv2's im2col)."""
    m2 = ho_dim * wo_dim
    g = np.zeros((9 * m2, m2), np.float32)
    for dy in range(3):
        for dx in range(3):
            k = dy * 3 + dx
            for ho in range(ho_dim):
                for wo in range(wo_dim):
                    hi = _reflect(ho + dy - 1, ho_dim)
                    wi = _reflect(wo + dx - 1, wo_dim)
                    g[k * m2 + ho * wo_dim + wo, hi * wo_dim + wi] = 1.0
    return g


def _conv1_patches(x_nchw):
    """NCHW input -> (N*4*M2, 800) bf16 im2col matrix for the 5x5 reflect-padded conv,
    rows ordered (sample, 2x2-pool-parity, pooled pixel); columns ordered (dy, dx, cin)."""
    n, cin, h, w = x_nchw.shape
    ho, wo = h // 2, w // 2
    k1 = 25 * cin
    xh = jnp.transpose(x_nchw, (0, 2, 3, 1))                              # NHWC
    xp = jnp.pad(xh, ((0, 0), (2, 2), (2, 2), (0, 0)), mode="reflect")    # reflect pad 2
    taps = [xp[:, dy:dy + h, dx:dx + w, :] for dy in range(5) for dx in range(5)]
    pat = jnp.concatenate(taps, axis=-1)                                  # (N, H, W, 800)
    pat = pat.reshape(n, ho, 2, wo, 2, k1)
    pat = pat.transpose(0, 2, 4, 1, 3, 5)                                 # (N, ph, pw, Ho, Wo, 800)
    return pat.reshape(n * 4 * ho * wo, k1).astype(jnp.bfloat16)


# --------------------------------------------------------------------------
# Forward pass
# --------------------------------------------------------------------------

@jax.jit
def convnetwork_2_forward(x_nchw, params):
    n, cin, h, w = x_nchw.shape
    ho, wo = h // 2, w // 2
    m2 = ho * wo
    k1 = 25 * cin
    cout = 64

    p1 = _conv1_patches(x_nchw)
    g2 = jnp.asarray(build_conv2_gather(ho, wo), dtype=jnp.bfloat16)      # trace-time constant

    out2d = pl.pallas_call(
        convnet2_kernel,
        out_shape=jax.ShapeDtypeStruct((n * m2, cout), jnp.float32),
        grid=(n,),
        in_specs=[
            pl.BlockSpec((4 * m2, k1), lambda b: (b, 0)),        # conv1 patches (per sample)
            pl.BlockSpec((k1, cout), lambda b: (0, 0)),          # conv1 weight
            pl.BlockSpec((1, cout), lambda b: (0, 0)),           # conv1 bias
            pl.BlockSpec((1, cout), lambda b: (0, 0)),           # BN1 scale
            pl.BlockSpec((1, cout), lambda b: (0, 0)),           # BN1 shift
            pl.BlockSpec((9 * m2, m2), lambda b: (0, 0)),        # conv2 gather matrix
            pl.BlockSpec((9, cout, cout), lambda b: (0, 0, 0)),  # conv2 weight
            pl.BlockSpec((1, cout), lambda b: (0, 0)),           # conv2 bias
            pl.BlockSpec((1, cout), lambda b: (0, 0)),           # BN2 scale
            pl.BlockSpec((1, cout), lambda b: (0, 0)),           # BN2 shift
        ],
        out_specs=pl.BlockSpec((m2, cout), lambda b: (b, 0)),
        compiler_params=pltpu.CompilerParams(dimension_semantics=("parallel",)),
    )(p1, params["w1"], params["b1"], params["s1"], params["t1"],
      g2, params["w2"], params["b2"], params["s2"], params["t2"])

    out = out2d.reshape(n, ho, wo, cout)
    return jnp.transpose(out, (0, 3, 1, 2))                               # NCHW, like the module


# --------------------------------------------------------------------------
# Deterministic synthetic parameters (shapes follow the nn.Module __init__)
# --------------------------------------------------------------------------

def _bn_fold(key, c):
    k1, k2, k3, k4 = jax.random.split(key, 4)
    gamma = 1.0 + 0.1 * jax.random.normal(k1, (1, c), jnp.float32)
    beta = 0.1 * jax.random.normal(k2, (1, c), jnp.float32)
    mean = 0.1 * jax.random.normal(k3, (1, c), jnp.float32)
    var = jax.random.uniform(k4, (1, c), jnp.float32, 0.5, 1.5)
    scale = gamma * jax.lax.rsqrt(var + 1e-5)
    shift = beta - mean * scale
    return scale, shift


def init_params(key):
    k1, k2 = jax.random.split(key, 2)
    kw1, kb1, kbn1 = jax.random.split(k1, 3)
    kw2, kb2, kbn2 = jax.random.split(k2, 3)
    p = {}
    # Conv2d(32, 64, k=5): PyTorch (64,32,5,5) stored as (5*5*32, 64), rows (dy, dx, cin)
    p["w1"] = (0.05 * jax.random.normal(kw1, (25 * 32, 64), jnp.float32)).astype(jnp.bfloat16)
    p["b1"] = 0.05 * jax.random.normal(kb1, (1, 64), jnp.float32)
    p["s1"], p["t1"] = _bn_fold(kbn1, 64)
    # Conv2d(64, 64, k=3): PyTorch (64,64,3,3) stored as (9, 64, 64), leading dim (dy*3+dx)
    p["w2"] = (0.05 * jax.random.normal(kw2, (9, 64, 64), jnp.float32)).astype(jnp.bfloat16)
    p["b2"] = 0.05 * jax.random.normal(kb2, (1, 64), jnp.float32)
    p["s2"], p["t2"] = _bn_fold(kbn2, 64)
    return p


if __name__ == "__main__":
    key = jax.random.PRNGKey(0)
    kx, kp = jax.random.split(key)
    # NCHW input: batch=2, channels=32 (required by Conv2d(32, ...)), H=W=16
    x = jax.random.normal(kx, (2, 32, 16, 16), jnp.float32)
    params = init_params(kp)
    out = convnetwork_2_forward(x, params)
    out = jax.block_until_ready(out)
    assert out.shape == (2, 64, 8, 8), out.shape
    assert bool(jnp.all(jnp.isfinite(out)))
    print("KERNEL_OK")
</pallas_src>

<mosaic_0001>
module attributes {stable_mosaic.version = 11 : i64} {
  func.func @convnet2_kernel(%arg0: i32, %arg1: memref<256x800xbf16, #tpu.memory_space<vmem>>, %arg2: memref<800x64xbf16, #tpu.memory_space<vmem>>, %arg3: memref<1x64xf32, #tpu.memory_space<vmem>>, %arg4: memref<1x64xf32, #tpu.memory_space<vmem>>, %arg5: memref<1x64xf32, #tpu.memory_space<vmem>>, %arg6: memref<576x64xbf16, #tpu.memory_space<vmem>>, %arg7: memref<9x64x64xbf16, #tpu.memory_space<vmem>>, %arg8: memref<1x64xf32, #tpu.memory_space<vmem>>, %arg9: memref<1x64xf32, #tpu.memory_space<vmem>>, %arg10: memref<1x64xf32, #tpu.memory_space<vmem>>, %arg11: memref<64x64xf32, #tpu.memory_space<vmem>>) attributes {dimension_semantics = [#tpu.dimension_semantics<parallel>], iteration_bounds = array<i64: 2>, scalar_prefetch = 0 : i64, scratch_operands = 0 : i64, tpu.core_type = #tpu.core_type<tc>, window_params = [{transform_indices = @transform_0, window_bounds = array<i64: 256, 800>}, {pipeline_mode = #tpu.pipeline_mode<synchronous>, transform_indices = @transform_1, window_bounds = array<i64: 800, 64>}, {pipeline_mode = #tpu.pipeline_mode<synchronous>, transform_indices = @transform_2, window_bounds = array<i64: 1, 64>}, {pipeline_mode = #tpu.pipeline_mode<synchronous>, transform_indices = @transform_3, window_bounds = array<i64: 1, 64>}, {pipeline_mode = #tpu.pipeline_mode<synchronous>, transform_indices = @transform_4, window_bounds = array<i64: 1, 64>}, {pipeline_mode = #tpu.pipeline_mode<synchronous>, transform_indices = @transform_5, window_bounds = array<i64: 576, 64>}, {pipeline_mode = #tpu.pipeline_mode<synchronous>, transform_indices = @transform_6, window_bounds = array<i64: 9, 64, 64>}, {pipeline_mode = #tpu.pipeline_mode<synchronous>, transform_indices = @transform_7, window_bounds = array<i64: 1, 64>}, {pipeline_mode = #tpu.pipeline_mode<synchronous>, transform_indices = @transform_8, window_bounds = array<i64: 1, 64>}, {pipeline_mode = #tpu.pipeline_mode<synchronous>, transform_indices = @transform_9, window_bounds = array<i64: 1, 64>}, {transform_indices = @transform_10, window_bounds = array<i64: 64, 64>}]} {
    %c0 = arith.constant 0 : index
    %c0_0 = arith.constant 0 : index
    %0 = vector.load %arg1[%c0, %c0_0] : memref<256x800xbf16, #tpu.memory_space<vmem>>, vector<256x800xbf16>
    %c0_1 = arith.constant 0 : index
    %c0_2 = arith.constant 0 : index
    %1 = vector.load %arg2[%c0_1, %c0_2] : memref<800x64xbf16, #tpu.memory_space<vmem>>, vector<800x64xbf16>
    %cst = arith.constant dense<0.000000e+00> : vector<256x64xf32>
    %2 = tpu.matmul %0, %1, %cst {dimension_numbers = #tpu.dot_dimension_numbers<[1], [0], [0], [1], [0, 0, 1, 1], [], []>} : vector<256x800xbf16>, vector<800x64xbf16>, vector<256x64xf32> -> vector<256x64xf32>
    %c0_3 = arith.constant 0 : index
    %c0_4 = arith.constant 0 : index
    %3 = vector.load %arg3[%c0_3, %c0_4] : memref<1x64xf32, #tpu.memory_space<vmem>>, vector<1x64xf32>
    %4 = vector.broadcast %3 : vector<1x64xf32> to vector<256x64xf32>
    %5 = arith.addf %2, %4 : vector<256x64xf32>
    %cst_5 = arith.constant 0.000000e+00 : f32
    %6 = vector.broadcast %cst_5 : f32 to vector<256x64xf32>
    %7 = arith.maximumf %5, %6 : vector<256x64xf32>
    %c0_6 = arith.constant 0 : index
    %c0_7 = arith.constant 0 : index
    %8 = vector.load %arg4[%c0_6, %c0_7] : memref<1x64xf32, #tpu.memory_space<vmem>>, vector<1x64xf32>
    %9 = vector.broadcast %8 : vector<1x64xf32> to vector<256x64xf32>
    %10 = arith.mulf %7, %9 : vector<256x64xf32>
    %c0_8 = arith.constant 0 : index
    %c0_9 = arith.constant 0 : index
    %11 = vector.load %arg5[%c0_8, %c0_9] : memref<1x64xf32, #tpu.memory_space<vmem>>, vector<1x64xf32>
    %12 = vector.broadcast %11 : vector<1x64xf32> to vector<256x64xf32>
    %13 = arith.addf %10, %12 : vector<256x64xf32>
    %14 = vector.extract_strided_slice %13 {offsets = [0, 0], sizes = [64, 64], strides = [1, 1]} : vector<256x64xf32> to vector<64x64xf32>
    %15 = vector.extract_strided_slice %13 {offsets = [64, 0], sizes = [64, 64], strides = [1, 1]} : vector<256x64xf32> to vector<64x64xf32>
    %16 = arith.maximumf %14, %15 : vector<64x64xf32>
    %17 = vector.extract_strided_slice %13 {offsets = [128, 0], sizes = [64, 64], strides = [1, 1]} : vector<256x64xf32> to vector<64x64xf32>
    %18 = arith.maximumf %16, %17 : vector<64x64xf32>
    %19 = vector.extract_strided_slice %13 {offsets = [192, 0], sizes = [64, 64], strides = [1, 1]} : vector<256x64xf32> to vector<64x64xf32>
    %20 = arith.maximumf %18, %19 : vector<64x64xf32>
    %c0_10 = arith.constant 0 : index
    %c0_11 = arith.constant 0 : index
    %21 = vector.load %arg6[%c0_10, %c0_11] : memref<576x64xbf16, #tpu.memory_space<vmem>>, vector<576x64xbf16>
    %22 = arith.truncf %20 : vector<64x64xf32> to vector<64x64xbf16>
    %cst_12 = arith.constant dense<0.000000e+00> : vector<576x64xf32>
    %23 = tpu.matmul %21, %22, %cst_12 {dimension_numbers = #tpu.dot_dimension_numbers<[1], [0], [0], [1], [0, 0, 1, 1], [], []>} : vector<576x64xbf16>, vector<64x64xbf16>, vector<576x64xf32> -> vector<576x64xf32>
    %24 = arith.truncf %23 : vector<576x64xf32> to vector<576x64xbf16>
    %cst_13 = arith.constant 0.000000e+00 : f32
    %25 = vector.broadcast %cst_13 : f32 to vector<64x64xf32>
    %26 = vector.extract_strided_slice %24 {offsets = [0, 0], sizes = [64, 64], strides = [1, 1]} : vector<576x64xbf16> to vector<64x64xbf16>
    %c0_14 = arith.constant 0 : index
    %c0_15 = arith.constant 0 : index
    %c0_16 = arith.constant 0 : index
    %27 = vector.load %arg7[%c0_14, %c0_15, %c0_16] : memref<9x64x64xbf16, #tpu.memory_space<vmem>>, vector<1x64x64xbf16>
    %28 = vector.shape_cast %27 : vector<1x64x64xbf16> to vector<64x64xbf16>
    %cst_17 = arith.constant dense<0.000000e+00> : vector<64x64xf32>
    %29 = tpu.matmul %26, %28, %cst_17 {dimension_numbers = #tpu.dot_dimension_numbers<[1], [0], [0], [1], [0, 0, 1, 1], [], []>} : vector<64x64xbf16>, vector<64x64xbf16>, vector<64x64xf32> -> vector<64x64xf32>
    %30 = arith.addf %25, %29 : vector<64x64xf32>
    %31 = vector.extract_strided_slice %24 {offsets = [64, 0], sizes = [64, 64], strides = [1, 1]} : vector<576x64xbf16> to vector<64x64xbf16>
    %c1 = arith.constant 1 : index
    %c0_18 = arith.constant 0 : index
    %c0_19 = arith.constant 0 : index
    %32 = vector.load %arg7[%c1, %c0_18, %c0_19] : memref<9x64x64xbf16, #tpu.memory_space<vmem>>, vector<1x64x64xbf16>
    %33 = vector.shape_cast %32 : vector<1x64x64xbf16> to vector<64x64xbf16>
    %cst_20 = arith.constant dense<0.000000e+00> : vector<64x64xf32>
    %34 = tpu.matmul %31, %33, %cst_20 {dimension_numbers = #tpu.dot_dimension_numbers<[1], [0], [0], [1], [0, 0, 1, 1], [], []>} : vector<64x64xbf16>, vector<64x64xbf16>, vector<64x64xf32> -> vector<64x64xf32>
    %35 = arith.addf %30, %34 : vector<64x64xf32>
    %36 = vector.extract_strided_slice %24 {offsets = [128, 0], sizes = [64, 64], strides = [1, 1]} : vector<576x64xbf16> to vector<64x64xbf16>
    %c2 = arith.constant 2 : index
    %c0_21 = arith.constant 0 : index
    %c0_22 = arith.constant 0 : index
    %37 = vector.load %arg7[%c2, %c0_21, %c0_22] : memref<9x64x64xbf16, #tpu.memory_space<vmem>>, vector<1x64x64xbf16>
    %38 = vector.shape_cast %37 : vector<1x64x64xbf16> to vector<64x64xbf16>
    %cst_23 = arith.constant dense<0.000000e+00> : vector<64x64xf32>
    %39 = tpu.matmul %36, %38, %cst_23 {dimension_numbers = #tpu.dot_dimension_numbers<[1], [0], [0], [1], [0, 0, 1, 1], [], []>} : vector<64x64xbf16>, vector<64x64xbf16>, vector<64x64xf32> -> vector<64x64xf32>
    %40 = arith.addf %35, %39 : vector<64x64xf32>
    %41 = vector.extract_strided_slice %24 {offsets = [192, 0], sizes = [64, 64], strides = [1, 1]} : vector<576x64xbf16> to vector<64x64xbf16>
    %c3 = arith.constant 3 : index
    %c0_24 = arith.constant 0 : index
    %c0_25 = arith.constant 0 : index
    %42 = vector.load %arg7[%c3, %c0_24, %c0_25] : memref<9x64x64xbf16, #tpu.memory_space<vmem>>, vector<1x64x64xbf16>
    %43 = vector.shape_cast %42 : vector<1x64x64xbf16> to vector<64x64xbf16>
    %cst_26 = arith.constant dense<0.000000e+00> : vector<64x64xf32>
    %44 = tpu.matmul %41, %43, %cst_26 {dimension_numbers = #tpu.dot_dimension_numbers<[1], [0], [0], [1], [0, 0, 1, 1], [], []>} : vector<64x64xbf16>, vector<64x64xbf16>, vector<64x64xf32> -> vector<64x64xf32>
    %45 = arith.addf %40, %44 : vector<64x64xf32>
    %46 = vector.extract_strided_slice %24 {offsets = [256, 0], sizes = [64, 64], strides = [1, 1]} : vector<576x64xbf16> to vector<64x64xbf16>
    %c4 = arith.constant 4 : index
    %c0_27 = arith.constant 0 : index
    %c0_28 = arith.constant 0 : index
    %47 = vector.load %arg7[%c4, %c0_27, %c0_28] : memref<9x64x64xbf16, #tpu.memory_space<vmem>>, vector<1x64x64xbf16>
    %48 = vector.shape_cast %47 : vector<1x64x64xbf16> to vector<64x64xbf16>
    %cst_29 = arith.constant dense<0.000000e+00> : vector<64x64xf32>
    %49 = tpu.matmul %46, %48, %cst_29 {dimension_numbers = #tpu.dot_dimension_numbers<[1], [0], [0], [1], [0, 0, 1, 1], [], []>} : vector<64x64xbf16>, vector<64x64xbf16>, vector<64x64xf32> -> vector<64x64xf32>
    %50 = arith.addf %45, %49 : vector<64x64xf32>
    %51 = vector.extract_strided_slice %24 {offsets = [320, 0], sizes = [64, 64], strides = [1, 1]} : vector<576x64xbf16> to vector<64x64xbf16>
    %c5 = arith.constant 5 : index
    %c0_30 = arith.constant 0 : index
    %c0_31 = arith.constant 0 : index
    %52 = vector.load %arg7[%c5, %c0_30, %c0_31] : memref<9x64x64xbf16, #tpu.memory_space<vmem>>, vector<1x64x64xbf16>
    %53 = vector.shape_cast %52 : vector<1x64x64xbf16> to vector<64x64xbf16>
    %cst_32 = arith.constant dense<0.000000e+00> : vector<64x64xf32>
    %54 = tpu.matmul %51, %53, %cst_32 {dimension_numbers = #tpu.dot_dimension_numbers<[1], [0], [0], [1], [0, 0, 1, 1], [], []>} : vector<64x64xbf16>, vector<64x64xbf16>, vector<64x64xf32> -> vector<64x64xf32>
    %55 = arith.addf %50, %54 : vector<64x64xf32>
    %56 = vector.extract_strided_slice %24 {offsets = [384, 0], sizes = [64, 64], strides = [1, 1]} : vector<576x64xbf16> to vector<64x64xbf16>
    %c6 = arith.constant 6 : index
    %c0_33 = arith.constant 0 : index
    %c0_34 = arith.constant 0 : index
    %57 = vector.load %arg7[%c6, %c0_33, %c0_34] : memref<9x64x64xbf16, #tpu.memory_space<vmem>>, vector<1x64x64xbf16>
    %58 = vector.shape_cast %57 : vector<1x64x64xbf16> to vector<64x64xbf16>
    %cst_35 = arith.constant dense<0.000000e+00> : vector<64x64xf32>
    %59 = tpu.matmul %56, %58, %cst_35 {dimension_numbers = #tpu.dot_dimension_numbers<[1], [0], [0], [1], [0, 0, 1, 1], [], []>} : vector<64x64xbf16>, vector<64x64xbf16>, vector<64x64xf32> -> vector<64x64xf32>
    %60 = arith.addf %55, %59 : vector<64x64xf32>
    %61 = vector.extract_strided_slice %24 {offsets = [448, 0], sizes = [64, 64], strides = [1, 1]} : vector<576x64xbf16> to vector<64x64xbf16>
    %c7 = arith.constant 7 : index
    %c0_36 = arith.constant 0 : index
    %c0_37 = arith.constant 0 : index
    %62 = vector.load %arg7[%c7, %c0_36, %c0_37] : memref<9x64x64xbf16, #tpu.memory_space<vmem>>, vector<1x64x64xbf16>
    %63 = vector.shape_cast %62 : vector<1x64x64xbf16> to vector<64x64xbf16>
    %cst_38 = arith.constant dense<0.000000e+00> : vector<64x64xf32>
    %64 = tpu.matmul %61, %63, %cst_38 {dimension_numbers = #tpu.dot_dimension_numbers<[1], [0], [0], [1], [0, 0, 1, 1], [], []>} : vector<64x64xbf16>, vector<64x64xbf16>, vector<64x64xf32> -> vector<64x64xf32>
    %65 = arith.addf %60, %64 : vector<64x64xf32>
    %66 = vector.extract_strided_slice %24 {offsets = [512, 0], sizes = [64, 64], strides = [1, 1]} : vector<576x64xbf16> to vector<64x64xbf16>
    %c8 = arith.constant 8 : index
    %c0_39 = arith.constant 0 : index
    %c0_40 = arith.constant 0 : index
    %67 = vector.load %arg7[%c8, %c0_39, %c0_40] : memref<9x64x64xbf16, #tpu.memory_space<vmem>>, vector<1x64x64xbf16>
    %68 = vector.shape_cast %67 : vector<1x64x64xbf16> to vector<64x64xbf16>
    %cst_41 = arith.constant dense<0.000000e+00> : vector<64x64xf32>
    %69 = tpu.matmul %66, %68, %cst_41 {dimension_numbers = #tpu.dot_dimension_numbers<[1], [0], [0], [1], [0, 0, 1, 1], [], []>} : vector<64x64xbf16>, vector<64x64xbf16>, vector<64x64xf32> -> vector<64x64xf32>
    %70 = arith.addf %65, %69 : vector<64x64xf32>
    %c0_42 = arith.constant 0 : index
    %c0_43 = arith.constant 0 : index
    %71 = vector.load %arg8[%c0_42, %c0_43] : memref<1x64xf32, #tpu.memory_space<vmem>>, vector<1x64xf32>
    %72 = vector.broadcast %71 : vector<1x64xf32> to vector<64x64xf32>
    %73 = arith.addf %70, %72 : vector<64x64xf32>
    %cst_44 = arith.constant 0.000000e+00 : f32
    %74 = vector.broadcast %cst_44 : f32 to vector<64x64xf32>
    %75 = arith.maximumf %73, %74 : vector<64x64xf32>
    %c0_45 = arith.constant 0 : index
    %c0_46 = arith.constant 0 : index
    %76 = vector.load %arg9[%c0_45, %c0_46] : memref<1x64xf32, #tpu.memory_space<vmem>>, vector<1x64xf32>
    %77 = vector.broadcast %76 : vector<1x64xf32> to vector<64x64xf32>
    %78 = arith.mulf %75, %77 : vector<64x64xf32>
    %c0_47 = arith.constant 0 : index
    %c0_48 = arith.constant 0 : index
    %79 = vector.load %arg10[%c0_47, %c0_48] : memref<1x64xf32, #tpu.memory_space<vmem>>, vector<1x64xf32>
    %80 = vector.broadcast %79 : vector<1x64xf32> to vector<64x64xf32>
    %81 = arith.addf %78, %80 : vector<64x64xf32>
    %c0_49 = arith.constant 0 : index
    %c0_50 = arith.constant 0 : index
    %82 = vector.load %arg11[%c0_49, %c0_50] : memref<64x64xf32, #tpu.memory_space<vmem>>, vector<64x64xf32>
    tpu.vector_store %arg11[%c0_49, %c0_50], %81 {strides = array<i32>} : memref<64x64xf32, #tpu.memory_space<vmem>>, vector<64x64xf32>,
    return
  }
  func.func @transform_0(%arg0: i32) -> (i32, i32) {
    %c0_i32 = arith.constant 0 : i32
    %c0_i32_0 = arith.constant 0 : i32
    return %arg0, %c0_i32 : i32, i32
  }
  func.func @transform_1(%arg0: i32) -> (i32, i32) {
    %c0_i32 = arith.constant 0 : i32
    %c0_i32_0 = arith.constant 0 : i32
    %c0_i32_1 = arith.constant 0 : i32
    return %c0_i32, %c0_i32_0 : i32, i32
  }
  func.func @transform_2(%arg0: i32) -> (i32, i32) {
    %c0_i32 = arith.constant 0 : i32
    %c0_i32_0 = arith.constant 0 : i32
    %c0_i32_1 = arith.constant 0 : i32
    return %c0_i32, %c0_i32_0 : i32, i32
  }
  func.func @transform_3(%arg0: i32) -> (i32, i32) {
    %c0_i32 = arith.constant 0 : i32
    %c0_i32_0 = arith.constant 0 : i32
    %c0_i32_1 = arith.constant 0 : i32
    return %c0_i32, %c0_i32_0 : i32, i32
  }
  func.func @transform_4(%arg0: i32) -> (i32, i32) {
    %c0_i32 = arith.constant 0 : i32
    %c0_i32_0 = arith.constant 0 : i32
    %c0_i32_1 = arith.constant 0 : i32
    return %c0_i32, %c0_i32_0 : i32, i32
  }
  func.func @transform_5(%arg0: i32) -> (i32, i32) {
    %c0_i32 = arith.constant 0 : i32
    %c0_i32_0 = arith.constant 0 : i32
    %c0_i32_1 = arith.constant 0 : i32
    return %c0_i32, %c0_i32_0 : i32, i32
  }
  func.func @transform_6(%arg0: i32) -> (i32, i32, i32) {
    %c0_i32 = arith.constant 0 : i32
    %c0_i32_0 = arith.constant 0 : i32
    %c0_i32_1 = arith.constant 0 : i32
    %c0_i32_2 = arith.constant 0 : i32
    return %c0_i32, %c0_i32_0, %c0_i32_1 : i32, i32, i32
  }
  func.func @transform_7(%arg0: i32) -> (i32, i32) {
    %c0_i32 = arith.constant 0 : i32
    %c0_i32_0 = arith.constant 0 : i32
    %c0_i32_1 = arith.constant 0 : i32
    return %c0_i32, %c0_i32_0 : i32, i32
  }
  func.func @transform_8(%arg0: i32) -> (i32, i32) {
    %c0_i32 = arith.constant 0 : i32
    %c0_i32_0 = arith.constant 0 : i32
    %c0_i32_1 = arith.constant 0 : i32
    return %c0_i32, %c0_i32_0 : i32, i32
  }
  func.func @transform_9(%arg0: i32) -> (i32, i32) {
    %c0_i32 = arith.constant 0 : i32
    %c0_i32_0 = arith.constant 0 : i32
    %c0_i32_1 = arith.constant 0 : i32
    return %c0_i32, %c0_i32_0 : i32, i32
  }
  func.func @transform_10(%arg0: i32) -> (i32, i32) {
    %c0_i32 = arith.constant 0 : i32
    %c0_i32_0 = arith.constant 0 : i32
    return %arg0, %c0_i32 : i32, i32
  }
}

</mosaic_0001>

<bundles_post_ra>
// kernel: convnetwork_2_forward.1
= control target key start
LH: loop header
LB: loop body
LE: loop exit
PB: predicated region body
PF: predicated region fallthrough
CT: control target
= control target key end

     0   :  { %15 = vsyncpa [#allocation3], 0  ;;  %s6883_s0 = inlined_call_operand.vmem [shape: bf16[512,800], index: 0, kind: input, shape index: {}]   ;;  %s6884_s1 = inlined_call_operand.vmem [shape: bf16[800,64], index: 1, kind: input, shape index: {}]   ;;  %s6885_s2 = inlined_call_operand.vmem [shape: f32[1,64], index: 2, kind: input, shape index: {}]   ;;  %s6886_s3 = inlined_call_operand.vmem [shape: f32[1,64], index: 3, kind: input, shape index: {}]   ;;  %s6887_s4 = inlined_call_operand.vmem [shape: f32[1,64], index: 4, kind: input, shape index: {}]   ;;  %s6888_s5 = inlined_call_operand.vmem [shape: bf16[576,64], index: 5, kind: input, shape index: {}]   ;;  %s6889_s6 = inlined_call_operand.vmem [shape: bf16[9,64,64], index: 6, kind: input, shape index: {}]   ;;  %s6890_s7 = inlined_call_operand.vmem [shape: f32[1,64], index: 7, kind: input, shape index: {}]   ;;  %s6891_s8 = inlined_call_operand.vmem [shape: f32[1,64], index: 8, kind: input, shape index: {}]   ;;  %s6892_s9 = inlined_call_operand.vmem [shape: f32[1,64], index: 9, kind: input, shape index: {}]   ;;  %s6893_s10 = inlined_call_operand.hbm [shape: f32[128,64], index: 10, kind: output, shape index: {}]  }
   0x1   :  { %17 = vsyncpa [#allocation3 + $0x1], 0  ;;  %s5443_s13 = smov 0   ;;  %s5445_s14 = smov 0  }
   0x2   :  { %s5447_s15 = smov 0   ;;  %s5449_s16 = smov 0  }
   0x3 LB: > { %s5464_s17 = sadd.s32 4294967295, %s5384_s16   ;;  %s3914_s18 = sadd.s32 4294967294, %s5384_s16   ;;  %s5384_s16 = sphi %s5449_s16, %s6947_s16   ;;  %s5380_s15 = sphi %s5447_s15, %s6946_s15   ;;  %s5376_s14 = sphi %s5445_s14, %s6945_s14   ;;  %s5372_s13 = sphi %s5443_s13, %s6944_s13  }
   0x4   : > { %s5468_s19 = sadd.s32 1, %s5384_s16   ;;  %s245_s20 = sadd.s32 1, %s5380_s15 }
   0x5   : > { %s242_s21 = ssub.s32 %s5384_s16, %s5468_s19  ;;  %p255_p0 = scmp.ne.s32.totalorder %s5380_s15, %s5376_s14 }
   0x6   : > { %p243_p1 = scmp.eq.s32.totalorder %s242_s21, 0  ;;  %p256_p2 = scmp.eq.s32.totalorder %s5464_s17, 1 }
   0x7   : > { %p261_p3 = scmp.ne.s32.totalorder %s5376_s14, %s5372_s13  ;;  %p262_p4 = scmp.eq.s32.totalorder %s3914_s18, 1 }
   0x8   : > { %s5479_s22 = scalar_select %p243_p1, %s5380_s15, %s245_s20  }
   0x9   : > { %p5481_p5 = por %p256_p2, %p255_p0  ;;  %p5485_p6 = por %p262_p4, %p261_p3 }
   0xa   : > { %6894 = sst [smem:[#allocation5_spill]] %s5479_s22  ;;  %p3917_p7 = scmp.ge.s32.totalorder %s5384_s16, 1 }
   0xb   : > { %p317_p8 = scmp.lt.s32.totalorder %s5384_s16, 3 }
   0xd   : > { %p318_p9 = pnand %p3917_p7, %p317_p8 }
   0xf   : > { %321 = sbr.rel (%p318_p9) target bundleno = 1653 (0x675), region = 60 }
  0x14   : > { %v5133_v0 = vld [vmem:[%s6884_s1 + $0x38] sm:$0xff]  ;;  %v5132_v3 = vld [vmem:[%s6884_s1 + $0x30] sm:$0xff]  ;;  %v5131_v6 = vld [vmem:[%s6884_s1 + $0x28] sm:$0xff]  ;;  %s3919_s12 = sshll.u32 %s5464_s17, 5  ;;  %vm1457_vm0 = vcmask 261120   ;;  %vm2513_vm1 = vcmask 523264  }
  0x15   : > { %v5149_v1 = vld [vmem:[%s6884_s1 + $0xb8] sm:$0xff]  ;;  %1506 = vmatpush.bf16.msra.mxu0 %v5133_v0  ;;  %v5148_v4 = vld [vmem:[%s6884_s1 + $0xb0] sm:$0xff]  ;;  %v5147_v7 = vld [vmem:[%s6884_s1 + $0xa8] sm:$0xff]  ;;  %p357_p10 = scmp.lt.s32.totalorder %s3919_s12, 63  ;;  %s353_s30 = sand.u32 1, %s5376_s14  }
  0x16   : > { %v5141_v2 = vld [vmem:[%s6884_s1 + $0x78] sm:$0xff]  ;;  %1684 = vmatpush.bf16.msra.mxu2 %v5149_v1  ;;  %v5140_v5 = vld [vmem:[%s6884_s1 + $0x70] sm:$0xff]  ;;  %v5139_v8 = vld [vmem:[%s6884_s1 + $0x68] sm:$0xff]  ;;  %s5248_s25 = sshll.u32 %s5464_s17, 6  ;;  %s3837_s17 = scalar_lea.sflag [#allocation3], %s353_s30 }
  0x17   : > { %1595 = vmatpush.bf16.msra.mxu1 %v5141_v2  ;;  %v5130_v9 = vld [vmem:[%s6884_s1 + $0x20] sm:$0xff]  ;;  %v5129_v12 = vld [vmem:[%s6884_s1 + $0x18] sm:$0xff]  ;;  %s6949_s12 = smov (!%p357_p10, %s3919_s12), 63  ;;  %v5128_v15 = vld [vmem:[%s6884_s1 + $0x10] sm:$0xff] }
  0x18   : > { %v5146_v10 = vld [vmem:[%s6884_s1 + $0xa0] sm:$0xff]  ;;  %v5145_v13 = vld [vmem:[%s6884_s1 + $0x98] sm:$0xff]  ;;  %v5144_v16 = vld [vmem:[%s6884_s1 + $0x90] sm:$0xff]  ;;  %s5273_s28 = smul.u32 28, %s6949_s12 }
  0x19   : > { %1507 = vmatpush.bf16.msra.mxu0 %v5132_v3  ;;  %v5138_v11 = vld [vmem:[%s6884_s1 + $0x60] sm:$0xff]  ;;  %v5137_v14 = vld [vmem:[%s6884_s1 + $0x58] sm:$0xff]  ;;  %v5136_v17 = vld [vmem:[%s6884_s1 + $0x50] sm:$0xff] }
  0x1a   : > { %1685 = vmatpush.bf16.msra.mxu2 %v5148_v4  ;;  %v5127_v18 = vld [vmem:[%s6884_s1 + $0x8] sm:$0xff]  ;;  %s5555_s26 = scalar_lea.vmem %s6883_s0, %s5273_s28  ;;  %v5126_v21 = vld [vmem:[%s6884_s1] sm:$0xff]  ;;  %v5157_v51 = vld [vmem:[%s6884_s1 + $0xf8] sm:$0xff]  ;;  %s3918_s28 = sshll.u32 %s353_s30, 6 }
  0x1b   : > { %1596 = vmatpush.bf16.msra.mxu1 %v5140_v5  ;;  %v5143_v19 = vld [vmem:[%s6884_s1 + $0x88] sm:$0xff]  ;;  %v5142_v22 = vld [vmem:[%s6884_s1 + $0x80] sm:$0xff]  ;;  %v5017_v24 = vld [vmem:[%s5555_s26 + $0x18] sm:$0xf0]  ;;  %5250 = vmatpush.bf16.msra.mxu3 %v5157_v51  ;;  %s6791_s21 = scalar_lea.vmem [#allocation2], %s3918_s28 }
  0x1c   : > { %v5135_v20 = vld [vmem:[%s6884_s1 + $0x48] sm:$0xff]  ;;  %v3923_v23 = vld [vmem:[%s5555_s26] sm:$0xf]  ;;  %v5018_v26 = vld [vmem:[%s5555_s26 + $0x20] sm:$0xf0]  ;;  %s3849_s29 = sshll.u32 %s6791_s21, 4  ;;  %s3850_s29 = int_to_ptr.vmem [resolvable:$true] %s3849_s29 }
  0x1d   : > { %1508 = vmatpush.bf16.msra.mxu0 %v5131_v6  ;;  %v3931_v25 = vld [vmem:[%s5555_s26 + $0x8] sm:$0xf]  ;;  %v5134_v27 = vld [vmem:[%s6884_s1 + $0x40] sm:$0xff]  ;;  %v3924_v30 = vor.u32 %v5017_v24, %v3923_v23  ;;  %v3951_v33 = vld [vmem:[%s5555_s26 + $0x38] sm:$0xf] }
  0x1e   : > { %1686 = vmatpush.bf16.msra.mxu2 %v5147_v7  ;;  %v5014_v28 = vld [vmem:[%s5555_s26 + $0x4] sm:$0xf]  ;;  %v3925_v29 = vld [vmem:[%s5555_s26 + $0x1c] sm:$0xf0]  ;;  %v3932_v31 = vor.u32 %v5018_v26, %v3931_v25  ;;  %v5024_v34 = vld [vmem:[%s5555_s26 + $0x50] sm:$0xf0] }
  0x1f   : > { %1597 = vmatpush.bf16.msra.mxu1 %v5139_v8  ;;  %v3928_v32 = vor.u32 %v5014_v28, %v3925_v29  ;;  %v3959_v35 = vld [vmem:[%s5555_s26 + $0x40] sm:$0xf]  ;;  %v5025_v36 = vld [vmem:[%s5555_s26 + $0x58] sm:$0xf0]  ;;  %v3953_v38 = vld [vmem:[%s5555_s26 + $0x54] sm:$0xf0]  ;;  %v3952_v39 = vor.u32 %v5024_v34, %v3951_v33 }
  0x20   : > { %v5021_v37 = vld [vmem:[%s5555_s26 + $0x3c] sm:$0xf]  ;;  %v3960_v40 = vor.u32 %v5025_v36, %v3959_v35  ;;  %v3979_v42 = vld [vmem:[%s5555_s26 + $0x70] sm:$0xf]  ;;  %v5031_v43 = vld [vmem:[%s5555_s26 + $0x88] sm:$0xf0] }
  0x21   : > { %1509 = vmatpush.bf16.msra.mxu0 %v5130_v9  ;;  %v3956_v41 = vor.u32 %v5021_v37, %v3953_v38  ;;  %v3987_v44 = vld [vmem:[%s5555_s26 + $0x78] sm:$0xf]  ;;  %v5032_v45 = vld [vmem:[%s5555_s26 + $0x90] sm:$0xf0]  ;;  %v3981_v47 = vld [vmem:[%s5555_s26 + $0x8c] sm:$0xf0]  ;;  %v3980_v48 = vor.u32 %v5031_v43, %v3979_v42 }
  0x22   : > { %1687 = vmatpush.bf16.msra.mxu2 %v5146_v10  ;;  %v5028_v46 = vld [vmem:[%s5555_s26 + $0x74] sm:$0xf]  ;;  %v3988_v49 = vor.u32 %v5032_v45, %v3987_v44  ;;  %v5155_v53 = vld [vmem:[%s6884_s1 + $0xe8] sm:$0xff]  ;;  %v5038_v55 = vld [vmem:[%s5555_s26 + $0xc0] sm:$0xf0] }
  0x23   : > { %1598 = vmatpush.bf16.msra.mxu1 %v5138_v11  ;;  %v3984_v50 = vor.u32 %v5028_v46, %v3981_v47  ;;  %v5156_v52 = vld [vmem:[%s6884_s1 + $0xf0] sm:$0xff]  ;;  %v4007_v54 = vld [vmem:[%s5555_s26 + $0xa8] sm:$0xf]  ;;  %v5039_v57 = vld [vmem:[%s5555_s26 + $0xc8] sm:$0xf0] }
  0x24   : > { %5252 = vmatpush.bf16.msra.mxu3 %v5156_v52  ;;  %v4015_v56 = vld [vmem:[%s5555_s26 + $0xb0] sm:$0xf]  ;;  %v5035_v58 = vld [vmem:[%s5555_s26 + $0xac] sm:$0xf]  ;;  %v4009_v59 = vld [vmem:[%s5555_s26 + $0xc4] sm:$0xf0]  ;;  %v4008_v61 = vor.u32 %v5038_v55, %v4007_v54 }
  0x25   : > { %1510 = vmatpush.bf16.msra.mxu0 %v5129_v12  ;;  %v5154_v60 = vld [vmem:[%s6884_s1 + $0xe0] sm:$0xff]  ;;  %v4016_v62 = vor.u32 %v5039_v57, %v4015_v56  ;;  %v4012_v63 = vor.u32 %v5035_v58, %v4009_v59  ;;  %v5153_v0 = vld [vmem:[%s6884_s1 + $0xd8] sm:$0xff]  ;;  %v5152_v1 = vld [vmem:[%s6884_s1 + $0xd0] sm:$0xff] }
  0x26   : > { %1688 = vmatpush.bf16.msra.mxu2 %v5145_v13  ;;  %v5151_v2 = vld [vmem:[%s6884_s1 + $0xc8] sm:$0xff]  ;;  %v4035_v3 = vld [vmem:[%s5555_s26 + $0xe0] sm:$0xf]  ;;  %v5045_v4 = vld [vmem:[%s5555_s26 + $0xf8] sm:$0xf0] }
  0x27   : > { %1599 = vmatpush.bf16.msra.mxu1 %v5137_v14  ;;  %v4043_v5 = vld [vmem:[%s5555_s26 + $0xe8] sm:$0xf]  ;;  %v5046_v6 = vld [vmem:[%s5555_s26 + $0x100] sm:$0xf0]  ;;  %v4037_v8 = vld [vmem:[%s5555_s26 + $0xfc] sm:$0xf0]  ;;  %v4036_v10 = vor.u32 %v5045_v4, %v4035_v3 }
  0x28   : > { %5254 = vmatpush.bf16.msra.mxu3 %v5155_v53  ;;  %v5042_v7 = vld [vmem:[%s5555_s26 + $0xe4] sm:$0xf]  ;;  %v4044_v11 = vor.u32 %v5046_v6, %v4043_v5  ;;  %v5057_v13 = vld [vmem:[%s5555_s26 + $0x15c] sm:$0xf]  ;;  %v4101_v14 = vld [vmem:[%s5555_s26 + $0x174] sm:$0xf0] }
  0x29   : > { %1511 = vmatpush.bf16.msra.mxu0 %v5128_v15  ;;  %v5150_v9 = vld [vmem:[%s6884_s1 + $0xc0] sm:$0xff]  ;;  %v4040_v12 = vor.u32 %v5042_v7, %v4037_v8  ;;  %v4104_v15 = vor.u32 %v5057_v13, %v4101_v14  ;;  %v5064_v25 = vld [vmem:[%s5555_s26 + $0x194] sm:$0xf]  ;;  %v4129_v26 = vld [vmem:[%s5555_s26 + $0x1ac] sm:$0xf0] }
  0x2a   : > { %1689 = vmatpush.bf16.msra.mxu2 %v5144_v16  ;;  %v4063_v16 = vld [vmem:[%s5555_s26 + $0x118] sm:$0xf]  ;;  %v4091_v28 = vld [vmem:[%s5555_s26 + $0x150] sm:$0xf]  ;;  %v5059_v29 = vld [vmem:[%s5555_s26 + $0x168] sm:$0xf0] }
  0x2b   : > { %1600 = vmatpush.bf16.msra.mxu1 %v5136_v17  ;;  %v5052_v17 = vld [vmem:[%s5555_s26 + $0x130] sm:$0xf0]  ;;  %v4093_v33 = vld [vmem:[%s5555_s26 + $0x16c] sm:$0xf0]  ;;  %v4092_v34 = vor.u32 %v5059_v29, %v4091_v28  ;;  %v5071_v37 = vld [vmem:[%s5555_s26 + $0x1cc] sm:$0xf] }
  0x2c   : > { %5256 = vmatpush.bf16.msra.mxu3 %v5154_v60  ;;  %v4157_v38 = vld [vmem:[%s5555_s26 + $0x1e4] sm:$0xf0]  ;;  %v4127_v42 = vld [vmem:[%s5555_s26 + $0x190] sm:$0xf]  ;;  %v5067_v43 = vld [vmem:[%s5555_s26 + $0x1a8] sm:$0xf0] }
  0x2d   : > { %1512 = vmatpush.bf16.msra.mxu0 %v5127_v18  ;;  %v4071_v18 = vld [vmem:[%s5555_s26 + $0x120] sm:$0xf]  ;;  %v5063_v44 = vld [vmem:[%s5555_s26 + $0x18c] sm:$0xf]  ;;  %v4121_v45 = vld [vmem:[%s5555_s26 + $0x1a4] sm:$0xf0]  ;;  %v4128_v47 = vor.u32 %v5067_v43, %v4127_v42 }
  0x2e   : > { %1690 = vmatpush.bf16.msra.mxu2 %v5143_v19  ;;  %v5053_v19 = vld [vmem:[%s5555_s26 + $0x138] sm:$0xf0]  ;;  %v4155_v54 = vld [vmem:[%s5555_s26 + $0x1c8] sm:$0xf]  ;;  %v5074_v55 = vld [vmem:[%s5555_s26 + $0x1e0] sm:$0xf0] }
  0x2f   : > { %1601 = vmatpush.bf16.msra.mxu1 %v5135_v20  ;;  %v5049_v20 = vld [vmem:[%s5555_s26 + $0x11c] sm:$0xf]  ;;  %v4072_v23 = vor.u32 %v5053_v19, %v4071_v18  ;;  %v5656_v56 = vld [vmem:[%s6885_s2] ss:$0 sm:$0xff]  ;;  %v5070_v57 = vld [vmem:[%s5555_s26 + $0x1c4] sm:$0xf] }
  0x30   : > { %5258 = vmatpush.bf16.msra.mxu3 %v5153_v0  ;;  %v4149_v58 = vld [vmem:[%s5555_s26 + $0x1dc] sm:$0xf0]  ;;  %v4213_v3 = vld [vmem:[%s5555_s26 + $0x254] sm:$0xf0]  ;;  %v5081_v14 = vld [vmem:[%s5555_s26 + $0x218] sm:$0xf0] }
  0x31   : > { %1513 = vmatpush.bf16.msra.mxu0 %v5126_v21  ;;  %v4065_v21 = vld [vmem:[%s5555_s26 + $0x134] sm:$0xf0]  ;;  %v4183_v13 = vld [vmem:[%s5555_s26 + $0x200] sm:$0xf] }
  0x32   : > { %1691 = vmatpush.bf16.msra.mxu2 %v5142_v22  ;;  %v4064_v22 = vor.u32 %v5052_v17, %v4063_v16  ;;  %v4068_v24 = vor.u32 %v5049_v20, %v4065_v21  ;;  %v4177_v16 = vld [vmem:[%s5555_s26 + $0x214] sm:$0xf0]  ;;  %v4184_v20 = vor.u32 %v5081_v14, %v4183_v13  ;;  %v4297_v13 = vld [vmem:[%s5555_s26 + $0x2fc] sm:$0xf0] }
  0x33   : > { %1602 = vmatpush.bf16.msra.mxu1 %v5134_v27  ;;  %v4132_v27 = vor.u32 %v5064_v25, %v4129_v26  ;;  %v5092_v25 = vld [vmem:[%s5555_s26 + $0x274] sm:$0xf] }
  0x34   : > { %1514 = vmatmul.bf16.vlgmr.msra.gmra.mxu0 %v3924_v30  ;;  %5260 = vmatpush.bf16.msra.mxu3 %v5152_v1  ;;  %v4099_v30 = vld [vmem:[%s5555_s26 + $0x158] sm:$0xf] }
  0x35   : > { %1692 = vmatmul.bf16.vlgmr.msra.gmra.mxu2 %v3932_v31  ;;  %1773 = vmatpush.bf16.msrb.mxu0 %v5157_v51  ;;  %v5060_v31 = vld [vmem:[%s5555_s26 + $0x170] sm:$0xf0] }
  0x36   : > { %1603 = vmatmul.bf16.vlgmr.msra.gmra.mxu1 %v3928_v32  ;;  %5249 = vmatpush.bf16.msrb.mxu2 %v5157_v51  ;;  %v5056_v32 = vld [vmem:[%s5555_s26 + $0x154] sm:$0xf]  ;;  %v4100_v35 = vor.u32 %v5060_v31, %v4099_v30 }
  0x37   : > { %v4096_v36 = vor.u32 %v5056_v32, %v4093_v33 }
  0x38   : > { %5262 = vmatpush.bf16.msra.mxu3 %v5151_v2 }
  0x39   : > { %1774 = vmatpush.bf16.msrb.mxu0 %v5156_v52 }
  0x3a   : > { %5251 = vmatpush.bf16.msrb.mxu2 %v5156_v52  ;;  %v4147_v52 = vld [vmem:[%s5555_s26 + $0x1c0] sm:$0xf] }
  0x3c   : > { %5264 = vmatpush.bf16.msra.mxu3 %v5150_v9 }
  0x3d   : > { %1775 = vmatpush.bf16.msrb.mxu0 %v5155_v53 }
  0x3e   : > { %5253 = vmatpush.bf16.msrb.mxu2 %v5155_v53  ;;  %v5073_v53 = vld [vmem:[%s5555_s26 + $0x1d8] sm:$0xf0] }
  0x3f   : > { %1811 = vmatmul.bf16.vlgmr.msra.gmra.mxu3 %v4104_v15  ;;  %v4148_v59 = vor.u32 %v5073_v53, %v4147_v52  ;;  %v5077_v15 = vld [vmem:[%s5555_s26 + $0x1fc] sm:$0xf] }
  0x41   : > { %1776 = vmatpush.bf16.msrb.mxu0 %v5154_v60 }
  0x42   : > { %5255 = vmatpush.bf16.msrb.mxu2 %v5154_v60  ;;  %v4156_v60 = vor.u32 %v5074_v55, %v4155_v54 }
  0x44   : > { %1519 = vmatmul.bf16.gmra.mxu0 %v3952_v39  ;;  %v4160_v39 = vor.u32 %v5071_v37, %v4157_v38  ;;  %v4211_v37 = vld [vmem:[%s5555_s26 + $0x238] sm:$0xf]  ;;  %v5088_v38 = vld [vmem:[%s5555_s26 + $0x250] sm:$0xf0] }
  0x45   : > { %1697 = vmatmul.bf16.gmra.mxu2 %v3960_v40  ;;  %1777 = vmatpush.bf16.msrb.mxu0 %v5153_v0  ;;  %v4119_v40 = vld [vmem:[%s5555_s26 + $0x188] sm:$0xf] }
  0x46   : > { %1608 = vmatmul.bf16.gmra.mxu1 %v3956_v41  ;;  %5257 = vmatpush.bf16.msrb.mxu2 %v5153_v0  ;;  %v5066_v41 = vld [vmem:[%s5555_s26 + $0x1a0] sm:$0xf0] }
  0x47   : > { %v4120_v46 = vor.u32 %v5066_v41, %v4119_v40  ;;  %v4205_v40 = vld [vmem:[%s5555_s26 + $0x24c] sm:$0xf0] }
  0x49   : > { %1778 = vmatpush.bf16.msrb.mxu0 %v5152_v1 }
  0x4a   : > { %5259 = vmatpush.bf16.msrb.mxu2 %v5152_v1  ;;  %v5085_v1 = vld [vmem:[%s5555_s26 + $0x23c] sm:$0xf] }
  0x4b   : > { %v4216_v4 = vor.u32 %v5085_v1, %v4213_v3  ;;  %v4233_v1 = vld [vmem:[%s5555_s26 + $0x284] sm:$0xf0] }
  0x4d   : > { %1779 = vmatpush.bf16.msrb.mxu0 %v5151_v2 }
  0x4e   : > { %5261 = vmatpush.bf16.msrb.mxu2 %v5151_v2 }
  0x4f   : > { %1816 = vmatmul.bf16.gmra.mxu3 %v4132_v27  ;;  %v4241_v27 = vld [vmem:[%s5555_s26 + $0x28c] sm:$0xf0] }
  0x50   : > { %v4244_v28 = vor.u32 %v5092_v25, %v4241_v27  ;;  %v5102_v25 = vld [vmem:[%s5555_s26 + $0x2c0] sm:$0xf0]  ;;  %v4261_v27 = vld [vmem:[%s5555_s26 + $0x2bc] sm:$0xf0] }
  0x51   : > { %1780 = vmatpush.bf16.msrb.mxu0 %v5150_v9 }
  0x52   : > { %5263 = vmatpush.bf16.msrb.mxu2 %v5150_v9 }
  0x54   : > { %1524 = vmatmul.bf16.gmra.mxu0 %v3980_v48  ;;  %v4124_v48 = vor.u32 %v5063_v44, %v4121_v45  ;;  %v4212_v44 = vor.u32 %v5088_v38, %v4211_v37  ;;  %v5113_v37 = vld [vmem:[%s5555_s26 + $0x31c] sm:$0xf] }
  0x55   : > { %1702 = vmatmul.bf16.gmra.mxu2 %v3988_v49  ;;  %v5078_v49 = vld [vmem:[%s5555_s26 + $0x204] sm:$0xf] }
  0x56   : > { %1613 = vmatmul.bf16.gmra.mxu1 %v3984_v50  ;;  %v4185_v50 = vld [vmem:[%s5555_s26 + $0x21c] sm:$0xf0] }
  0x57   : > { %v4188_v51 = vor.u32 %v5078_v49, %v4185_v50  ;;  %v5099_v49 = vld [vmem:[%s5555_s26 + $0x2ac] sm:$0xf] }
  0x5f   : > { %1821 = vmatmul.bf16.gmra.mxu3 %v4160_v39  ;;  %v5084_v39 = vld [vmem:[%s5555_s26 + $0x234] sm:$0xf] }
  0x64   : > { %1529 = vmatmul.bf16.gmra.mxu0 %v4008_v61 }
  0x65   : > { %1707 = vmatmul.bf16.gmra.mxu2 %v4016_v62  ;;  %v4152_v62 = vor.u32 %v5070_v57, %v4149_v58 }
  0x66   : > { %1618 = vmatmul.bf16.gmra.mxu1 %v4012_v63 }
  0x6f   : > { %1826 = vmatmul.bf16.gmra.mxu3 %v4188_v51  ;;  %v4269_v51 = vld [vmem:[%s5555_s26 + $0x2c4] sm:$0xf0] }
  0x70   : > { %v4272_v52 = vor.u32 %v5099_v49, %v4269_v51  ;;  %v5108_v49 = vld [vmem:[%s5555_s26 + $0x2f0] sm:$0xf0]  ;;  %v5109_v51 = vld [vmem:[%s5555_s26 + $0x2f8] sm:$0xf0] }
  0x74   : > { %1534 = vmatmul.bf16.gmra.mxu0 %v4036_v10 }
  0x75   : > { %1712 = vmatmul.bf16.gmra.mxu2 %v4044_v11  ;;  %v4175_v11 = vld [vmem:[%s5555_s26 + $0x1f8] sm:$0xf] }
  0x76   : > { %1623 = vmatmul.bf16.gmra.mxu1 %v4040_v12  ;;  %v5080_v12 = vld [vmem:[%s5555_s26 + $0x210] sm:$0xf0] }
  0x77   : > { %v4176_v19 = vor.u32 %v5080_v12, %v4175_v11  ;;  %v5106_v11 = vld [vmem:[%s5555_s26 + $0x2e4] sm:$0xf] }
  0x78   : > { %v4300_v14 = vor.u32 %v5106_v11, %v4297_v13  ;;  %v4315_v13 = vld [vmem:[%s5555_s26 + $0x310] sm:$0xf] }
  0x7f   : > { %1831 = vmatmul.bf16.gmra.mxu3 %v4216_v4 }
  0x84   : > { %1539 = vmatmul.bf16.gmra.mxu0 %v4064_v22  ;;  %v4180_v22 = vor.u32 %v5077_v15, %v4177_v16 }
  0x85   : > { %1717 = vmatmul.bf16.gmra.mxu2 %v4072_v23 }
  0x86   : > { %1628 = vmatmul.bf16.gmra.mxu1 %v4068_v24 }
  0x8f   : > { %1836 = vmatmul.bf16.gmra.mxu3 %v4244_v28 }
  0x94   : > { %1544 = vmatmul.bf16.gmra.mxu0 %v4092_v34 }
  0x95   : > { %1722 = vmatmul.bf16.gmra.mxu2 %v4100_v35  ;;  %v4203_v35 = vld [vmem:[%s5555_s26 + $0x230] sm:$0xf] }
  0x96   : > { %1633 = vmatmul.bf16.gmra.mxu1 %v4096_v36  ;;  %v5087_v36 = vld [vmem:[%s5555_s26 + $0x248] sm:$0xf0] }
  0x97   : > { %v4204_v43 = vor.u32 %v5087_v36, %v4203_v35 }
  0x9f   : > { %1841 = vmatmul.bf16.gmra.mxu3 %v4272_v52 }
  0xa4   : > { %1549 = vmatmul.bf16.gmra.mxu0 %v4120_v46  ;;  %v4208_v46 = vor.u32 %v5084_v39, %v4205_v40  ;;  %v4325_v39 = vld [vmem:[%s5555_s26 + $0x334] sm:$0xf0] }
  0xa5   : > { %1727 = vmatmul.bf16.gmra.mxu2 %v4128_v47  ;;  %v4328_v40 = vor.u32 %v5113_v37, %v4325_v39  ;;  %v5122_v39 = vld [vmem:[%s5555_s26 + $0x360] sm:$0xf0] }
  0xa6   : > { %1638 = vmatmul.bf16.gmra.mxu1 %v4124_v48 }
  0xaf   : > { %1846 = vmatmul.bf16.gmra.mxu3 %v4300_v14  ;;  %v5115_v14 = vld [vmem:[%s5555_s26 + $0x328] sm:$0xf0] }
  0xb1   : > { %v1515_v61 = vpop.f32.mrf.mxu0 }
  0xb2   : > { %v1516_v63 = vadd.f32 %v5656_v56, %v1515_v61  ;;  %v5094_v61 = vld [vmem:[%s5555_s26 + $0x280] sm:$0xf0] }
  0xb3   : > { %v1604_v0 = vpop.f32.mrf.mxu1 }
  0xb4   : > { %v1605_v2 = vadd.f32 %v1604_v0, %v1516_v63  ;;  %1554 = vmatmul.bf16.gmra.mxu0 %v4148_v59  ;;  %v5095_v63 = vld [vmem:[%s5555_s26 + $0x288] sm:$0xf0] }
  0xb5   : > { %1732 = vmatmul.bf16.gmra.mxu2 %v4156_v60  ;;  %v4231_v60 = vld [vmem:[%s5555_s26 + $0x268] sm:$0xf]  ;;  %v5091_v0 = vld [vmem:[%s5555_s26 + $0x26c] sm:$0xf] }
  0xb6   : > { %1643 = vmatmul.bf16.gmra.mxu1 %v4152_v62  ;;  %v4239_v62 = vld [vmem:[%s5555_s26 + $0x270] sm:$0xf]  ;;  %v4232_v4 = vor.u32 %v5094_v61, %v4231_v60 }
  0xb8   : > { %v1693_v5 = vpop.f32.mrf.mxu2 }
  0xb9   : > { %v5663_v6 = vadd.f32 %v1693_v5, %v1605_v2  ;;  %v1517_v7 = vpop.f32.mrf.mxu0  ;;  %v4240_v5 = vor.u32 %v5095_v63, %v4239_v62 }
  0xba   : > { %v1518_v8 = vadd.f32 %v5656_v56, %v1517_v7 }
  0xbb   : > { %v1606_v9 = vpop.f32.mrf.mxu1 }
  0xbc   : > { %v1607_v10 = vadd.f32 %v1606_v9, %v1518_v8  ;;  %v4236_v8 = vor.u32 %v5091_v0, %v4233_v1 }
  0xbf   : > { %1851 = vmatmul.bf16.gmra.mxu3 %v4328_v40  ;;  %v4351_v40 = vld [vmem:[%s5555_s26 + $0x350] sm:$0xf] }
  0xc0   : > { %v1695_v17 = vpop.f32.mrf.mxu2 }
  0xc1   : > { %v5672_v18 = vadd.f32 %v1695_v17, %v1607_v10  ;;  %v1520_v21 = vpop.f32.mrf.mxu0 }
  0xc2   : > { %v1521_v23 = vadd.f32 %v5656_v56, %v1520_v21 }
  0xc3   : > { %v1609_v24 = vpop.f32.mrf.mxu1 }
  0xc4   : > { %v1610_v26 = vadd.f32 %v1609_v24, %v1521_v23  ;;  %1559 = vmatmul.bf16.gmra.mxu0 %v4176_v19  ;;  %v5101_v23 = vld [vmem:[%s5555_s26 + $0x2b8] sm:$0xf0]  ;;  %v4267_v24 = vld [vmem:[%s5555_s26 + $0x2a8] sm:$0xf] }
  0xc5   : > { %1737 = vmatmul.bf16.gmra.mxu2 %v4184_v20 }
  0xc6   : > { %1648 = vmatmul.bf16.gmra.mxu1 %v4180_v22  ;;  %v4259_v22 = vld [vmem:[%s5555_s26 + $0x2a0] sm:$0xf] }
  0xc8   : > { %v1698_v29 = vpop.f32.mrf.mxu2 }
  0xc9   : > { %v5677_v30 = vadd.f32 %v1698_v29, %v1610_v26  ;;  %v1522_v31 = vpop.f32.mrf.mxu0  ;;  %v5098_v26 = vld [vmem:[%s5555_s26 + $0x2a4] sm:$0xf] }
  0xca   : > { %v1523_v32 = vadd.f32 %v5656_v56, %v1522_v31  ;;  %v4260_v31 = vor.u32 %v5101_v23, %v4259_v22  ;;  %v4316_v22 = vor.u32 %v5115_v14, %v4315_v13 }
  0xcb   : > { %v1611_v33 = vpop.f32.mrf.mxu1 }
  0xcc   : > { %v1612_v34 = vadd.f32 %v1611_v33, %v1523_v32  ;;  %v4268_v32 = vor.u32 %v5102_v25, %v4267_v24 }
  0xd0   : > { %v1700_v41 = vpop.f32.mrf.mxu2 }
  0xd1   : > { %v5686_v42 = vadd.f32 %v1700_v41, %v1612_v34  ;;  %v1525_v45 = vpop.f32.mrf.mxu0  ;;  %v4264_v34 = vor.u32 %v5098_v26, %v4261_v27 }
  0xd2   : > { %v1526_v47 = vadd.f32 %v5656_v56, %v1525_v45 }
  0xd3   : > { %v1614_v48 = vpop.f32.mrf.mxu1 }
  0xd4   : > { %v1615_v50 = vadd.f32 %v1614_v48, %v1526_v47  ;;  %1564 = vmatmul.bf16.gmra.mxu0 %v4204_v43  ;;  %v4287_v48 = vld [vmem:[%s5555_s26 + $0x2d8] sm:$0xf] }
  0xd5   : > { %1742 = vmatmul.bf16.gmra.mxu2 %v4212_v44  ;;  %v5173_v44 = vld [vmem:[%s6884_s1 + $0x178] sm:$0xff]  ;;  %v4288_v60 = vor.u32 %v5108_v49, %v4287_v48 }
  0xd6   : > { %1653 = vmatmul.bf16.gmra.mxu1 %v4208_v46 }
  0xd7   : > { %1951 = vmatpush.bf16.msrb.mxu1 %v5173_v44 }
  0xd8   : > { %v1703_v53 = vpop.f32.mrf.mxu2 }
  0xd9   : > { %v5691_v54 = vadd.f32 %v1703_v53, %v1615_v50  ;;  %v1527_v55 = vpop.f32.mrf.mxu0  ;;  %v4295_v50 = vld [vmem:[%s5555_s26 + $0x2e0] sm:$0xf]  ;;  %v5105_v53 = vld [vmem:[%s5555_s26 + $0x2dc] sm:$0xf] }
  0xda   : > { %v1528_v57 = vadd.f32 %v5656_v56, %v1527_v55  ;;  %v4289_v55 = vld [vmem:[%s5555_s26 + $0x2f4] sm:$0xf0]  ;;  %v4296_v61 = vor.u32 %v5109_v51, %v4295_v50 }
  0xdb   : > { %v1616_v58 = vpop.f32.mrf.mxu1  ;;  %v4292_v63 = vor.u32 %v5105_v53, %v4289_v55 }
  0xdc   : > { %v1617_v59 = vadd.f32 %v1616_v58, %v1528_v57  ;;  %v1812_v58 = vpop.f32.mrf.mxu3 }
  0xe0   : > { %v1705_v2 = vpop.f32.mrf.mxu2 }
  0xe1   : > { %v5700_v3 = vadd.f32 %v1705_v2, %v1617_v59  ;;  %v1530_v7 = vpop.f32.mrf.mxu0  ;;  %v5120_v2 = vld [vmem:[%s5555_s26 + $0x354] sm:$0xf] }
  0xe2   : > { %v1531_v9 = vadd.f32 %v5656_v56, %v1530_v7 }
  0xe3   : > { %v1619_v10 = vpop.f32.mrf.mxu1 }
  0xe4   : > { %v1620_v12 = vadd.f32 %v1619_v10, %v1531_v9  ;;  %1569 = vmatmul.bf16.gmra.mxu0 %v4232_v4  ;;  %v5740_v11 = vpop.f32.mrf.mxu3 }
  0xe5   : > { %1747 = vmatmul.bf16.gmra.mxu2 %v4240_v5  ;;  %v4353_v5 = vld [vmem:[%s5555_s26 + $0x36c] sm:$0xf0] }
  0xe6   : > { %1658 = vmatmul.bf16.gmra.mxu1 %v4236_v8  ;;  %v4356_v7 = vor.u32 %v5120_v2, %v4353_v5  ;;  %v5050_v2 = vld [vmem:[%s5555_s26 + $0x124] sm:$0xf] }
  0xe8   : > { %v1708_v15 = vpop.f32.mrf.mxu2  ;;  %1856 = vmatmul.bf16.gmra.mxu3 %v4356_v7 }
  0xe9   : > { %v5705_v16 = vadd.f32 %v1708_v15, %v1620_v12  ;;  %v1532_v17 = vpop.f32.mrf.mxu0  ;;  %v4323_v15 = vld [vmem:[%s5555_s26 + $0x318] sm:$0xf] }
  0xea   : > { %v1533_v19 = vadd.f32 %v5656_v56, %v1532_v17  ;;  %v5116_v17 = vld [vmem:[%s5555_s26 + $0x330] sm:$0xf0] }
  0xeb   : > { %v1621_v20 = vpop.f32.mrf.mxu1  ;;  %v4324_v23 = vor.u32 %v5116_v17, %v4323_v15 }
  0xec   : > { %v1622_v21 = vadd.f32 %v1621_v20, %v1533_v19  ;;  %v5112_v19 = vld [vmem:[%s5555_s26 + $0x314] sm:$0xf]  ;;  %v4317_v20 = vld [vmem:[%s5555_s26 + $0x32c] sm:$0xf0] }
  0xed   : > { %v4320_v25 = vor.u32 %v5112_v19, %v4317_v20 }
  0xf0   : > { %v1710_v28 = vpop.f32.mrf.mxu2 }
  0xf1   : > { %v5714_v29 = vadd.f32 %v1710_v28, %v1622_v21  ;;  %v1535_v33 = vpop.f32.mrf.mxu0  ;;  %v1817_v28 = vpop.f32.mrf.mxu3 }
  0xf2   : > { %v1536_v35 = vadd.f32 %v5656_v56, %v1535_v33 }
  0xf3   : > { %v1624_v36 = vpop.f32.mrf.mxu1 }
  0xf4   : > { %v1625_v38 = vadd.f32 %v1624_v36, %v1536_v35  ;;  %1574 = vmatmul.bf16.gmra.mxu0 %v4260_v31 }
  0xf5   : > { %1752 = vmatmul.bf16.gmra.mxu2 %v4268_v32 }
  0xf6   : > { %1663 = vmatmul.bf16.gmra.mxu1 %v4264_v34  ;;  %v5172_v34 = vld [vmem:[%s6884_s1 + $0x170] sm:$0xff] }
  0xf7   : > { %1952 = vmatpush.bf16.msrb.mxu1 %v5172_v34 }
  0xf8   : > { %v1713_v41 = vpop.f32.mrf.mxu2 }
  0xf9   : > { %v5719_v43 = vadd.f32 %v1713_v41, %v1625_v38  ;;  %v1537_v45 = vpop.f32.mrf.mxu0  ;;  %v4343_v38 = vld [vmem:[%s5555_s26 + $0x348] sm:$0xf]  ;;  %v5123_v41 = vld [vmem:[%s5555_s26 + $0x368] sm:$0xf0]  ;;  %v5766_v44 = vpop.f32.mrf.mxu3 }
  0xfa   : > { %v1538_v46 = vadd.f32 %v5656_v56, %v1537_v45  ;;  %v5119_v45 = vld [vmem:[%s5555_s26 + $0x34c] sm:$0xf]  ;;  %v4344_v48 = vor.u32 %v5122_v39, %v4343_v38  ;;  %v4352_v49 = vor.u32 %v5123_v41, %v4351_v40  ;;  %v5165_v40 = vld [vmem:[%s6884_s1 + $0x138] sm:$0xff] }
  0xfb   : > { %v1626_v47 = vpop.f32.mrf.mxu1  ;;  %1862 = vmatpush.bf16.msra.mxu0 %v5165_v40 }
  0xfc   : > { %v1627_v52 = vadd.f32 %v1626_v47, %v1538_v46  ;;  %v4345_v46 = vld [vmem:[%s5555_s26 + $0x364] sm:$0xf0] }
  0xfd   : > { %v4348_v51 = vor.u32 %v5119_v45, %v4345_v46 }
 0x100   : > { %v1715_v57 = vpop.f32.mrf.mxu2 }
 0x101   : > { %v5731_v59 = vadd.f32 %v1715_v57, %v1627_v52  ;;  %v1540_v62 = vpop.f32.mrf.mxu0 }
 0x102   : > { %v1541_v0 = vadd.f32 %v5656_v56, %v1540_v62 }
 0x103   : > { %v1629_v1 = vpop.f32.mrf.mxu1 }
 0x104   : > { %v1630_v4 = vadd.f32 %v1629_v1, %v1541_v0  ;;  %1579 = vmatmul.bf16.gmra.mxu0 %v4288_v60  ;;  %v5015_v0 = vld [vmem:[%s5555_s26 + $0xc] sm:$0xf]  ;;  %v3933_v1 = vld [vmem:[%s5555_s26 + $0x24] sm:$0xf0] }
 0x105   : > { %1757 = vmatmul.bf16.gmra.mxu2 %v4296_v61  ;;  %v3936_v7 = vor.u32 %v5015_v0, %v3933_v1 }
 0x106   : > { %1668 = vmatmul.bf16.gmra.mxu1 %v4292_v63 }
 0x108   : > { %v1718_v8 = vpop.f32.mrf.mxu2 }
 0x109   : > { %v5736_v9 = vadd.f32 %v1718_v8, %v1630_v4  ;;  %v5738_v10 = vpop.f32.mrf.mxu0  ;;  %v4073_v4 = vld [vmem:[%s5555_s26 + $0x13c] sm:$0xf0] }
 0x10a   : > { %v4076_v8 = vor.u32 %v5050_v2, %v4073_v4  ;;  %v5162_v2 = vld [vmem:[%s6884_s1 + $0x120] sm:$0xff] }
 0x10b   : > { %v5742_v12 = vpop.f32.mrf.mxu1 }
 0x110   : > { %v5750_v21 = vpop.f32.mrf.mxu2 }
 0x111   : > { %v1545_v24 = vpop.f32.mrf.mxu0 }
 0x112   : > { %v1546_v26 = vadd.f32 %v5656_v56, %v1545_v24 }
 0x113   : > { %v1634_v27 = vpop.f32.mrf.mxu1 }
 0x114   : > { %v1635_v31 = vadd.f32 %v1634_v27, %v1546_v26  ;;  %1584 = vmatmul.bf16.gmra.mxu0 %v4316_v22 }
 0x115   : > { %1762 = vmatmul.bf16.gmra.mxu2 %v4324_v23  ;;  %v5171_v23 = vld [vmem:[%s6884_s1 + $0x168] sm:$0xff] }
 0x116   : > { %1673 = vmatmul.bf16.gmra.mxu1 %v4320_v25 }
 0x117   : > { %1953 = vmatpush.bf16.msrb.mxu1 %v5171_v23  ;;  %v5174_v23 = vld [vmem:[%s6884_s1 + $0x180] sm:$0xff] }
 0x118   : > { %v1723_v32 = vpop.f32.mrf.mxu2 }
 0x119   : > { %v1724_v33 = vadd.f32 %v1723_v32, %v1635_v31  ;;  %v5756_v35 = vpop.f32.mrf.mxu0  ;;  %v3961_v31 = vld [vmem:[%s5555_s26 + $0x5c] sm:$0xf0] }
 0x11b   : > { %v5758_v36 = vadd.f32 %v1812_v58, %v1724_v33  ;;  %v5760_v37 = vpop.f32.mrf.mxu1  ;;  %v1822_v58 = vpop.f32.mrf.mxu3 }
 0x120   : > { %v5770_v47 = vpop.f32.mrf.mxu2 }
 0x121   : > { %v1550_v50 = vpop.f32.mrf.mxu0 }
 0x122   : > { %v1551_v52 = vadd.f32 %v5656_v56, %v1550_v50 }
 0x123   : > { %v1639_v53 = vpop.f32.mrf.mxu1  ;;  %v5785_v14 = vpop.f32.mrf.mxu3 }
 0x124   : > { %v1640_v55 = vadd.f32 %v1639_v53, %v1551_v52  ;;  %1589 = vmatmul.bf16.gmra.mxu0 %v4344_v48  ;;  %v5164_v48 = vld [vmem:[%s6884_s1 + $0x130] sm:$0xff] }
 0x125   : > { %1767 = vmatmul.bf16.gmra.mxu2 %v4352_v49  ;;  %1863 = vmatpush.bf16.msra.mxu0 %v5164_v48 }
 0x126   : > { %1678 = vmatmul.bf16.gmra.mxu1 %v4348_v51  ;;  %v5170_v51 = vld [vmem:[%s6884_s1 + $0x160] sm:$0xff] }
 0x127   : > { %1954 = vmatpush.bf16.msrb.mxu1 %v5170_v51  ;;  %v5016_v51 = vld [vmem:[%s5555_s26 + $0x14] sm:$0xf] }
 0x128   : > { %v1728_v57 = vpop.f32.mrf.mxu2 }
 0x129   : > { %v1729_v60 = vadd.f32 %v1728_v57, %v1640_v55  ;;  %v5773_v61 = vpop.f32.mrf.mxu0  ;;  %v5163_v55 = vld [vmem:[%s6884_s1 + $0x128] sm:$0xff]  ;;  %v5029_v57 = vld [vmem:[%s5555_s26 + $0x7c] sm:$0xf] }
 0x12a   : > { %1864 = vmatpush.bf16.msra.mxu0 %v5163_v55  ;;  %v3941_v55 = vld [vmem:[%s5555_s26 + $0x2c] sm:$0xf0] }
 0x12b   : > { %v5775_v62 = vadd.f32 %v1817_v28, %v1729_v60  ;;  %v5777_v63 = vpop.f32.mrf.mxu1  ;;  %v1827_v27 = vpop.f32.mrf.mxu3  ;;  %v5022_v28 = vld [vmem:[%s5555_s26 + $0x44] sm:$0xf]  ;;  %v5169_v60 = vld [vmem:[%s6884_s1 + $0x158] sm:$0xff] }
 0x12c   : > { %v3964_v33 = vor.u32 %v5022_v28, %v3961_v31  ;;  %1955 = vmatpush.bf16.msrb.mxu1 %v5169_v60  ;;  %v5160_v28 = vld [vmem:[%s6884_s1 + $0x110] sm:$0xff]  ;;  %v3947_v31 = vld [vmem:[%s5555_s26 + $0x18] sm:$0xf] }
 0x12d   : > { %v4017_v60 = vld [vmem:[%s5555_s26 + $0xcc] sm:$0xf0] }
 0x12e   : > { %1865 = vmatpush.bf16.msra.mxu0 %v5162_v2  ;;  %v5158_v2 = vld [vmem:[%s6884_s1 + $0x100] sm:$0xff] }
 0x130   : > { %v5783_v5 = vpop.f32.mrf.mxu2 }
 0x131   : > { %v1555_v13 = vpop.f32.mrf.mxu0 }
 0x132   : > { %v1556_v15 = vadd.f32 %v5656_v56, %v1555_v13  ;;  %v5175_v13 = vld [vmem:[%s6884_s1 + $0x188] sm:$0xff] }
 0x133   : > { %v1644_v17 = vpop.f32.mrf.mxu1  ;;  %v5805_v45 = vpop.f32.mrf.mxu3  ;;  %2046 = vmatpush.bf16.msra.mxu2 %v5175_v13 }
 0x134   : > { %v1645_v19 = vadd.f32 %v1644_v17, %v1556_v15  ;;  %1781 = vmatmul.bf16.vlgmr.msrb.gmra.mxu0 %v3936_v7 }
 0x135   : > { %1806 = vmatmul.bf16.vlgmr.msrb.gmra.mxu2 %v4076_v8  ;;  %v5168_v8 = vld [vmem:[%s6884_s1 + $0x150] sm:$0xff] }
 0x136   : > { %1956 = vmatpush.bf16.msrb.mxu1 %v5168_v8 }
 0x137   : > { %2047 = vmatpush.bf16.msra.mxu2 %v5174_v23 }
 0x138   : > { %v1733_v20 = vpop.f32.mrf.mxu2 }
 0x139   : > { %v1734_v22 = vadd.f32 %v1733_v20, %v1645_v19  ;;  %v5791_v24 = vpop.f32.mrf.mxu0  ;;  %v5161_v19 = vld [vmem:[%s6884_s1 + $0x118] sm:$0xff] }
 0x13a   : > { %1866 = vmatpush.bf16.msra.mxu0 %v5161_v19 }
 0x13b   : > { %v5793_v25 = vadd.f32 %v1822_v58, %v1734_v22  ;;  %v5795_v26 = vpop.f32.mrf.mxu1  ;;  %v3989_v58 = vld [vmem:[%s5555_s26 + $0x94] sm:$0xf0]  ;;  %v1832_v1 = vpop.f32.mrf.mxu3  ;;  %v5167_v22 = vld [vmem:[%s6884_s1 + $0x148] sm:$0xff] }
 0x13c   : > { %v3992_v4 = vor.u32 %v5029_v57, %v3989_v58  ;;  %1957 = vmatpush.bf16.msrb.mxu1 %v5167_v22  ;;  %v3944_v57 = vor.u32 %v5016_v51, %v3941_v55  ;;  %v5036_v58 = vld [vmem:[%s5555_s26 + $0xb4] sm:$0xf]  ;;  %v5027_v22 = vld [vmem:[%s5555_s26 + $0x68] sm:$0xf0]  ;;  %v4045_v55 = vld [vmem:[%s5555_s26 + $0x104] sm:$0xf0] }
 0x13d   : > { %v5043_v51 = vld [vmem:[%s5555_s26 + $0xec] sm:$0xf] }
 0x13e   : > { %1867 = vmatpush.bf16.msra.mxu0 %v5160_v28 }
 0x140   : > { %v5799_v32 = vpop.f32.mrf.mxu2 }
 0x141   : > { %v1560_v34 = vpop.f32.mrf.mxu0 }
 0x142   : > { %v1561_v38 = vadd.f32 %v5656_v56, %v1560_v34 }
 0x143   : > { %v1649_v39 = vpop.f32.mrf.mxu1  ;;  %v5855_v40 = vpop.f32.mrf.mxu3 }
 0x144   : > { %v1650_v41 = vadd.f32 %v1649_v39, %v1561_v38  ;;  %1786 = vmatmul.bf16.gmra.mxu0 %v3964_v33  ;;  %v5020_v33 = vld [vmem:[%s5555_s26 + $0x30] sm:$0xf0]  ;;  %6897 = vst [vmem:[#allocation6_spill] sm:$0xff] %v5855_v40 }
 0x145   : > { %v3948_v38 = vor.u32 %v5020_v33, %v3947_v31 }
 0x147   : > { %4569 = vmatmul.msk.bf16.vlgmr.msra.gmra.mxu2 %vm1457_vm0, %v3948_v38  ;;  %v3969_v38 = vld [vmem:[%s5555_s26 + $0x64] sm:$0xf0] }
 0x148   : > { %v1738_v46 = vpop.f32.mrf.mxu2 }
 0x149   : > { %v1739_v49 = vadd.f32 %v1738_v46, %v1650_v41  ;;  %v5810_v50 = vpop.f32.mrf.mxu0  ;;  %v5166_v41 = vld [vmem:[%s6884_s1 + $0x140] sm:$0xff] }
 0x14a   : > { %1958 = vmatpush.bf16.msrb.mxu1 %v5166_v41 }
 0x14b   : > { %v5815_v52 = vadd.f32 %v1827_v27, %v1739_v49  ;;  %v5817_v53 = vpop.f32.mrf.mxu1  ;;  %v5159_v49 = vld [vmem:[%s6884_s1 + $0x108] sm:$0xff] }
 0x14c   : > { %1868 = vmatpush.bf16.msra.mxu0 %v5159_v49 }
 0x14d   : > { %1959 = vmatmul.bf16.vlgmr.msrb.gmra.mxu1 %v3944_v57 }
 0x150   : > { %v5827_v0 = vpop.f32.mrf.mxu2  ;;  %1869 = vmatpush.bf16.msra.mxu0 %v5158_v2 }
 0x151   : > { %v1565_v7 = vpop.f32.mrf.mxu0 }
 0x152   : > { %v1566_v15 = vadd.f32 %v5656_v56, %v1565_v7 }
 0x153   : > { %v1654_v17 = vpop.f32.mrf.mxu1 }
 0x154   : > { %v1655_v20 = vadd.f32 %v1654_v17, %v1566_v15  ;;  %1791 = vmatmul.bf16.gmra.mxu0 %v3992_v4  ;;  %v4020_v4 = vor.u32 %v5036_v58, %v4017_v60  ;;  %v1837_v15 = vpop.f32.mrf.mxu3  ;;  %v4048_v58 = vor.u32 %v5043_v51, %v4045_v55  ;;  %v3939_v51 = vld [vmem:[%s5555_s26 + $0x10] sm:$0xf]  ;;  %v5019_v55 = vld [vmem:[%s5555_s26 + $0x28] sm:$0xf0] }
 0x158   : > { %v1743_v27 = vpop.f32.mrf.mxu2 }
 0x159   : > { %v1744_v34 = vadd.f32 %v1743_v27, %v1655_v20  ;;  %v5853_v39 = vpop.f32.mrf.mxu0  ;;  %v3975_v20 = vld [vmem:[%s5555_s26 + $0x50] sm:$0xf] }
 0x15a   : > { %v3976_v27 = vor.u32 %v5027_v22, %v3975_v20 }
 0x15b   : > { %v5860_v46 = vadd.f32 %v1832_v1, %v1744_v34  ;;  %v5862_v48 = vpop.f32.mrf.mxu1  ;;  %v5023_v34 = vld [vmem:[%s5555_s26 + $0x4c] sm:$0xf] }
 0x15c   : > { %4570 = vmatmul.msk.bf16.gmra.mxu2 %vm1457_vm0, %v3976_v27  ;;  %v3972_v41 = vor.u32 %v5023_v34, %v3969_v38  ;;  %v5889_v49 = vpop.f32.mrf.mxu3  ;;  %v5030_v34 = vld [vmem:[%s5555_s26 + $0x84] sm:$0xf]  ;;  %v3997_v38 = vld [vmem:[%s5555_s26 + $0x9c] sm:$0xf0] }
 0x15d   : > { %6902 = vst [vmem:[#allocation11_spill] sm:$0xff] %v5889_v49 }
 0x15e   : > { %1964 = vmatmul.bf16.gmra.mxu1 %v3972_v41  ;;  %v4000_v41 = vor.u32 %v5030_v34, %v3997_v38 }
 0x160   : > { %v5872_v1 = vpop.f32.mrf.mxu2 }
 0x161   : > { %6898 = vst [vmem:[#allocation7_spill] sm:$0xff] %v5872_v1  ;;  %v1570_v7 = vpop.f32.mrf.mxu0  ;;  %v5103_v1 = vld [vmem:[%s5555_s26 + $0x2c8] sm:$0xf0] }
 0x162   : > { %v1571_v8 = vadd.f32 %v5656_v56, %v1570_v7 }
 0x163   : > { %v1659_v13 = vpop.f32.mrf.mxu1 }
 0x164   : > { %v1660_v17 = vadd.f32 %v1659_v13, %v1571_v8  ;;  %1796 = vmatmul.bf16.gmra.mxu0 %v4020_v4  ;;  %v1842_v13 = vpop.f32.mrf.mxu3 }
 0x168   : > { %v1748_v19 = vpop.f32.mrf.mxu2 }
 0x169   : > { %v1749_v23 = vadd.f32 %v1748_v19, %v1660_v17  ;;  %v5880_v28 = vpop.f32.mrf.mxu0  ;;  %v5034_v17 = vld [vmem:[%s5555_s26 + $0xa0] sm:$0xf0] }
 0x16a   : > { %6899 = vst [vmem:[#allocation8_spill] sm:$0xff] %v5880_v28 }
 0x16b   : > { %v5882_v31 = vadd.f32 %v1837_v15, %v1749_v23  ;;  %v5884_v33 = vpop.f32.mrf.mxu1  ;;  %v4003_v15 = vld [vmem:[%s5555_s26 + $0x88] sm:$0xf] }
 0x16c   : > { %6901 = vst [vmem:[#allocation10_spill] sm:$0xff] %v5884_v33  ;;  %v4004_v20 = vor.u32 %v5034_v17, %v4003_v15  ;;  %v4031_v15 = vld [vmem:[%s5555_s26 + $0xc0] sm:$0xf]  ;;  %v5041_v17 = vld [vmem:[%s5555_s26 + $0xd8] sm:$0xf0] }
 0x16d   : > { %6900 = vst [vmem:[#allocation9_spill] sm:$0xff] %v5882_v31 }
 0x16e   : > { %4571 = vmatmul.msk.bf16.gmra.mxu2 %vm1457_vm0, %v4004_v20  ;;  %1969 = vmatmul.bf16.gmra.mxu1 %v4000_v41  ;;  %v4032_v20 = vor.u32 %v5041_v17, %v4031_v15  ;;  %v5037_v41 = vld [vmem:[%s5555_s26 + $0xbc] sm:$0xf] }
 0x170   : > { %v5893_v57 = vpop.f32.mrf.mxu2 }
 0x171   : > { %6903 = vst [vmem:[#allocation12_spill] sm:$0xff] %v5893_v57  ;;  %v1575_v60 = vpop.f32.mrf.mxu0 }
 0x172   : > { %v1576_v2 = vadd.f32 %v5656_v56, %v1575_v60  ;;  %v3940_v60 = vor.u32 %v5019_v55, %v3939_v51  ;;  %v4025_v51 = vld [vmem:[%s5555_s26 + $0xd4] sm:$0xf0] }
 0x173   : > { %v1664_v4 = vpop.f32.mrf.mxu1  ;;  %v4028_v55 = vor.u32 %v5037_v41, %v4025_v51 }
 0x174   : > { %v1665_v7 = vadd.f32 %v1664_v4, %v1576_v2  ;;  %1801 = vmatmul.bf16.gmra.mxu0 %v4048_v58 }
 0x178   : > { %v1753_v8 = vpop.f32.mrf.mxu2 }
 0x179   : > { %v1754_v19 = vadd.f32 %v1753_v8, %v1665_v7  ;;  %v5898_v22 = vpop.f32.mrf.mxu0 }
 0x17a   : > { %6904 = vst [vmem:[#allocation13_spill] sm:$0xff] %v5898_v22 }
 0x17b   : > { %v5900_v23 = vadd.f32 %v1842_v13, %v1754_v19  ;;  %v5902_v27 = vpop.f32.mrf.mxu1 }
 0x17c   : > { %6906 = vst [vmem:[#allocation15_spill] sm:$0xff] %v5902_v27  ;;  %v5090_v27 = vld [vmem:[%s5555_s26 + $0x260] sm:$0xf0] }
 0x17d   : > { %6905 = vst [vmem:[#allocation14_spill] sm:$0xff] %v5900_v23 }
 0x17e   : > { %4572 = vmatmul.msk.bf16.gmra.mxu2 %vm1457_vm0, %v4032_v20  ;;  %1974 = vmatmul.bf16.gmra.mxu1 %v4028_v55 }
 0x180   : > { %v5909_v58 = vpop.f32.mrf.mxu2 }
 0x181   : > { %6907 = vst [vmem:[#allocation16_spill] sm:$0xff] %v5909_v58  ;;  %v1580_v2 = vpop.f32.mrf.mxu0 }
 0x182   : > { %v1581_v4 = vadd.f32 %v5656_v56, %v1580_v2  ;;  %v3967_v2 = vld [vmem:[%s5555_s26 + $0x48] sm:$0xf] }
 0x183   : > { %v1669_v7 = vpop.f32.mrf.mxu1 }
 0x184   : > { %v1670_v8 = vadd.f32 %v1669_v7, %v1581_v4  ;;  %1870 = vmatmul.bf16.vlgmr.msra.gmra.mxu0 %v3940_v60  ;;  %v5026_v4 = vld [vmem:[%s5555_s26 + $0x60] sm:$0xf0] }
 0x185   : > { %v3968_v7 = vor.u32 %v5026_v4, %v3967_v2  ;;  %v5044_v2 = vld [vmem:[%s5555_s26 + $0xf4] sm:$0xf]  ;;  %v4053_v4 = vld [vmem:[%s5555_s26 + $0x10c] sm:$0xf0] }
 0x188   : > { %v1758_v13 = vpop.f32.mrf.mxu2 }
 0x189   : > { %v5914_v19 = vadd.f32 %v1758_v13, %v1670_v8  ;;  %v5916_v34 = vpop.f32.mrf.mxu0 }
 0x18a   : > { %6909 = vst [vmem:[#allocation18_spill] sm:$0xff] %v5916_v34 }
 0x18b   : > { %6908 = vst [vmem:[#allocation17_spill] sm:$0xff] %v5914_v19  ;;  %v5918_v38 = vpop.f32.mrf.mxu1  ;;  %v5048_v19 = vld [vmem:[%s5555_s26 + $0x110] sm:$0xf0] }
 0x18c   : > { %6910 = vst [vmem:[#allocation19_spill] sm:$0xff] %v5918_v38  ;;  %v4059_v38 = vld [vmem:[%s5555_s26 + $0xf8] sm:$0xf] }
 0x18d   : > { %v4060_v51 = vor.u32 %v5048_v19, %v4059_v38 }
 0x18f   : > { %4573 = vmatmul.msk.bf16.gmra.mxu2 %vm1457_vm0, %v4060_v51 }
 0x190   : > { %v5925_v60 = vpop.f32.mrf.mxu2 }
 0x191   : > { %6911 = vst [vmem:[#allocation20_spill] sm:$0xff] %v5925_v60  ;;  %v1585_v8 = vpop.f32.mrf.mxu0  ;;  %v3995_v60 = vld [vmem:[%s5555_s26 + $0x80] sm:$0xf] }
 0x192   : > { %v1586_v13 = vadd.f32 %v5656_v56, %v1585_v8  ;;  %v4056_v8 = vor.u32 %v5044_v2, %v4053_v4 }
 0x193   : > { %v1674_v15 = vpop.f32.mrf.mxu1 }
 0x194   : > { %v1675_v17 = vadd.f32 %v1674_v15, %v1586_v13  ;;  %1875 = vmatmul.bf16.gmra.mxu0 %v3968_v7  ;;  %v5033_v13 = vld [vmem:[%s5555_s26 + $0x98] sm:$0xf0]  ;;  %1979 = vmatmul.bf16.gmra.mxu1 %v4056_v8 }
 0x195   : > { %v3996_v15 = vor.u32 %v5033_v13, %v3995_v60  ;;  %v5051_v60 = vld [vmem:[%s5555_s26 + $0x12c] sm:$0xf]  ;;  %v4081_v13 = vld [vmem:[%s5555_s26 + $0x144] sm:$0xf0] }
 0x198   : > { %v1763_v20 = vpop.f32.mrf.mxu2 }
 0x199   : > { %v5930_v41 = vadd.f32 %v1763_v20, %v1675_v17  ;;  %v5932_v55 = vpop.f32.mrf.mxu0 }
 0x19a   : > { %6913 = vst [vmem:[#allocation22_spill] sm:$0xff] %v5932_v55  ;;  %v4023_v55 = vld [vmem:[%s5555_s26 + $0xb8] sm:$0xf] }
 0x19b   : > { %6912 = vst [vmem:[#allocation21_spill] sm:$0xff] %v5930_v41  ;;  %v5934_v34 = vpop.f32.mrf.mxu1  ;;  %v5055_v41 = vld [vmem:[%s5555_s26 + $0x148] sm:$0xf0] }
 0x19c   : > { %6914 = vst [vmem:[#allocation23_spill] sm:$0xff] %v5934_v34  ;;  %v4087_v34 = vld [vmem:[%s5555_s26 + $0x130] sm:$0xf] }
 0x19d   : > { %v4088_v4 = vor.u32 %v5055_v41, %v4087_v34 }
 0x19f   : > { %4574 = vmatmul.msk.bf16.gmra.mxu2 %vm1457_vm0, %v4088_v4 }
 0x1a0   : > { %v5941_v7 = vpop.f32.mrf.mxu2 }
 0x1a1   : > { %6915 = vst [vmem:[#allocation24_spill] sm:$0xff] %v5941_v7  ;;  %v1590_v19 = vpop.f32.mrf.mxu0  ;;  %v4084_v7 = vor.u32 %v5051_v60, %v4081_v13 }
 0x1a2   : > { %v1591_v38 = vadd.f32 %v5656_v56, %v1590_v19  ;;  %v5040_v56 = vld [vmem:[%s5555_s26 + $0xd0] sm:$0xf0] }
 0x1a3   : > { %v1679_v17 = vpop.f32.mrf.mxu1  ;;  %v4024_v19 = vor.u32 %v5040_v56, %v4023_v55  ;;  %v5058_v55 = vld [vmem:[%s5555_s26 + $0x164] sm:$0xf]  ;;  %v4051_v56 = vld [vmem:[%s5555_s26 + $0xf0] sm:$0xf] }
 0x1a4   : > { %v1680_v20 = vadd.f32 %v1679_v17, %v1591_v38  ;;  %1880 = vmatmul.bf16.gmra.mxu0 %v3996_v15  ;;  %1984 = vmatmul.bf16.gmra.mxu1 %v4084_v7  ;;  %v4115_v17 = vld [vmem:[%s5555_s26 + $0x168] sm:$0xf] }
 0x1a8   : > { %v1768_v51 = vpop.f32.mrf.mxu2 }
 0x1a9   : > { %v5946_v2 = vadd.f32 %v1768_v51, %v1680_v20  ;;  %v5948_v8 = vpop.f32.mrf.mxu0  ;;  %v5062_v20 = vld [vmem:[%s5555_s26 + $0x180] sm:$0xf0] }
 0x1aa   : > { %6917 = vst [vmem:[#allocation26_spill] sm:$0xff] %v5948_v8  ;;  %v4116_v4 = vor.u32 %v5062_v20, %v4115_v17  ;;  %v5069_v17 = vld [vmem:[%s5555_s26 + $0x1b8] sm:$0xf0] }
 0x1ab   : > { %6916 = vst [vmem:[#allocation25_spill] sm:$0xff] %v5946_v2  ;;  %v5083_v2 = vld [vmem:[%s5555_s26 + $0x228] sm:$0xf0] }
 0x1af   : > { %4575 = vmatmul.msk.bf16.gmra.mxu2 %vm1457_vm0, %v4116_v4 }
 0x1b0   : > { %v5955_v15 = vpop.f32.mrf.mxu2 }
 0x1b1   : > { %6918 = vst [vmem:[#allocation27_spill] sm:$0xff] %v5955_v15  ;;  %v1782_v38 = vpop.f32.mrf.mxu0  ;;  %v5061_v15 = vld [vmem:[%s5555_s26 + $0x178] sm:$0xf0] }
 0x1b2   : > { %v5958_v34 = vadd.f32 %v1782_v38, %v5663_v6  ;;  %v4109_v6 = vld [vmem:[%s5555_s26 + $0x17c] sm:$0xf0] }
 0x1b3   : > { %v4112_v13 = vor.u32 %v5058_v55, %v4109_v6  ;;  %v5065_v55 = vld [vmem:[%s5555_s26 + $0x19c] sm:$0xf]  ;;  %v4137_v6 = vld [vmem:[%s5555_s26 + $0x1b4] sm:$0xf0] }
 0x1b4   : > { %1885 = vmatmul.bf16.gmra.mxu0 %v4024_v19  ;;  %v5047_v19 = vld [vmem:[%s5555_s26 + $0x108] sm:$0xf0] }
 0x1b5   : > { %1989 = vmatmul.bf16.gmra.mxu1 %v4112_v13  ;;  %v4140_v13 = vor.u32 %v5065_v55, %v4137_v6 }
 0x1b8   : > { %v1807_v41 = vpop.f32.mrf.mxu2 }
 0x1b9   : > { %v5963_v51 = vadd.f32 %v1807_v41, %v5736_v9  ;;  %v1784_v7 = vpop.f32.mrf.mxu0  ;;  %v4052_v9 = vor.u32 %v5047_v19, %v4051_v56  ;;  %v4079_v56 = vld [vmem:[%s5555_s26 + $0x128] sm:$0xf] }
 0x1ba   : > { %v5966_v60 = vadd.f32 %v1784_v7, %v5672_v18  ;;  %v4143_v18 = vld [vmem:[%s5555_s26 + $0x1a0] sm:$0xf] }
 0x1bb   : > { %v4144_v20 = vor.u32 %v5069_v17, %v4143_v18  ;;  %v5989_v18 = vpop.f32.mrf.mxu1  ;;  %v4171_v17 = vld [vmem:[%s5555_s26 + $0x1d8] sm:$0xf] }
 0x1bc   : > { %6919 = vst [vmem:[#allocation28_spill] sm:$0xff] %v5989_v18 }
 0x1bf   : > { %4576 = vmatmul.msk.bf16.gmra.mxu2 %vm1457_vm0, %v4144_v20  ;;  %v5076_v20 = vld [vmem:[%s5555_s26 + $0x1f0] sm:$0xf0] }
 0x1c1   : > { %v1787_v38 = vpop.f32.mrf.mxu0 }
 0x1c2   : > { %v5974_v41 = vadd.f32 %v1787_v38, %v5677_v30  ;;  %v5054_v30 = vld [vmem:[%s5555_s26 + $0x140] sm:$0xf0] }
 0x1c3   : > { %v4080_v19 = vor.u32 %v5054_v30, %v4079_v56  ;;  %v4165_v56 = vld [vmem:[%s5555_s26 + $0x1ec] sm:$0xf0] }
 0x1c4   : > { %1890 = vmatmul.bf16.gmra.mxu0 %v4052_v9 }
 0x1c5   : > { %1994 = vmatmul.bf16.gmra.mxu1 %v4140_v13  ;;  %v5072_v13 = vld [vmem:[%s5555_s26 + $0x1d4] sm:$0xf] }
 0x1c6   : > { %v4168_v30 = vor.u32 %v5072_v13, %v4165_v56 }
 0x1c9   : > { %v1789_v4 = vpop.f32.mrf.mxu0 }
 0x1ca   : > { %v5979_v7 = vadd.f32 %v1789_v4, %v5686_v42  ;;  %v5991_v42 = vpop.f32.mrf.mxu2  ;;  %v4172_v4 = vor.u32 %v5076_v20, %v4171_v17 }
 0x1cf   : > { %4577 = vmatmul.msk.bf16.gmra.mxu2 %vm1457_vm0, %v4172_v4 }
 0x1d1   : > { %v1792_v9 = vpop.f32.mrf.mxu0 }
 0x1d2   : > { %v5987_v38 = vadd.f32 %v1792_v9, %v5691_v54  ;;  %v1960_v54 = vpop.f32.mrf.mxu1  ;;  %v4107_v9 = vld [vmem:[%s5555_s26 + $0x160] sm:$0xf] }
 0x1d3   : > { %v4108_v18 = vor.u32 %v5061_v15, %v4107_v9  ;;  %v4193_v9 = vld [vmem:[%s5555_s26 + $0x224] sm:$0xf0] }
 0x1d4   : > { %1895 = vmatmul.bf16.gmra.mxu0 %v4080_v19  ;;  %v2049_v19 = vpop.f32.mrf.mxu2 }
 0x1d5   : > { %1999 = vmatmul.bf16.gmra.mxu1 %v4168_v30  ;;  %v5079_v30 = vld [vmem:[%s5555_s26 + $0x20c] sm:$0xf] }
 0x1d6   : > { %v4196_v58 = vor.u32 %v5079_v30, %v4193_v9 }
 0x1d9   : > { %v1794_v55 = vpop.f32.mrf.mxu0 }
 0x1da   : > { %v5996_v6 = vadd.f32 %v1794_v55, %v5700_v3  ;;  %v1962_v20 = vpop.f32.mrf.mxu1  ;;  %v4199_v55 = vld [vmem:[%s5555_s26 + $0x210] sm:$0xf] }
 0x1db   : > { %v4200_v8 = vor.u32 %v5083_v2, %v4199_v55 }
 0x1dc   : > { %v2051_v4 = vpop.f32.mrf.mxu2 }
 0x1df   : > { %4578 = vmatmul.msk.bf16.gmra.mxu2 %vm1457_vm0, %v4200_v8 }
 0x1e1   : > { %v1797_v17 = vpop.f32.mrf.mxu0 }
 0x1e2   : > { %v6004_v3 = vadd.f32 %v1797_v17, %v5705_v16  ;;  %v1965_v15 = vpop.f32.mrf.mxu1  ;;  %v4135_v16 = vld [vmem:[%s5555_s26 + $0x198] sm:$0xf]  ;;  %v5068_v17 = vld [vmem:[%s5555_s26 + $0x1b0] sm:$0xf0] }
 0x1e3   : > { %v4136_v23 = vor.u32 %v5068_v17, %v4135_v16  ;;  %v5086_v16 = vld [vmem:[%s5555_s26 + $0x244] sm:$0xf]  ;;  %v4221_v17 = vld [vmem:[%s5555_s26 + $0x25c] sm:$0xf0] }
 0x1e4   : > { %1900 = vmatmul.bf16.gmra.mxu0 %v4108_v18  ;;  %v2054_v18 = vpop.f32.mrf.mxu2  ;;  %v4224_v49 = vor.u32 %v5086_v16, %v4221_v17  ;;  %v4255_v16 = vld [vmem:[%s5555_s26 + $0x280] sm:$0xf]  ;;  %v5097_v17 = vld [vmem:[%s5555_s26 + $0x298] sm:$0xf0] }
 0x1e5   : > { %2004 = vmatmul.bf16.gmra.mxu1 %v4196_v58  ;;  %v4256_v33 = vor.u32 %v5097_v17, %v4255_v16 }
 0x1e9   : > { %v1799_v13 = vpop.f32.mrf.mxu0 }
 0x1ea   : > { %v6009_v56 = vadd.f32 %v1799_v13, %v5714_v29  ;;  %v1967_v55 = vpop.f32.mrf.mxu1  ;;  %v4227_v13 = vld [vmem:[%s5555_s26 + $0x248] sm:$0xf] }
 0x1eb   : > { %v4228_v22 = vor.u32 %v5090_v27, %v4227_v13 }
 0x1ec   : > { %v2056_v8 = vpop.f32.mrf.mxu2 }
 0x1ef   : > { %4579 = vmatmul.msk.bf16.gmra.mxu2 %vm1457_vm0, %v4228_v22 }
 0x1f1   : > { %v1802_v2 = vpop.f32.mrf.mxu0 }
 0x1f2   : > { %v6017_v29 = vadd.f32 %v1802_v2, %v5719_v43  ;;  %v1970_v58 = vpop.f32.mrf.mxu1  ;;  %v4163_v43 = vld [vmem:[%s5555_s26 + $0x1d0] sm:$0xf]  ;;  %v5075_v2 = vld [vmem:[%s5555_s26 + $0x1e8] sm:$0xf0] }
 0x1f4   : > { %1905 = vmatmul.bf16.gmra.mxu0 %v4136_v23  ;;  %v2059_v57 = vpop.f32.mrf.mxu2  ;;  %v4164_v23 = vor.u32 %v5075_v2, %v4163_v43  ;;  %v5093_v2 = vld [vmem:[%s5555_s26 + $0x27c] sm:$0xf] }
 0x1f5   : > { %2009 = vmatmul.bf16.gmra.mxu1 %v4224_v49 }
 0x1f9   : > { %v1804_v30 = vpop.f32.mrf.mxu0 }
 0x1fa   : > { %v6022_v9 = vadd.f32 %v1804_v30, %v5731_v59  ;;  %v1972_v59 = vpop.f32.mrf.mxu1 }
 0x1fc   : > { %v6030_v22 = vpop.f32.mrf.mxu2 }
 0x1ff   : > { %4580 = vmatmul.msk.bf16.gmra.mxu2 %vm1457_vm0, %v4256_v33 }
 0x201   : > { %v1871_v27 = vpop.f32.mrf.mxu0 }
 0x202   : > { %v1872_v13 = vadd.f32 %v1871_v27, %v5958_v34  ;;  %v1975_v43 = vpop.f32.mrf.mxu1  ;;  %v4249_v34 = vld [vmem:[%s5555_s26 + $0x294] sm:$0xf0] }
 0x204   : > { %v1961_v30 = vadd.f32 %v1960_v54, %v1872_v13  ;;  %1910 = vmatmul.bf16.gmra.mxu0 %v4164_v23  ;;  %v4252_v54 = vor.u32 %v5093_v2, %v4249_v34  ;;  %v4191_v23 = vld [vmem:[%s5555_s26 + $0x208] sm:$0xf]  ;;  %v5082_v13 = vld [vmem:[%s5555_s26 + $0x220] sm:$0xf0]  ;;  %v2064_v40 = vpop.f32.mrf.mxu2  ;;  %v5104_v2 = vld [vmem:[%s5555_s26 + $0x2d0] sm:$0xf0] }
 0x206   : > { %v6032_v31 = vadd.f32 %v2049_v19, %v1961_v30  ;;  %2014 = vmatmul.bf16.gmra.mxu1 %v4252_v54  ;;  %v4192_v30 = vor.u32 %v5082_v13, %v4191_v23  ;;  %v4277_v23 = vld [vmem:[%s5555_s26 + $0x2cc] sm:$0xf0] }
 0x209   : > { %v1873_v28 = vpop.f32.mrf.mxu0 }
 0x20a   : > { %v1874_v49 = vadd.f32 %v1873_v28, %v5966_v60  ;;  %v1977_v33 = vpop.f32.mrf.mxu1 }
 0x20c   : > { %v1963_v27 = vadd.f32 %v1962_v20, %v1874_v49  ;;  %v6045_v20 = vpop.f32.mrf.mxu2  ;;  %v4283_v49 = vld [vmem:[%s5555_s26 + $0x2b8] sm:$0xf] }
 0x20e   : > { %v6042_v19 = vadd.f32 %v2051_v4, %v1963_v27  ;;  %v4284_v4 = vor.u32 %v5104_v2, %v4283_v49 }
 0x210   : > { %4581 = vmatmul.msk.bf16.gmra.mxu2 %vm1457_vm0, %v4284_v4 }
 0x211   : > { %v1876_v16 = vpop.f32.mrf.mxu0 }
 0x212   : > { %v1877_v28 = vadd.f32 %v1876_v16, %v5974_v41  ;;  %v6053_v54 = vpop.f32.mrf.mxu1  ;;  %v5100_v41 = vld [vmem:[%s5555_s26 + $0x2b4] sm:$0xf]  ;;  %v5089_v16 = vld [vmem:[%s5555_s26 + $0x258] sm:$0xf0] }
 0x213   : > { %v4280_v13 = vor.u32 %v5100_v41, %v4277_v23 }
 0x214   : > { %v1966_v60 = vadd.f32 %v1965_v15, %v1877_v28  ;;  %1915 = vmatmul.bf16.gmra.mxu0 %v4192_v30  ;;  %v4219_v30 = vld [vmem:[%s5555_s26 + $0x240] sm:$0xf] }
 0x216   : > { %v6047_v17 = vadd.f32 %v2054_v18, %v1966_v60  ;;  %v2069_v18 = vpop.f32.mrf.mxu2  ;;  %2019 = vmatmul.bf16.gmra.mxu1 %v4280_v13  ;;  %v4220_v60 = vor.u32 %v5089_v16, %v4219_v30  ;;  %v4305_v30 = vld [vmem:[%s5555_s26 + $0x304] sm:$0xf0] }
 0x219   : > { %v1878_v34 = vpop.f32.mrf.mxu0 }
 0x21a   : > { %v1879_v27 = vadd.f32 %v1878_v34, %v5979_v7  ;;  %v6062_v2 = vpop.f32.mrf.mxu1 }
 0x21c   : > { %v1968_v15 = vadd.f32 %v1967_v55, %v1879_v27  ;;  %v4311_v27 = vld [vmem:[%s5555_s26 + $0x2f0] sm:$0xf] }
 0x21e   : > { %v6059_v28 = vadd.f32 %v2056_v8, %v1968_v15  ;;  %v6064_v55 = vpop.f32.mrf.mxu2  ;;  %v5111_v8 = vld [vmem:[%s5555_s26 + $0x308] sm:$0xf0] }
 0x21f   : > { %v4312_v41 = vor.u32 %v5111_v8, %v4311_v27 }
 0x221   : > { %v1881_v7 = vpop.f32.mrf.mxu0  ;;  %4582 = vmatmul.msk.bf16.gmra.mxu2 %vm1457_vm0, %v4312_v41 }
 0x222   : > { %v1882_v49 = vadd.f32 %v1881_v7, %v5987_v38  ;;  %v6072_v13 = vpop.f32.mrf.mxu1  ;;  %v5107_v38 = vld [vmem:[%s5555_s26 + $0x2ec] sm:$0xf]  ;;  %v5096_v7 = vld [vmem:[%s5555_s26 + $0x290] sm:$0xf0] }
 0x223   : > { %v4308_v16 = vor.u32 %v5107_v38, %v4305_v30 }
 0x224   : > { %v1971_v4 = vadd.f32 %v1970_v58, %v1882_v49  ;;  %1920 = vmatmul.bf16.gmra.mxu0 %v4220_v60  ;;  %v4247_v60 = vld [vmem:[%s5555_s26 + $0x278] sm:$0xf] }
 0x226   : > { %v6066_v34 = vadd.f32 %v2059_v57, %v1971_v4  ;;  %v6078_v57 = vpop.f32.mrf.mxu2  ;;  %2024 = vmatmul.bf16.gmra.mxu1 %v4308_v16  ;;  %v5114_v16 = vld [vmem:[%s5555_s26 + $0x324] sm:$0xf] }
 0x229   : > { %v1883_v23 = vpop.f32.mrf.mxu0 }
 0x22a   : > { %v1884_v15 = vadd.f32 %v1883_v23, %v5996_v6  ;;  %v4248_v6 = vor.u32 %v5096_v7, %v4247_v60  ;;  %v6084_v8 = vpop.f32.mrf.mxu1 }
 0x22c   : > { %v1973_v58 = vadd.f32 %v1972_v59, %v1884_v15  ;;  %v4339_v15 = vld [vmem:[%s5555_s26 + $0x328] sm:$0xf] }
 0x22e   : > { %v6081_v49 = vadd.f32 %v6030_v22, %v1973_v58  ;;  %v6086_v41 = vpop.f32.mrf.mxu2  ;;  %v5118_v22 = vld [vmem:[%s5555_s26 + $0x340] sm:$0xf0] }
 0x22f   : > { %v4340_v38 = vor.u32 %v5118_v22, %v4339_v15  ;;  %v2129_v15 = vmax.f32 %v6032_v31, 0.0  ;;  %v4367_v31 = vld [vmem:[%s5555_s26 + $0x360] sm:$0xf] }
 0x231   : > { %v1886_v4 = vpop.f32.mrf.mxu0  ;;  %4583 = vmatmul.msk.bf16.gmra.mxu2 %vm1457_vm0, %v4340_v38 }
 0x232   : > { %v1887_v27 = vadd.f32 %v1886_v4, %v6004_v3  ;;  %v4333_v3 = vld [vmem:[%s5555_s26 + $0x33c] sm:$0xf0]  ;;  %v4275_v4 = vld [vmem:[%s5555_s26 + $0x2b0] sm:$0xf] }
 0x233   : > { %v4336_v7 = vor.u32 %v5114_v16, %v4333_v3 }
 0x234   : > { %v1976_v59 = vadd.f32 %v1975_v43, %v1887_v27  ;;  %1925 = vmatmul.bf16.gmra.mxu0 %v4248_v6  ;;  %v6098_v43 = vpop.f32.mrf.mxu1  ;;  %v4276_v27 = vor.u32 %v5103_v1, %v4275_v4  ;;  %v6117_v1 = vld [vmem:[%s6887_s4] ss:$0 sm:$0xff]  ;;  %v5121_v4 = vld [vmem:[%s5555_s26 + $0x35c] sm:$0xf] }
 0x236   : > { %v6088_v23 = vadd.f32 %v2064_v40, %v1976_v59  ;;  %2029 = vmatmul.bf16.gmra.mxu1 %v4336_v7  ;;  %v6103_v6 = vpop.f32.mrf.mxu2 }
 0x239   : > { %v1888_v30 = vpop.f32.mrf.mxu0 }
 0x23a   : > { %v1889_v58 = vadd.f32 %v1888_v30, %v6009_v56  ;;  %v5125_v30 = vld [vmem:[%s5555_s26 + $0x378] sm:$0xf0] }
 0x23b   : > { %v4368_v16 = vor.u32 %v5125_v30, %v4367_v31  ;;  %v5110_v31 = vld [vmem:[%s5555_s26 + $0x300] sm:$0xf0] }
 0x23c   : > { %v1978_v60 = vadd.f32 %v1977_v33, %v1889_v58  ;;  %v6110_v33 = vld [vmem:[%s6886_s3] ss:$0 sm:$0xff] }
 0x23d   : > { %v2165_v38 = vmul.f32 %v6110_v33, %v2129_v15 }
 0x23e   : > { %v6101_v40 = vadd.f32 %v6045_v20, %v1978_v60  ;;  %v6123_v3 = vpop.f32.mrf.mxu2 }
 0x23f   : > { %v6129_v7 = vadd.f32 %v6117_v1, %v2165_v38  ;;  %v6146_v38 = vld [vmem:[%s6885_s2] ss:$0 sm:$0xff] }
 0x241   : > { %v1891_v56 = vpop.f32.mrf.mxu0  ;;  %4584 = vmatmul.msk.bf16.gmra.mxu2 %vm1457_vm0, %v4368_v16 }
 0x242   : > { %v1892_v59 = vadd.f32 %v1891_v56, %v6017_v29  ;;  %v6119_v29 = vpop.f32.mrf.mxu1  ;;  %v2130_v56 = vmax.f32 %v6042_v19, 0.0  ;;  %v1543_v19 = vadd.f32 %v6146_v38, %v5738_v10 }
 0x244   : > { %v1981_v22 = vadd.f32 %v6053_v54, %v1892_v59  ;;  %1930 = vmatmul.bf16.gmra.mxu0 %v4276_v27  ;;  %v4361_v27 = vld [vmem:[%s5555_s26 + $0x374] sm:$0xf0] }
 0x246   : > { %v2070_v20 = vadd.f32 %v2069_v18, %v1981_v22  ;;  %v4364_v22 = vor.u32 %v5121_v4, %v4361_v27  ;;  %v1632_v4 = vadd.f32 %v5742_v12, %v1543_v19  ;;  %v6156_v27 = vpop.f32.mrf.mxu2 }
 0x248   : > { %v2137_v58 = vmax.f32 %v2070_v20, 0.0  ;;  %v4303_v20 = vld [vmem:[%s5555_s26 + $0x2e8] sm:$0xf]  ;;  %2034 = vmatmul.bf16.gmra.mxu1 %v4364_v22 }
 0x249   : > { %v1893_v54 = vpop.f32.mrf.mxu0  ;;  %v4304_v16 = vor.u32 %v5110_v31, %v4303_v20  ;;  %v1721_v20 = vadd.f32 %v5750_v21, %v1632_v4  ;;  %v2132_v21 = vmax.f32 %v6059_v28, 0.0 }
 0x24a   : > { %v2173_v18 = vmul.f32 %v6110_v33, %v2137_v58  ;;  %v1894_v60 = vadd.f32 %v1893_v54, %v6022_v9  ;;  %v2166_v58 = vmul.f32 %v6110_v33, %v2130_v56 }
 0x24c   : > { %v6135_v59 = vadd.f32 %v6117_v1, %v2173_v18  ;;  %v1983_v15 = vadd.f32 %v6062_v2, %v1894_v60  ;;  %v6151_v18 = vpop.f32.mrf.mxu1  ;;  %v6161_v10 = vadd.f32 %v6117_v1, %v2166_v58 }
 0x24e   : > { %v2072_v30 = vadd.f32 %v6064_v55, %v1983_v15  ;;  %v2233_v9 = vmax.f32 %v6129_v7, %v6135_v59  ;;  %v2131_v15 = vmax.f32 %v6047_v17, 0.0  ;;  %v1810_v17 = vadd.f32 %v5991_v42, %v1721_v20  ;;  %v6187_v4 = vpop.f32.mrf.mxu2 }
 0x24f   : > { %v1548_v42 = vadd.f32 %v6146_v38, %v5756_v35  ;;  %v2168_v20 = vmul.f32 %v6110_v33, %v2132_v21 }
 0x250   : > { %v2138_v2 = vmax.f32 %v2072_v30, 0.0 }
 0x251   : > { %v1896_v54 = vpop.f32.mrf.mxu0 }
 0x252   : > { %v2174_v55 = vmul.f32 %v6110_v33, %v2138_v2  ;;  %v1897_v60 = vadd.f32 %v1896_v54, %v5963_v51 }
 0x254   : > { %v1986_v22 = vadd.f32 %v6072_v13, %v1897_v60  ;;  %1935 = vmatmul.bf16.gmra.mxu0 %v4304_v16  ;;  %v6164_v56 = vadd.f32 %v6117_v1, %v2174_v55  ;;  %v2167_v13 = vmul.f32 %v6110_v33, %v2131_v15  ;;  %v6173_v2 = vpop.f32.mrf.mxu1  ;;  %v4331_v55 = vld [vmem:[%s5555_s26 + $0x320] sm:$0xf]  ;;  %v5117_v60 = vld [vmem:[%s5555_s26 + $0x338] sm:$0xf0] }
 0x256   : > { %v2075_v51 = vadd.f32 %v6078_v57, %v1986_v22  ;;  %v2234_v12 = vmax.f32 %v6161_v10, %v6164_v56  ;;  %v6176_v16 = vadd.f32 %v6117_v1, %v2167_v13 }
 0x258   : > { %v2139_v31 = vmax.f32 %v2075_v51, 0.0  ;;  %v4332_v51 = vor.u32 %v5117_v60, %v4331_v55 }
 0x259   : > { %v1898_v30 = vpop.f32.mrf.mxu0 }
 0x25a   : > { %v2175_v19 = vmul.f32 %v6110_v33, %v2139_v31  ;;  %v1899_v58 = vadd.f32 %v1898_v30, %v1810_v17  ;;  %v1637_v17 = vadd.f32 %v5760_v37, %v1548_v42  ;;  %v2133_v30 = vmax.f32 %v6066_v34, 0.0 }
 0x25c   : > { %v6180_v57 = vadd.f32 %v6117_v1, %v2175_v19  ;;  %v1988_v54 = vadd.f32 %v6084_v8, %v1899_v58  ;;  %v1726_v31 = vadd.f32 %v5770_v47, %v1637_v17  ;;  %v6200_v19 = vadd.f32 %v6117_v1, %v2168_v20  ;;  %v2000_v37 = vpop.f32.mrf.mxu1  ;;  %v2089_v47 = vpop.f32.mrf.mxu2  ;;  %v5124_v17 = vld [vmem:[%s5555_s26 + $0x370] sm:$0xf0] }
 0x25d   : > { %v2134_v20 = vmax.f32 %v6081_v49, 0.0 }
 0x25e   : > { %v2077_v15 = vadd.f32 %v6086_v41, %v1988_v54  ;;  %v2235_v22 = vmax.f32 %v6176_v16, %v6180_v57  ;;  %v1815_v34 = vadd.f32 %v5740_v11, %v1726_v31  ;;  %v1553_v11 = vadd.f32 %v6146_v38, %v5773_v61  ;;  %v6921_v57 = vld [vmem:[#allocation6_spill] sm:$0xff] }
 0x25f   : > { %v2170_v31 = vmul.f32 %v6110_v33, %v2134_v20 }
 0x260   : > { %v2140_v28 = vmax.f32 %v2077_v15, 0.0 }
 0x261   : > { %v1901_v13 = vpop.f32.mrf.mxu0 }
 0x262   : > { %v2176_v8 = vmul.f32 %v6110_v33, %v2140_v28  ;;  %v1902_v35 = vadd.f32 %v1901_v13, %v5758_v36 }
 0x264   : > { %v1991_v41 = vadd.f32 %v6098_v43, %v1902_v35  ;;  %1940 = vmatmul.bf16.gmra.mxu0 %v4332_v51  ;;  %v6203_v58 = vadd.f32 %v6117_v1, %v2176_v8  ;;  %v2169_v43 = vmul.f32 %v6110_v33, %v2133_v30  ;;  %v4359_v51 = vld [vmem:[%s5555_s26 + $0x358] sm:$0xf]  ;;  %v2002_v35 = vpop.f32.mrf.mxu1  ;;  %s3848_s26 = scalar_lea.hbm %s6893_s10, %s5248_s25  ;;  %s5342_s25 = scalar_lea.hbm %s6893_s10, 128 }
 0x265   : > { %v4360_v49 = vor.u32 %v5124_v17, %v4359_v51  ;;  %s3851_s22 = sshll.u32 %s3848_s26, 4  ;;  %s3852_s22 = int_to_ptr.hbm [resolvable:$true] %s3851_s22 }
 0x266   : > { %v2080_v21 = vadd.f32 %v6103_v6, %v1991_v41  ;;  %v2236_v36 = vmax.f32 %v6200_v19, %v6203_v58  ;;  %v6212_v15 = vadd.f32 %v6117_v1, %v2169_v43  ;;  %v1642_v41 = vadd.f32 %v5777_v63, %v1553_v11  ;;  %s5336_s11 = sshra.s32 %s3852_s22, 4  ;;  %s5337_s11 = int_to_ptr.hbm [resolvable:$true] %s5336_s11 }
 0x267   : > { %s5338_s28 = scalar_lea.hbm %s5337_s11, 64  ;;  %p5343_p0 = scmp.lt.s32.totalorder %s5337_s11, %s6893_s10 }
 0x268   : > { %v2141_v54 = vmax.f32 %v2080_v21, 0.0  ;;  %v1731_v43 = vadd.f32 %v5783_v5, %v1642_v41  ;;  %p5339_p11 = scmp.ne.s32.totalorder %s5337_s11, %s5338_s28  ;;  %p5344_p1 = scmp.lt.s32.totalorder %s5342_s25, %s5338_s28 }
 0x269   : > { %v1903_v42 = vpop.f32.mrf.mxu0 }
 0x26a   : > { %v2177_v55 = vmul.f32 %v6110_v33, %v2141_v54  ;;  %v1904_v60 = vadd.f32 %v1903_v42, %v1815_v34  ;;  %v2091_v34 = vpop.f32.mrf.mxu2  ;;  %v6234_v42 = vadd.f32 %v6117_v1, %v2170_v31  ;;  %p5340_p12 = pnand %p5339_p11, %p5481_p5  ;;  %p5345_p2 = por %p5344_p1, %p5343_p0 }
 0x26c   : > { %v6216_v6 = vadd.f32 %v6117_v1, %v2177_v55  ;;  %v1993_v28 = vadd.f32 %v6119_v29, %v1904_v60  ;;  %p5341_p13 = pneg %p5340_p12 }
 0x26e   : > { %v2082_v13 = vadd.f32 %v6123_v3, %v1993_v28  ;;  %v2237_v8 = vmax.f32 %v6212_v15, %v6216_v6  ;;  %v2135_v3 = vmax.f32 %v6088_v23, 0.0  ;;  %v2005_v28 = vpop.f32.mrf.mxu1  ;;  %p5346_p3 = pnand %p5345_p2, %p5341_p13 }
 0x270   : > { %v2142_v30 = vmax.f32 %v2082_v13, 0.0  ;;  %v2171_v5 = vmul.f32 %v6110_v33, %v2135_v3  ;;  %v2136_v13 = vmax.f32 %v6101_v40, 0.0 }
 0x271   : > { %v1906_v21 = vpop.f32.mrf.mxu0 }
 0x272   : > { %v2178_v29 = vmul.f32 %v6110_v33, %v2142_v30  ;;  %v1907_v61 = vadd.f32 %v1906_v21, %v5775_v62  ;;  %v1820_v62 = vadd.f32 %v5766_v44, %v1731_v43  ;;  %v2094_v51 = vpop.f32.mrf.mxu2  ;;  %v6246_v17 = vadd.f32 %v6117_v1, %v2171_v5 }
 0x273   : > { %v1558_v44 = vadd.f32 %v6146_v38, %v5791_v24  ;;  %v2172_v41 = vmul.f32 %v6110_v33, %v2136_v13  ;;  %v1563_v13 = vadd.f32 %v6146_v38, %v5810_v50 }
 0x274   : > { %v1996_v54 = vadd.f32 %v6151_v18, %v1907_v61  ;;  %1945 = vmatmul.bf16.gmra.mxu0 %v4360_v49  ;;  %v6237_v55 = vadd.f32 %v6117_v1, %v2178_v29 }
 0x275   : > { %v1647_v61 = vadd.f32 %v5795_v26, %v1558_v44  ;;  %v6264_v24 = vadd.f32 %v6117_v1, %v2172_v41  ;;  %v1652_v41 = vadd.f32 %v5817_v53, %v1563_v13 }
 0x276   : > { %v2085_v63 = vadd.f32 %v6156_v27, %v1996_v54  ;;  %v2238_v60 = vmax.f32 %v6234_v42, %v6237_v55  ;;  %v2007_v3 = vpop.f32.mrf.mxu1 }
 0x278   : > { %v2143_v20 = vmax.f32 %v2085_v63, 0.0 }
 0x279   : > { %v1908_v23 = vpop.f32.mrf.mxu0 }
 0x27a   : > { %v2179_v18 = vmul.f32 %v6110_v33, %v2143_v20  ;;  %v1909_v11 = vadd.f32 %v1908_v23, %v1820_v62  ;;  %v2096_v63 = vpop.f32.mrf.mxu2 }
 0x27c   : > { %v6250_v27 = vadd.f32 %v6117_v1, %v2179_v18  ;;  %v1998_v31 = vadd.f32 %v6173_v2, %v1909_v11  ;;  %v1736_v2 = vadd.f32 %v5799_v32, %v1647_v61 }
 0x27e   : > { %v2087_v30 = vadd.f32 %v6187_v4, %v1998_v31  ;;  %v2239_v49 = vmax.f32 %v6246_v17, %v6250_v27  ;;  %v1825_v26 = vadd.f32 %v5785_v14, %v1736_v2  ;;  %v2010_v11 = vpop.f32.mrf.mxu1 }
 0x280   : > { %v2144_v21 = vmax.f32 %v2087_v30, 0.0 }
 0x281   : > { %v1911_v29 = vpop.f32.mrf.mxu0 }
 0x282   : > { %v2180_v40 = vmul.f32 %v6110_v33, %v2144_v21  ;;  %v1912_v43 = vadd.f32 %v1911_v29, %v5793_v25  ;;  %v2099_v44 = vpop.f32.mrf.mxu2  ;;  %v1741_v29 = vadd.f32 %v5827_v0, %v1652_v41 }
 0x284   : > { %v2001_v54 = vadd.f32 %v2000_v37, %v1912_v43  ;;  %v6267_v4 = vadd.f32 %v6117_v1, %v2180_v40 }
 0x286   : > { %v2090_v62 = vadd.f32 %v2089_v47, %v2001_v54  ;;  %v2240_v5 = vmax.f32 %v6264_v24, %v6267_v4  ;;  %v2012_v59 = vpop.f32.mrf.mxu1  ;;  %v6932_v4 = vld [vmem:[#allocation17_spill] sm:$0xff] }
 0x288   : > { %v2145_v20 = vmax.f32 %v2090_v62, 0.0 }
 0x289   : > { %v1913_v23 = vpop.f32.mrf.mxu0 }
 0x28a   : > { %v2181_v25 = vmul.f32 %v6110_v33, %v2145_v20  ;;  %v1914_v18 = vadd.f32 %v1913_v23, %v1825_v26  ;;  %v2101_v43 = vpop.f32.mrf.mxu2  ;;  %v6920_v23 = vld [vmem:[#allocation7_spill] sm:$0xff] }
 0x28c   : > { %v2003_v32 = vadd.f32 %v2002_v35, %v1914_v18  ;;  %v2217_v37 = vadd.f32 %v6117_v1, %v2181_v25 }
 0x28e   : > { %v2092_v31 = vadd.f32 %v2091_v34, %v2003_v32  ;;  %v6279_v47 = vmax.f32 %v2233_v9, %v2217_v37  ;;  %v1830_v9 = vadd.f32 %v5805_v45, %v1741_v29 }
 0x290   : > { %v2146_v14 = vmax.f32 %v2092_v31, 0.0 }
 0x291   : > { %v1916_v30 = vpop.f32.mrf.mxu0 }
 0x292   : > { %v2182_v21 = vmul.f32 %v6110_v33, %v2146_v14  ;;  %v1917_v35 = vadd.f32 %v1916_v30, %v5815_v52  ;;  %v2104_v20 = vpop.f32.mrf.mxu2  ;;  %v6922_v30 = vld [vmem:[#allocation8_spill] sm:$0xff] }
 0x294   : > { %v2006_v61 = vadd.f32 %v2005_v28, %v1917_v35  ;;  %v2218_v50 = vadd.f32 %v6117_v1, %v2182_v21  ;;  %v1568_v28 = vadd.f32 %v6146_v38, %v5853_v39  ;;  %v6923_v21 = vld [vmem:[#allocation10_spill] sm:$0xff] }
 0x296   : > { %v2095_v34 = vadd.f32 %v2094_v51, %v2006_v61  ;;  %v6289_v7 = vmax.f32 %v2234_v12, %v2218_v50  ;;  %v2015_v12 = vpop.f32.mrf.mxu1  ;;  %v1657_v62 = vadd.f32 %v5862_v48, %v1568_v28  ;;  %v6924_v61 = vld [vmem:[#allocation9_spill] sm:$0xff] }
 0x298   : > { %v2147_v40 = vmax.f32 %v2095_v34, 0.0  ;;  %v1746_v25 = vadd.f32 %v6920_v23, %v1657_v62  ;;  %v6925_v34 = vld [vmem:[#allocation12_spill] sm:$0xff]  ;;  %v6928_v23 = vld [vmem:[#allocation15_spill] sm:$0xff] }
 0x299   : > { %v1918_v53 = vpop.f32.mrf.mxu0 }
 0x29a   : > { %v2183_v2 = vmul.f32 %v6110_v33, %v2147_v40  ;;  %v1919_v52 = vadd.f32 %v1918_v53, %v1830_v9 }
 0x29c   : > { %v2008_v54 = vadd.f32 %v2007_v3, %v1919_v52  ;;  %v2219_v0 = vadd.f32 %v6117_v1, %v2183_v2 }
 0x29e   : > { %v2097_v51 = vadd.f32 %v2096_v63, %v2008_v54  ;;  %v6299_v10 = vmax.f32 %v2235_v22, %v2219_v0  ;;  %v1835_v22 = vadd.f32 %v6921_v57, %v1746_v25  ;;  %v1844_v54 = vpop.f32.mrf.mxu3 }
 0x2a0   : > { %v2148_v56 = vmax.f32 %v2097_v51, 0.0 }
 0x2a1   : > { %v1921_v45 = vpop.f32.mrf.mxu0 }
 0x2a2   : > { %v2184_v26 = vmul.f32 %v6110_v33, %v2148_v56  ;;  %v1922_v3 = vadd.f32 %v1921_v45, %v5860_v46  ;;  %v2017_v46 = vpop.f32.mrf.mxu1 }
 0x2a4   : > { %v2011_v18 = vadd.f32 %v2010_v11, %v1922_v3  ;;  %v2220_v39 = vadd.f32 %v6117_v1, %v2184_v26  ;;  %v2106_v11 = vpop.f32.mrf.mxu2 }
 0x2a6   : > { %v2100_v63 = vadd.f32 %v2099_v44, %v2011_v18  ;;  %v6309_v16 = vmax.f32 %v2236_v36, %v2220_v39  ;;  %v1573_v44 = vadd.f32 %v6146_v38, %v6922_v30  ;;  %v6929_v39 = vld [vmem:[#allocation14_spill] sm:$0xff]  ;;  %v1847_v57 = vpop.f32.mrf.mxu3 }
 0x2a8   : > { %v2149_v32 = vmax.f32 %v2100_v63, 0.0  ;;  %v1662_v35 = vadd.f32 %v6923_v21, %v1573_v44 }
 0x2a9   : > { %v1923_v48 = vpop.f32.mrf.mxu0 }
 0x2aa   : > { %v2185_v37 = vmul.f32 %v6110_v33, %v2149_v32  ;;  %v1924_v13 = vadd.f32 %v1923_v48, %v1835_v22  ;;  %v2020_v53 = vpop.f32.mrf.mxu1  ;;  %v6930_v22 = vld [vmem:[#allocation16_spill] sm:$0xff] }
 0x2ac   : > { %v2013_v31 = vadd.f32 %v2012_v59, %v1924_v13  ;;  %v2221_v14 = vadd.f32 %v6117_v1, %v2185_v37  ;;  %v1751_v59 = vadd.f32 %v6925_v34, %v1662_v35  ;;  %v2109_v6 = vpop.f32.mrf.mxu2 }
 0x2ae   : > { %v2102_v41 = vadd.f32 %v2101_v43, %v2013_v31  ;;  %v6319_v19 = vmax.f32 %v2237_v8, %v2221_v14  ;;  %v6926_v8 = vld [vmem:[#allocation11_spill] sm:$0xff] }
 0x2af   : > { %v1840_v2 = vadd.f32 %v6926_v8, %v1751_v59 }
 0x2b0   : > { %v2150_v58 = vmax.f32 %v2102_v41, 0.0 }
 0x2b1   : > { %v1926_v36 = vpop.f32.mrf.mxu0 }
 0x2b2   : > { %v2186_v29 = vmul.f32 %v6110_v33, %v2150_v58  ;;  %v1927_v50 = vadd.f32 %v1926_v36, %v6924_v61  ;;  %v2022_v55 = vpop.f32.mrf.mxu1  ;;  %v1849_v58 = vpop.f32.mrf.mxu3  ;;  %v6931_v36 = vld [vmem:[#allocation18_spill] sm:$0xff] }
 0x2b3   : > { %v1583_v21 = vadd.f32 %v6146_v38, %v6931_v36 }
 0x2b4   : > { %v2016_v9 = vadd.f32 %v2015_v12, %v1927_v50  ;;  %v2222_v40 = vadd.f32 %v6117_v1, %v2186_v29  ;;  %v6927_v12 = vld [vmem:[#allocation13_spill] sm:$0xff]  ;;  %v6933_v50 = vld [vmem:[#allocation19_spill] sm:$0xff] }
 0x2b5   : > { %v1578_v62 = vadd.f32 %v6146_v38, %v6927_v12  ;;  %v1672_v34 = vadd.f32 %v6933_v50, %v1583_v21 }
 0x2b6   : > { %v2105_v43 = vadd.f32 %v2104_v20, %v2016_v9  ;;  %v6329_v15 = vmax.f32 %v2238_v60, %v2222_v40  ;;  %v2111_v20 = vpop.f32.mrf.mxu2 }
 0x2b7   : > { %v1667_v25 = vadd.f32 %v6928_v23, %v1578_v62 }
 0x2b8   : > { %v2151_v52 = vmax.f32 %v2105_v43, 0.0 }
 0x2b9   : > { %v1928_v0 = vpop.f32.mrf.mxu0  ;;  %v1756_v32 = vadd.f32 %v6930_v22, %v1667_v25  ;;  %v6936_v25 = vld [vmem:[#allocation21_spill] sm:$0xff]  ;;  %v6937_v22 = vld [vmem:[#allocation23_spill] sm:$0xff] }
 0x2ba   : > { %v2187_v28 = vmul.f32 %v6110_v33, %v2151_v52  ;;  %v1929_v51 = vadd.f32 %v1928_v0, %v1840_v2  ;;  %v2025_v31 = vpop.f32.mrf.mxu1 }
 0x2bb   : > { %v1845_v27 = vadd.f32 %v1844_v54, %v1756_v32 }
 0x2bc   : > { %v2018_v56 = vadd.f32 %v2017_v46, %v1929_v51  ;;  %v2223_v45 = vadd.f32 %v6117_v1, %v2187_v28 }
 0x2be   : > { %v2107_v26 = vadd.f32 %v2106_v11, %v2018_v56  ;;  %v6339_v42 = vmax.f32 %v2239_v49, %v2223_v45  ;;  %v2114_v30 = vpop.f32.mrf.mxu2 }
 0x2c0   : > { %v2152_v60 = vmax.f32 %v2107_v26, 0.0 }
 0x2c1   : > { %v1931_v3 = vpop.f32.mrf.mxu0 }
 0x2c2   : > { %v2188_v18 = vmul.f32 %v6110_v33, %v2152_v60  ;;  %v1932_v63 = vadd.f32 %v1931_v3, %v6929_v39  ;;  %v2027_v40 = vpop.f32.mrf.mxu1  ;;  %v6935_v60 = vld [vmem:[#allocation22_spill] sm:$0xff] }
 0x2c3   : > { %v1588_v3 = vadd.f32 %v6146_v38, %v6935_v60 }
 0x2c4   : > { %v2021_v48 = vadd.f32 %v2020_v53, %v1932_v63  ;;  %v2224_v37 = vadd.f32 %v6117_v1, %v2188_v18  ;;  %v6934_v53 = vld [vmem:[#allocation20_spill] sm:$0xff] }
 0x2c5   : > { %v1761_v43 = vadd.f32 %v6934_v53, %v1672_v34  ;;  %v1677_v32 = vadd.f32 %v6937_v22, %v1588_v3  ;;  %v6941_v53 = vld [vmem:[#allocation28_spill] sm:$0xff]  ;;  %v5176_v22 = vld [vmem:[%s6888_s5] sm:$0xff] }
 0x2c6   : > { %v2110_v13 = vadd.f32 %v2109_v6, %v2021_v48  ;;  %v6349_v17 = vmax.f32 %v2240_v5, %v2224_v37  ;;  %v1848_v5 = vadd.f32 %v1847_v57, %v6932_v4  ;;  %v2116_v2 = vpop.f32.mrf.mxu2 }
 0x2c7   : > { %v1850_v0 = vadd.f32 %v1849_v58, %v1761_v43 }
 0x2c8   : > { %v2153_v49 = vmax.f32 %v2110_v13, 0.0  ;;  %v6938_v13 = vld [vmem:[#allocation24_spill] sm:$0xff] }
 0x2c9   : > { %v1933_v46 = vpop.f32.mrf.mxu0 }
 0x2ca   : > { %v2189_v14 = vmul.f32 %v6110_v33, %v2153_v49  ;;  %v1934_v11 = vadd.f32 %v1933_v46, %v1845_v27  ;;  %v1766_v27 = vadd.f32 %v6938_v13, %v1677_v32  ;;  %v5182_v32 = vld [vmem:[%s6888_s5 + $0x30] sm:$0xff] }
 0x2cc   : > { %v2023_v44 = vadd.f32 %v2022_v55, %v1934_v11  ;;  %v2225_v41 = vadd.f32 %v6117_v1, %v2189_v14  ;;  %v2030_v55 = vpop.f32.mrf.mxu1 }
 0x2ce   : > { %v2112_v35 = vadd.f32 %v2111_v20, %v2023_v44  ;;  %v2249_v24 = vmax.f32 %v6279_v47, %v2225_v41  ;;  %v1852_v47 = vpop.f32.mrf.mxu3 }
 0x2cf   : > { %v1853_v18 = vadd.f32 %v1852_v47, %v6936_v25 }
 0x2d0   : > { %v2154_v29 = vmax.f32 %v2112_v35, 0.0 }
 0x2d1   : > { %v1936_v61 = vpop.f32.mrf.mxu0 }
 0x2d2   : > { %v1937_v59 = vadd.f32 %v1936_v61, %v1848_v5  ;;  %v2190_v9 = vmul.f32 %v6110_v33, %v2154_v29  ;;  %v6939_v5 = vld [vmem:[#allocation26_spill] sm:$0xff] }
 0x2d3   : > { %v1593_v29 = vadd.f32 %v6146_v38, %v6939_v5 }
 0x2d4   : > { %v2026_v6 = vadd.f32 %v2025_v31, %v1937_v59  ;;  %v2226_v8 = vadd.f32 %v6117_v1, %v2190_v9 }
 0x2d5   : > { %v1682_v43 = vadd.f32 %v6941_v53, %v1593_v29  ;;  %v5218_v29 = vld [vmem:[%s6889_s6 + $0x30] sm:$0xff] }
 0x2d6   : > { %v2115_v52 = vadd.f32 %v2114_v30, %v2026_v6  ;;  %v2250_v54 = vmax.f32 %v6289_v7, %v2226_v8  ;;  %v2119_v7 = vpop.f32.mrf.mxu2  ;;  %v1854_v63 = vpop.f32.mrf.mxu3 }
 0x2d7   : > { %v1855_v11 = vadd.f32 %v1854_v63, %v1766_v27 }
 0x2d8   : > { %v2155_v28 = vmax.f32 %v2115_v52, 0.0  ;;  %v6362_v51 = vpack.c.bf16 %v2250_v54, %v2249_v24  ;;  %v6942_v52 = vld [vmem:[#allocation27_spill] sm:$0xff] }
 0x2d9   : > { %v1938_v56 = vpop.f32.mrf.mxu0  ;;  %v1771_v54 = vadd.f32 %v6942_v52, %v1682_v43 }
 0x2da   : > { %v2191_v45 = vmul.f32 %v6110_v33, %v2155_v28  ;;  %v1939_v12 = vadd.f32 %v1938_v56, %v1850_v0 }
 0x2dc   : > { %v2028_v62 = vadd.f32 %v2027_v40, %v1939_v12  ;;  %v2227_v26 = vadd.f32 %v6117_v1, %v2191_v45 }
 0x2de   : > { %v2117_v20 = vadd.f32 %v2116_v2, %v2028_v62  ;;  %v2251_v23 = vmax.f32 %v6299_v10, %v2227_v26  ;;  %v2032_v10 = vpop.f32.mrf.mxu1  ;;  %v2121_v41 = vpop.f32.mrf.mxu2 }
 0x2df   : > { %v1857_v35 = vpop.f32.mrf.mxu3 }
 0x2e0   : > { %v2156_v39 = vmax.f32 %v2117_v20, 0.0 }
 0x2e1   : > { %v1941_v57 = vpop.f32.mrf.mxu0 }
 0x2e2   : > { %v2192_v48 = vmul.f32 %v6110_v33, %v2156_v39  ;;  %v1942_v37 = vadd.f32 %v1941_v57, %v1853_v18 }
 0x2e4   : > { %v2031_v49 = vadd.f32 %v2030_v55, %v1942_v37  ;;  %v2228_v46 = vadd.f32 %v6117_v1, %v2192_v48  ;;  %v5183_v48 = vld [vmem:[%s6888_s5 + $0x38] sm:$0xff]  ;;  %v5184_v37 = vld [vmem:[%s6888_s5 + $0x40] sm:$0xff] }
 0x2e6   : > { %v2120_v31 = vadd.f32 %v2119_v7, %v2031_v49  ;;  %v2252_v14 = vmax.f32 %v6309_v16, %v2228_v46  ;;  %v6940_v16 = vld [vmem:[#allocation25_spill] sm:$0xff]  ;;  %v2035_v9 = vpop.f32.mrf.mxu1  ;;  %v2124_v2 = vpop.f32.mrf.mxu2 }
 0x2e7   : > { %v1858_v34 = vadd.f32 %v1857_v35, %v6940_v16  ;;  %v1859_v38 = vpop.f32.mrf.mxu3 }
 0x2e8   : > { %v2157_v30 = vmax.f32 %v2120_v31, 0.0  ;;  %v2330_v44 = vpack.c.bf16 %v2252_v14, %v2251_v23  ;;  %v1860_v56 = vadd.f32 %v1859_v38, %v1771_v54  ;;  %v5185_v31 = vld [vmem:[%s6888_s5 + $0x48] sm:$0xff]  ;;  %v5188_v54 = vld [vmem:[%s6888_s5 + $0x60] sm:$0xff] }
 0x2e9   : > { %v1943_v58 = vpop.f32.mrf.mxu0 }
 0x2ea   : > { %v2193_v36 = vmul.f32 %v6110_v33, %v2157_v30  ;;  %v1944_v21 = vadd.f32 %v1943_v58, %v1855_v11 }
 0x2ec   : > { %v2033_v24 = vadd.f32 %v2032_v10, %v1944_v21  ;;  %v2229_v4 = vadd.f32 %v6117_v1, %v2193_v36  ;;  %v5186_v36 = vld [vmem:[%s6888_s5 + $0x50] sm:$0xff] }
 0x2ee   : > { %v2122_v61 = vadd.f32 %v2121_v41, %v2033_v24  ;;  %v2253_v50 = vmax.f32 %v6319_v19, %v2229_v4  ;;  %v2037_v60 = vpop.f32.mrf.mxu1  ;;  %v2126_v23 = vpop.f32.mrf.mxu2  ;;  %v5219_v4 = vld [vmem:[%s6889_s6 + $0x38] sm:$0xff] }
 0x2ef   : > { %5265 = vmatpush.bf16.msra.mxu1 %v5219_v4  ;;  %5266 = vmatpush.bf16.msrb.mxu2 %v5219_v4 }
 0x2f0   : > { %v2158_v59 = vmax.f32 %v2122_v61, 0.0  ;;  %2960 = vmatpush.bf16.msrb.mxu0 %v5219_v4  ;;  %v5217_v61 = vld [vmem:[%s6889_s6 + $0x28] sm:$0xff] }
 0x2f1   : > { %v1946_v40 = vpop.f32.mrf.mxu0 }
 0x2f2   : > { %v2194_v6 = vmul.f32 %v6110_v33, %v2158_v59  ;;  %v1947_v8 = vadd.f32 %v1946_v40, %v1858_v34  ;;  %v5187_v59 = vld [vmem:[%s6888_s5 + $0x58] sm:$0xff] }
 0x2f3   : > { %5267 = vmatpush.bf16.msra.mxu1 %v5218_v29  ;;  %5268 = vmatpush.bf16.msrb.mxu2 %v5218_v29 }
 0x2f4   : > { %v2036_v47 = vadd.f32 %v2035_v9, %v1947_v8  ;;  %v2230_v0 = vadd.f32 %v6117_v1, %v2194_v6  ;;  %2961 = vmatpush.bf16.msrb.mxu0 %v5218_v29  ;;  %v5216_v9 = vld [vmem:[%s6889_s6 + $0x20] sm:$0xff] }
 0x2f6   : > { %v2125_v28 = vadd.f32 %v2124_v2, %v2036_v47  ;;  %v2254_v19 = vmax.f32 %v6329_v15, %v2230_v0 }
 0x2f7   : > { %5269 = vmatpush.bf16.msra.mxu1 %v5217_v61  ;;  %5270 = vmatpush.bf16.msrb.mxu2 %v5217_v61 }
 0x2f8   : > { %v2159_v45 = vmax.f32 %v2125_v28, 0.0  ;;  %v2331_v12 = vpack.c.bf16 %v2254_v19, %v2253_v50  ;;  %2962 = vmatpush.bf16.msrb.mxu0 %v5217_v61 }
 0x2f9   : > { %v1948_v62 = vpop.f32.mrf.mxu0 }
 0x2fa   : > { %v2195_v26 = vmul.f32 %v6110_v33, %v2159_v45  ;;  %v1949_v55 = vadd.f32 %v1948_v62, %v1860_v56 }
 0x2fb   : > { %5271 = vmatpush.bf16.msra.mxu1 %v5216_v9  ;;  %5272 = vmatpush.bf16.msrb.mxu2 %v5216_v9 }
 0x2fc   : > { %v2038_v3 = vadd.f32 %v2037_v60, %v1949_v55  ;;  %v2231_v20 = vadd.f32 %v6117_v1, %v2195_v26  ;;  %2963 = vmatpush.bf16.msrb.mxu0 %v5216_v9  ;;  %v5215_v60 = vld [vmem:[%s6889_s6 + $0x18] sm:$0xff] }
 0x2fe   : > { %v2127_v7 = vadd.f32 %v2126_v23, %v2038_v3  ;;  %v2255_v25 = vmax.f32 %v6339_v42, %v2231_v20  ;;  %v5179_v42 = vld [vmem:[%s6888_s5 + $0x18] sm:$0xff]  ;;  %v5214_v20 = vld [vmem:[%s6889_s6 + $0x10] sm:$0xff]  ;;  %v5213_v23 = vld [vmem:[%s6889_s6 + $0x8] sm:$0xff] }
 0x2ff   : > { %3045 = vmatpush.bf16.msrb.mxu1 %v5215_v60 }
 0x300   : > { %v2160_v18 = vmax.f32 %v2127_v7, 0.0 }
 0x302   : > { %v2196_v39 = vmul.f32 %v6110_v33, %v2160_v18  ;;  %v5177_v33 = vld [vmem:[%s6888_s5 + $0x8] sm:$0xff] }
 0x303   : > { %3046 = vmatpush.bf16.msrb.mxu1 %v5214_v20 }
 0x304   : > { %v2232_v15 = vadd.f32 %v6117_v1, %v2196_v39  ;;  %v5178_v1 = vld [vmem:[%s6888_s5 + $0x10] sm:$0xff] }
 0x305   : > { %v5190_v39 = vld [vmem:[%s6888_s5 + $0x70] sm:$0xff] }
 0x306   : > { %v2256_v63 = vmax.f32 %v6349_v17, %v2232_v15  ;;  %v5180_v17 = vld [vmem:[%s6888_s5 + $0x20] sm:$0xff] }
 0x307   : > { %3047 = vmatpush.bf16.msrb.mxu1 %v5213_v23  ;;  %v5212_v15 = vld [vmem:[%s6889_s6] sm:$0xff] }
 0x308   : > { %v2332_v57 = vpack.c.bf16 %v2256_v63, %v2255_v25  ;;  %v5196_v23 = vld [vmem:[%s6888_s5 + $0xa0] sm:$0xff] }
 0x30a   : > { %2626 = vmatpush.bf16.msrb.mxu3 %v2332_v57 }
 0x30b   : > { %3048 = vmatpush.bf16.msrb.mxu1 %v5212_v15 }
 0x30e   : > { %2627 = vmatpush.bf16.msrb.mxu3 %v2331_v12  ;;  %v5189_v12 = vld [vmem:[%s6888_s5 + $0x68] sm:$0xff] }
 0x312   : > { %2628 = vmatpush.bf16.msrb.mxu3 %v2330_v44 }
 0x316   : > { %2629 = vmatpush.bf16.msrb.mxu3 %v6362_v51  ;;  %v5181_v51 = vld [vmem:[%s6888_s5 + $0x28] sm:$0xff] }
 0x319   : > { %4729 = vmatmul.msk.bf16.vlgmr.msrb.gmra.mxu3 %vm2513_vm1, %v5176_v22 }
 0x329   : > { %4730 = vmatmul.msk.bf16.gmra.mxu3 %vm2513_vm1, %v5177_v33  ;;  %v5223_v33 = vld [vmem:[%s6889_s6 + $0x58] sm:$0xff] }
 0x32a   : > { %3139 = vmatpush.bf16.msra.mxu2 %v5223_v33 }
 0x339   : > { %4731 = vmatmul.msk.bf16.gmra.mxu3 %vm2513_vm1, %v5178_v1 }
 0x349   : > { %4732 = vmatmul.msk.bf16.gmra.mxu3 %vm2513_vm1, %v5179_v42  ;;  %v5222_v42 = vld [vmem:[%s6889_s6 + $0x50] sm:$0xff] }
 0x34a   : > { %3140 = vmatpush.bf16.msra.mxu2 %v5222_v42 }
 0x359   : > { %4733 = vmatmul.msk.bf16.gmra.mxu3 %vm2513_vm1, %v5180_v17  ;;  %v5221_v17 = vld [vmem:[%s6889_s6 + $0x48] sm:$0xff] }
 0x35a   : > { %3141 = vmatpush.bf16.msra.mxu2 %v5221_v17 }
 0x369   : > { %4734 = vmatmul.msk.bf16.gmra.mxu3 %vm2513_vm1, %v5181_v51 }
 0x379   : > { %4735 = vmatmul.msk.bf16.gmra.mxu3 %vm2513_vm1, %v5182_v32 }
 0x389   : > { %4736 = vmatmul.msk.bf16.gmra.mxu3 %vm2513_vm1, %v5183_v48 }
 0x399   : > { %4737 = vmatmul.msk.bf16.gmra.mxu3 %vm2513_vm1, %v5184_v37  ;;  %v5191_v37 = vld [vmem:[%s6888_s5 + $0x78] sm:$0xff] }
 0x39c   : > { %v2631_v13 = vpop.f32.mrf.mxu3 }
 0x39d   : > { %v2811_v27 = vpack.c.bf16 %v2631_v13, %v2631_v13  ;;  %v5220_v13 = vld [vmem:[%s6889_s6 + $0x40] sm:$0xff] }
 0x39e   : > { %3142 = vmatpush.bf16.msra.mxu2 %v5220_v13 }
 0x39f   : > { %v6432_v14 = vunpack.c.l.b16 %v2811_v27 }
 0x3a4   : > { %v2633_v49 = vpop.f32.mrf.mxu3 }
 0x3a5   : > { %v2812_v46 = vpack.c.bf16 %v2633_v49, %v2633_v49 }
 0x3a7   : > { %v6434_v10 = vunpack.c.l.b16 %v2812_v46 }
 0x3a9   : > { %v3001_v11 = vpack.c.b16 %v6434_v10, %v6432_v14  ;;  %4738 = vmatmul.msk.bf16.gmra.mxu3 %vm2513_vm1, %v5185_v31 }
 0x3ac   : > { %v2636_v30 = vpop.f32.mrf.mxu3 }
 0x3ad   : > { %v2813_v44 = vpack.c.bf16 %v2636_v30, %v2636_v30 }
 0x3af   : > { %v6442_v21 = vunpack.c.l.b16 %v2813_v44 }
 0x3b4   : > { %v2638_v41 = vpop.f32.mrf.mxu3 }
 0x3b5   : > { %v2814_v58 = vpack.c.bf16 %v2638_v41, %v2638_v41 }
 0x3b7   : > { %v6444_v35 = vunpack.c.l.b16 %v2814_v58  ;;  %v5192_v58 = vld [vmem:[%s6888_s5 + $0x80] sm:$0xff] }
 0x3b9   : > { %v3002_v24 = vpack.c.b16 %v6444_v35, %v6442_v21  ;;  %4739 = vmatmul.msk.bf16.gmra.mxu3 %vm2513_vm1, %v5186_v36  ;;  %v5226_v35 = vld [vmem:[%s6889_s6 + $0x70] sm:$0xff] }
 0x3bc   : > { %v2641_v5 = vpop.f32.mrf.mxu3 }
 0x3bd   : > { %v2815_v50 = vpack.c.bf16 %v2641_v5, %v2641_v5 }
 0x3bf   : > { %v6464_v40 = vunpack.c.l.b16 %v2815_v50 }
 0x3c4   : > { %v2643_v16 = vpop.f32.mrf.mxu3 }
 0x3c5   : > { %v2816_v34 = vpack.c.bf16 %v2643_v16, %v2643_v16 }
 0x3c7   : > { %v6466_v53 = vunpack.c.l.b16 %v2816_v34  ;;  %v5193_v34 = vld [vmem:[%s6888_s5 + $0x88] sm:$0xff] }
 0x3c9   : > { %v3003_v43 = vpack.c.b16 %v6466_v53, %v6464_v40  ;;  %4740 = vmatmul.msk.bf16.gmra.mxu3 %vm2513_vm1, %v5187_v59  ;;  %v5195_v40 = vld [vmem:[%s6888_s5 + $0x98] sm:$0xff]  ;;  %v5224_v53 = vld [vmem:[%s6889_s6 + $0x60] sm:$0xff] }
 0x3cc   : > { %v2646_v6 = vpop.f32.mrf.mxu3 }
 0x3cd   : > { %v2817_v8 = vpack.c.bf16 %v2646_v6, %v2646_v6 }
 0x3cf   : > { %v6474_v47 = vunpack.c.l.b16 %v2817_v8 }
 0x3d4   : > { %v2648_v2 = vpop.f32.mrf.mxu3 }
 0x3d5   : > { %v2818_v52 = vpack.c.bf16 %v2648_v2, %v2648_v2  ;;  %v5194_v2 = vld [vmem:[%s6888_s5 + $0x90] sm:$0xff] }
 0x3d7   : > { %v6476_v0 = vunpack.c.l.b16 %v2818_v52 }
 0x3d9   : > { %v3004_v38 = vpack.c.b16 %v6476_v0, %v6474_v47  ;;  %4741 = vmatmul.msk.bf16.gmra.mxu3 %vm2513_vm1, %v5188_v54 }
 0x3dc   : > { %v2651_v28 = vpop.f32.mrf.mxu3 }
 0x3dd   : > { %v2819_v19 = vpack.c.bf16 %v2651_v28, %v2651_v28 }
 0x3df   : > { %v2908_v62 = vunpack.c.l.b16 %v2819_v19  ;;  %v5227_v19 = vld [vmem:[%s6889_s6 + $0x78] sm:$0xff] }
 0x3e0   : > { %3241 = vmatpush.bf16.msra.mxu0 %v5227_v19 }
 0x3e4   : > { %v2653_v56 = vpop.f32.mrf.mxu3  ;;  %3242 = vmatpush.bf16.msra.mxu0 %v5226_v35 }
 0x3e5   : > { %v2820_v45 = vpack.c.bf16 %v2653_v56, %v2653_v56 }
 0x3e7   : > { %v2909_v26 = vunpack.c.l.b16 %v2820_v45 }
 0x3e9   : > { %v2916_v55 = vpack.c.b16 %v2909_v26, %v2908_v62  ;;  %4742 = vmatmul.msk.bf16.gmra.mxu3 %vm2513_vm1, %v5189_v12 }
 0x3eb   : > { %4789 = vmatmul.msk.bf16.vlgmr.msrb.gmra.mxu0 %vm2513_vm1, %v2916_v55 }
 0x3ec   : > { %v2656_v3 = vpop.f32.mrf.mxu3 }
 0x3ed   : > { %v2821_v7 = vpack.c.bf16 %v2656_v3, %v2656_v3 }
 0x3ef   : > { %v2910_v63 = vunpack.c.l.b16 %v2821_v7 }
 0x3f4   : > { %v2658_v25 = vpop.f32.mrf.mxu3 }
 0x3f5   : > { %v2822_v18 = vpack.c.bf16 %v2658_v25, %v2658_v25 }
 0x3f7   : > { %v2911_v57 = vunpack.c.l.b16 %v2822_v18 }
 0x3f9   : > { %v2917_v22 = vpack.c.b16 %v2911_v57, %v2910_v63  ;;  %4743 = vmatmul.msk.bf16.gmra.mxu3 %vm2513_vm1, %v5190_v39 }
 0x3fb   : > { %4790 = vmatmul.msk.bf16.vlgmr.msra.gmra.mxu1 %vm2513_vm1, %v2917_v22 }
 0x3fc   : > { %v2661_v1 = vpop.f32.mrf.mxu3 }
 0x3fd   : > { %v2823_v51 = vpack.c.bf16 %v2661_v1, %v2661_v1 }
 0x3ff   : > { %v2912_v27 = vunpack.c.l.b16 %v2823_v51  ;;  %v5198_v51 = vld [vmem:[%s6888_s5 + $0xb0] sm:$0xff] }
 0x404   : > { %v2663_v32 = vpop.f32.mrf.mxu3 }
 0x405   : > { %v2824_v48 = vpack.c.bf16 %v2663_v32, %v2663_v32 }
 0x407   : > { %v2913_v49 = vunpack.c.l.b16 %v2824_v48 }
 0x409   : > { %v2918_v46 = vpack.c.b16 %v2913_v49, %v2912_v27  ;;  %4744 = vmatmul.msk.bf16.gmra.mxu3 %vm2513_vm1, %v5191_v37  ;;  %v5231_v27 = vld [vmem:[%s6889_s6 + $0x98] sm:$0xff] }
 0x40a   : > { %3343 = vmatpush.bf16.msra.mxu1 %v5231_v27 }
 0x40b   : > { %4791 = vmatmul.msk.bf16.gmra.mxu1 %vm2513_vm1, %v2918_v46  ;;  %v5230_v46 = vld [vmem:[%s6889_s6 + $0x90] sm:$0xff] }
 0x40c   : > { %v2666_v31 = vpop.f32.mrf.mxu3 }
 0x40d   : > { %v2825_v30 = vpack.c.bf16 %v2666_v31, %v2666_v31 }
 0x40e   : > { %3344 = vmatpush.bf16.msra.mxu1 %v5230_v46 }
 0x40f   : > { %v2914_v36 = vunpack.c.l.b16 %v2825_v30  ;;  %v5229_v30 = vld [vmem:[%s6889_s6 + $0x88] sm:$0xff] }
 0x412   : > { %3345 = vmatpush.bf16.msra.mxu1 %v5229_v30  ;;  %v5203_v30 = vld [vmem:[%s6888_s5 + $0xd8] sm:$0xff] }
 0x414   : > { %v2668_v44 = vpop.f32.mrf.mxu3 }
 0x415   : > { %v2826_v41 = vpack.c.bf16 %v2668_v44, %v2668_v44 }
 0x417   : > { %v2915_v4 = vunpack.c.l.b16 %v2826_v41 }
 0x419   : > { %v2919_v5 = vpack.c.b16 %v2915_v4, %v2914_v36  ;;  %4745 = vmatmul.msk.bf16.gmra.mxu3 %vm2513_vm1, %v5192_v58  ;;  %v5199_v36 = vld [vmem:[%s6888_s5 + $0xb8] sm:$0xff]  ;;  %v5228_v4 = vld [vmem:[%s6889_s6 + $0x80] sm:$0xff] }
 0x41a   : > { %3346 = vmatpush.bf16.msra.mxu1 %v5228_v4 }
 0x41b   : > { %4792 = vmatmul.msk.bf16.vlgmr.msrb.gmra.mxu2 %vm2513_vm1, %v2919_v5  ;;  %4809 = vmatmul.msk.bf16.vlgmr.msrb.gmra.mxu1 %vm2513_vm1, %v3001_v11 }
 0x41c   : > { %v2671_v29 = vpop.f32.mrf.mxu3 }
 0x41d   : > { %v2827_v61 = vpack.c.bf16 %v2671_v29, %v2671_v29 }
 0x41f   : > { %v3087_v59 = vunpack.c.l.b16 %v2827_v61 }
 0x424   : > { %v2673_v50 = vpop.f32.mrf.mxu3 }
 0x425   : > { %v2828_v16 = vpack.c.bf16 %v2673_v50, %v2673_v50 }
 0x427   : > { %v3088_v9 = vunpack.c.l.b16 %v2828_v16 }
 0x429   : > { %v3095_v6 = vpack.c.b16 %v3088_v9, %v3087_v59  ;;  %4746 = vmatmul.msk.bf16.gmra.mxu3 %vm2513_vm1, %v5193_v34 }
 0x42b   : > { %4837 = vmatmul.msk.bf16.vlgmr.msra.gmra.mxu2 %vm2513_vm1, %v3095_v6  ;;  %4810 = vmatmul.msk.bf16.gmra.mxu1 %vm2513_vm1, %v3002_v24  ;;  %v5225_v24 = vld [vmem:[%s6889_s6 + $0x68] sm:$0xff] }
 0x42c   : > { %v2676_v14 = vpop.f32.mrf.mxu3  ;;  %3243 = vmatpush.bf16.msra.mxu0 %v5225_v24 }
 0x42d   : > { %v2829_v10 = vpack.c.bf16 %v2676_v14, %v2676_v14  ;;  %v5200_v14 = vld [vmem:[%s6888_s5 + $0xc0] sm:$0xff] }
 0x42f   : > { %v3089_v52 = vunpack.c.l.b16 %v2829_v10 }
 0x430   : > { %3244 = vmatpush.bf16.msra.mxu0 %v5224_v53 }
 0x434   : > { %v2678_v11 = vpop.f32.mrf.mxu3 }
 0x435   : > { %v2830_v8 = vpack.c.bf16 %v2678_v11, %v2678_v11 }
 0x437   : > { %v3090_v54 = vunpack.c.l.b16 %v2830_v8 }
 0x439   : > { %v3096_v28 = vpack.c.b16 %v3090_v54, %v3089_v52  ;;  %4747 = vmatmul.msk.bf16.gmra.mxu3 %vm2513_vm1, %v5194_v2 }
 0x43b   : > { %4838 = vmatmul.msk.bf16.gmra.mxu2 %vm2513_vm1, %v3096_v28  ;;  %4811 = vmatmul.msk.bf16.gmra.mxu1 %vm2513_vm1, %v3003_v43 }
 0x43c   : > { %v2681_v21 = vpop.f32.mrf.mxu3 }
 0x43d   : > { %v2831_v56 = vpack.c.bf16 %v2681_v21, %v2681_v21 }
 0x43f   : > { %v3091_v43 = vunpack.c.l.b16 %v2831_v56 }
 0x444   : > { %v2683_v45 = vpop.f32.mrf.mxu3 }
 0x445   : > { %v2832_v12 = vpack.c.bf16 %v2683_v45, %v2683_v45 }
 0x447   : > { %v3092_v62 = vunpack.c.l.b16 %v2832_v12 }
 0x449   : > { %v3097_v26 = vpack.c.b16 %v3092_v62, %v3091_v43  ;;  %4748 = vmatmul.msk.bf16.gmra.mxu3 %vm2513_vm1, %v5195_v40  ;;  %v5201_v40 = vld [vmem:[%s6888_s5 + $0xc8] sm:$0xff] }
 0x44b   : > { %4839 = vmatmul.msk.bf16.gmra.mxu2 %vm2513_vm1, %v3097_v26  ;;  %4812 = vmatmul.msk.bf16.gmra.mxu1 %vm2513_vm1, %v3004_v38  ;;  %v5197_v38 = vld [vmem:[%s6888_s5 + $0xa8] sm:$0xff] }
 0x44c   : > { %v2686_v55 = vpop.f32.mrf.mxu3 }
 0x44d   : > { %v2833_v60 = vpack.c.bf16 %v2686_v55, %v2686_v55 }
 0x44f   : > { %v3093_v7 = vunpack.c.l.b16 %v2833_v60 }
 0x454   : > { %v2688_v3 = vpop.f32.mrf.mxu3 }
 0x455   : > { %v2834_v20 = vpack.c.bf16 %v2688_v3, %v2688_v3 }
 0x457   : > { %v3094_v25 = vunpack.c.l.b16 %v2834_v20 }
 0x459   : > { %v3098_v18 = vpack.c.b16 %v3094_v25, %v3093_v7  ;;  %4749 = vmatmul.msk.bf16.gmra.mxu3 %vm2513_vm1, %v5196_v23 }
 0x45b   : > { %4840 = vmatmul.msk.bf16.gmra.mxu2 %vm2513_vm1, %v3098_v18 }
 0x45c   : > { %v2691_v39 = vpop.f32.mrf.mxu3 }
 0x45d   : > { %v2835_v15 = vpack.c.bf16 %v2691_v39, %v2691_v39 }
 0x45f   : > { %v3189_v63 = vunpack.c.l.b16 %v2835_v15  ;;  %v5202_v15 = vld [vmem:[%s6888_s5 + $0xd0] sm:$0xff] }
 0x464   : > { %v2693_v47 = vpop.f32.mrf.mxu3 }
 0x465   : > { %v2836_v0 = vpack.c.bf16 %v2693_v47, %v2693_v47 }
 0x467   : > { %v3190_v57 = vunpack.c.l.b16 %v2836_v0 }
 0x468   : > { %v2965_v10 = vpop.f32.mrf.mxu0 }
 0x469   : > { %v3197_v22 = vpack.c.b16 %v3190_v57, %v3189_v63  ;;  %4750 = vmatmul.msk.bf16.gmra.mxu3 %vm2513_vm1, %v5197_v38 }
 0x46b   : > { %4865 = vmatmul.msk.bf16.vlgmr.msra.gmra.mxu0 %vm2513_vm1, %v3197_v22 }
 0x46c   : > { %v2696_v33 = vpop.f32.mrf.mxu3 }
 0x46d   : > { %v2837_v1 = vpack.c.bf16 %v2696_v33, %v2696_v33 }
 0x46f   : > { %v3191_v32 = vunpack.c.l.b16 %v2837_v1  ;;  %v5235_v1 = vld [vmem:[%s6889_s6 + $0xb8] sm:$0xff] }
 0x470   : > { %v2967_v21 = vpop.f32.mrf.mxu0  ;;  %3445 = vmatpush.bf16.msrb.mxu2 %v5235_v1 }
 0x474   : > { %v2698_v42 = vpop.f32.mrf.mxu3 }
 0x475   : > { %v2838_v17 = vpack.c.bf16 %v2698_v42, %v2698_v42 }
 0x477   : > { %v3192_v48 = vunpack.c.l.b16 %v2838_v17 }
 0x478   : > { %v2970_v37 = vpop.f32.mrf.mxu1 }
 0x479   : > { %v3198_v13 = vpack.c.b16 %v3192_v48, %v3191_v32  ;;  %4751 = vmatmul.msk.bf16.gmra.mxu3 %vm2513_vm1, %v5198_v51  ;;  %v5234_v51 = vld [vmem:[%s6889_s6 + $0xb0] sm:$0xff] }
 0x47a   : > { %3446 = vmatpush.bf16.msrb.mxu2 %v5234_v51 }
 0x47b   : > { %4866 = vmatmul.msk.bf16.gmra.mxu0 %vm2513_vm1, %v3198_v13 }
 0x47c   : > { %v2701_v49 = vpop.f32.mrf.mxu3 }
 0x47d   : > { %v2839_v44 = vpack.c.bf16 %v2701_v49, %v2701_v49 }
 0x47f   : > { %v3193_v5 = vunpack.c.l.b16 %v2839_v44 }
 0x480   : > { %v6589_v31 = vpop.f32.mrf.mxu1 }
 0x484   : > { %v2703_v41 = vpop.f32.mrf.mxu3 }
 0x485   : > { %v2840_v58 = vpack.c.bf16 %v2703_v41, %v2703_v41  ;;  %v5232_v41 = vld [vmem:[%s6889_s6 + $0xa0] sm:$0xff] }
 0x487   : > { %v3194_v29 = vunpack.c.l.b16 %v2840_v58 }
 0x488   : > { %v2975_v61 = vpop.f32.mrf.mxu1 }
 0x489   : > { %v3199_v50 = vpack.c.b16 %v3194_v29, %v3193_v5  ;;  %4752 = vmatmul.msk.bf16.gmra.mxu3 %vm2513_vm1, %v5199_v36 }
 0x48b   : > { %4867 = vmatmul.msk.bf16.gmra.mxu0 %vm2513_vm1, %v3199_v50 }
 0x48c   : > { %v2706_v16 = vpop.f32.mrf.mxu3 }
 0x48d   : > { %v2841_v59 = vpack.c.bf16 %v2706_v16, %v2706_v16 }
 0x48f   : > { %v3195_v11 = vunpack.c.l.b16 %v2841_v59 }
 0x490   : > { %v6602_v34 = vpop.f32.mrf.mxu1 }
 0x494   : > { %v2708_v9 = vpop.f32.mrf.mxu3 }
 0x495   : > { %v2842_v6 = vpack.c.bf16 %v2708_v9, %v2708_v9 }
 0x497   : > { %v3196_v8 = vunpack.c.l.b16 %v2842_v6 }
 0x498   : > { %v3050_v2 = vpop.f32.mrf.mxu1 }
 0x499   : > { %v3200_v52 = vpack.c.b16 %v3196_v8, %v3195_v11  ;;  %4753 = vmatmul.msk.bf16.gmra.mxu3 %vm2513_vm1, %v5200_v14  ;;  %v3051_v54 = vadd.f32 %v3050_v2, %v2965_v10  ;;  %v5204_v10 = vld [vmem:[%s6888_s5 + $0xe0] sm:$0xff] }
 0x49b   : > { %4868 = vmatmul.msk.bf16.gmra.mxu0 %vm2513_vm1, %v3200_v52 }
 0x49c   : > { %v2711_v28 = vpop.f32.mrf.mxu3 }
 0x49d   : > { %v2843_v56 = vpack.c.bf16 %v2711_v28, %v2711_v28 }
 0x49e   : > { %v2980_v19 = vpop.f32.mrf.mxu2 }
 0x49f   : > { %v3291_v43 = vunpack.c.l.b16 %v2843_v56  ;;  %v5205_v56 = vld [vmem:[%s6888_s5 + $0xe8] sm:$0xff] }
 0x4a0   : > { %v3052_v35 = vpop.f32.mrf.mxu1 }
 0x4a1   : > { %v3053_v24 = vadd.f32 %v3052_v35, %v2967_v21 }
 0x4a4   : > { %v2713_v45 = vpop.f32.mrf.mxu3 }
 0x4a5   : > { %v2844_v12 = vpack.c.bf16 %v2713_v45, %v2713_v45 }
 0x4a6   : > { %v6612_v53 = vpop.f32.mrf.mxu2 }
 0x4a7   : > { %v3292_v62 = vunpack.c.l.b16 %v2844_v12 }
 0x4a8   : > { %v3055_v26 = vpop.f32.mrf.mxu1 }
 0x4a9   : > { %v3299_v55 = vpack.c.b16 %v3292_v62, %v3291_v43  ;;  %4754 = vmatmul.msk.bf16.gmra.mxu3 %vm2513_vm1, %v5201_v40  ;;  %v3056_v60 = vadd.f32 %v3055_v26, %v2970_v37  ;;  %v5233_v37 = vld [vmem:[%s6889_s6 + $0xa8] sm:$0xff] }
 0x4aa   : > { %3447 = vmatpush.bf16.msrb.mxu2 %v5233_v37 }
 0x4ab   : > { %4893 = vmatmul.msk.bf16.vlgmr.msra.gmra.mxu1 %vm2513_vm1, %v3299_v55 }
 0x4ac   : > { %v2716_v3 = vpop.f32.mrf.mxu3 }
 0x4ad   : > { %v2845_v25 = vpack.c.bf16 %v2716_v3, %v2716_v3 }
 0x4ae   : > { %v3144_v20 = vpop.f32.mrf.mxu2  ;;  %3448 = vmatpush.bf16.msrb.mxu2 %v5232_v41 }
 0x4af   : > { %v6616_v23 = vadd.f32 %v3144_v20, %v3051_v54  ;;  %v3293_v0 = vunpack.c.l.b16 %v2845_v25  ;;  %v5239_v25 = vld [vmem:[%s6889_s6 + $0xd8] sm:$0xff] }
 0x4b0   : > { %v3057_v7 = vpop.f32.mrf.mxu1  ;;  %3547 = vmatpush.bf16.msrb.mxu0 %v5239_v25 }
 0x4b1   : > { %v3058_v49 = vadd.f32 %v3057_v7, %v6589_v31 }
 0x4b4   : > { %v2718_v18 = vpop.f32.mrf.mxu3 }
 0x4b5   : > { %v2846_v39 = vpack.c.bf16 %v2718_v18, %v2718_v18 }
 0x4b6   : > { %v3146_v47 = vpop.f32.mrf.mxu2 }
 0x4b7   : > { %v3294_v38 = vunpack.c.l.b16 %v2846_v39  ;;  %v6621_v63 = vadd.f32 %v3146_v47, %v3053_v24  ;;  %v5238_v39 = vld [vmem:[%s6889_s6 + $0xd0] sm:$0xff] }
 0x4b8   : > { %v3060_v57 = vpop.f32.mrf.mxu1  ;;  %3548 = vmatpush.bf16.msrb.mxu0 %v5238_v39 }
 0x4b9   : > { %v3300_v22 = vpack.c.b16 %v3294_v38, %v3293_v0  ;;  %4755 = vmatmul.msk.bf16.gmra.mxu3 %vm2513_vm1, %v5202_v15  ;;  %v3061_v33 = vadd.f32 %v3060_v57, %v2975_v61  ;;  %v5237_v15 = vld [vmem:[%s6889_s6 + $0xc8] sm:$0xff]  ;;  %v5207_v57 = vld [vmem:[%s6888_s5 + $0xf8] sm:$0xff] }
 0x4bb   : > { %4894 = vmatmul.msk.bf16.gmra.mxu1 %vm2513_vm1, %v3300_v22  ;;  %v5236_v22 = vld [vmem:[%s6889_s6 + $0xc0] sm:$0xff] }
 0x4bc   : > { %v2721_v42 = vpop.f32.mrf.mxu3  ;;  %3549 = vmatpush.bf16.msrb.mxu0 %v5237_v15 }
 0x4bd   : > { %v2847_v13 = vpack.c.bf16 %v2721_v42, %v2721_v42 }
 0x4be   : > { %v3149_v17 = vpop.f32.mrf.mxu2 }
 0x4bf   : > { %v6631_v32 = vadd.f32 %v3149_v17, %v3056_v60  ;;  %v3295_v58 = vunpack.c.l.b16 %v2847_v13  ;;  %v5206_v60 = vld [vmem:[%s6888_s5 + $0xf0] sm:$0xff]  ;;  %v5208_v13 = vld [vmem:[%s6888_s5 + $0x100] sm:$0xff] }
 0x4c0   : > { %v3062_v48 = vpop.f32.mrf.mxu1  ;;  %3550 = vmatpush.bf16.msrb.mxu0 %v5236_v22 }
 0x4c1   : > { %v3063_v6 = vadd.f32 %v3062_v48, %v6602_v34 }
 0x4c4   : > { %v2723_v27 = vpop.f32.mrf.mxu3 }
 0x4c5   : > { %v2848_v46 = vpack.c.bf16 %v2723_v27, %v2723_v27 }
 0x4c6   : > { %v3151_v44 = vpop.f32.mrf.mxu2 }
 0x4c7   : > { %v3296_v36 = vunpack.c.l.b16 %v2848_v46  ;;  %v6643_v4 = vadd.f32 %v3151_v44, %v3058_v49 }
 0x4c8   : > { %v3065_v5 = vpop.f32.mrf.mxu1 }
 0x4c9   : > { %v3301_v29 = vpack.c.b16 %v3296_v36, %v3295_v58  ;;  %4756 = vmatmul.msk.bf16.gmra.mxu3 %vm2513_vm1, %v5203_v30  ;;  %v3066_v31 = vadd.f32 %v3065_v5, %v2980_v19  ;;  %v5209_v36 = vld [vmem:[%s6888_s5 + $0x108] sm:$0xff] }
 0x4cb   : > { %4895 = vmatmul.msk.bf16.gmra.mxu1 %vm2513_vm1, %v3301_v29 }
 0x4cc   : > { %v2726_v61 = vpop.f32.mrf.mxu3 }
 0x4cd   : > { %v2849_v59 = vpack.c.bf16 %v2726_v61, %v2726_v61 }
 0x4ce   : > { %v3154_v50 = vpop.f32.mrf.mxu2 }
 0x4cf   : > { %v6647_v16 = vadd.f32 %v3154_v50, %v3061_v33  ;;  %v3297_v8 = vunpack.c.l.b16 %v2849_v59 }
 0x4d4   : > { %v2728_v9 = vpop.f32.mrf.mxu3 }
 0x4d5   : > { %v2850_v14 = vpack.c.bf16 %v2728_v9, %v2728_v9 }
 0x4d6   : > { %v3156_v11 = vpop.f32.mrf.mxu2 }
 0x4d7   : > { %v3298_v2 = vunpack.c.l.b16 %v2850_v14  ;;  %v6653_v52 = vadd.f32 %v3156_v11, %v3063_v6  ;;  %v5210_v6 = vld [vmem:[%s6888_s5 + $0x110] sm:$0xff] }
 0x4d9   : > { %v3302_v54 = vpack.c.b16 %v3298_v2, %v3297_v8  ;;  %4757 = vmatmul.msk.bf16.gmra.mxu3 %vm2513_vm1, %v5204_v10  ;;  %v5243_v8 = vld [vmem:[%s6889_s6 + $0xf8] sm:$0xff] }
 0x4da   : > { %3649 = vmatpush.bf16.msrb.mxu1 %v5243_v8 }
 0x4db   : > { %4896 = vmatmul.msk.bf16.gmra.mxu1 %vm2513_vm1, %v3302_v54  ;;  %v5242_v54 = vld [vmem:[%s6889_s6 + $0xf0] sm:$0xff] }
 0x4dc   : > { %v2731_v28 = vpop.f32.mrf.mxu3 }
 0x4dd   : > { %v2851_v34 = vpack.c.bf16 %v2731_v28, %v2731_v28  ;;  %v5241_v28 = vld [vmem:[%s6889_s6 + $0xe8] sm:$0xff] }
 0x4de   : > { %v3159_v19 = vpop.f32.mrf.mxu2  ;;  %3650 = vmatpush.bf16.msrb.mxu1 %v5242_v54 }
 0x4df   : > { %v6657_v21 = vadd.f32 %v3159_v19, %v3066_v31  ;;  %v3393_v45 = vunpack.c.l.b16 %v2851_v34 }
 0x4e2   : > { %3651 = vmatpush.bf16.msrb.mxu1 %v5241_v28 }
 0x4e4   : > { %v2733_v35 = vpop.f32.mrf.mxu3 }
 0x4e5   : > { %v2852_v24 = vpack.c.bf16 %v2733_v35, %v2733_v35 }
 0x4e7   : > { %v3394_v12 = vunpack.c.l.b16 %v2852_v24  ;;  %v5211_v24 = vld [vmem:[%s6888_s5 + $0x118] sm:$0xff] }
 0x4e9   : > { %v3401_v40 = vpack.c.b16 %v3394_v12, %v3393_v45  ;;  %4758 = vmatmul.msk.bf16.gmra.mxu3 %vm2513_vm1, %v5205_v56  ;;  %v5240_v56 = vld [vmem:[%s6889_s6 + $0xe0] sm:$0xff] }
 0x4ea   : > { %3652 = vmatpush.bf16.msrb.mxu1 %v5240_v56 }
 0x4eb   : > { %4921 = vmatmul.msk.bf16.vlgmr.msrb.gmra.mxu2 %vm2513_vm1, %v3401_v40 }
 0x4ec   : > { %v2736_v43 = vpop.f32.mrf.mxu3 }
 0x4ed   : > { %v2853_v62 = vpack.c.bf16 %v2736_v43, %v2736_v43 }
 0x4ef   : > { %v3395_v3 = vunpack.c.l.b16 %v2853_v62 }
 0x4f4   : > { %v2738_v26 = vpop.f32.mrf.mxu3 }
 0x4f5   : > { %v2854_v55 = vpack.c.bf16 %v2738_v26, %v2738_v26 }
 0x4f7   : > { %v3396_v20 = vunpack.c.l.b16 %v2854_v55 }
 0x4f9   : > { %v3402_v7 = vpack.c.b16 %v3396_v20, %v3395_v3  ;;  %4759 = vmatmul.msk.bf16.gmra.mxu3 %vm2513_vm1, %v5206_v60 }
 0x4fb   : > { %4922 = vmatmul.msk.bf16.gmra.mxu2 %vm2513_vm1, %v3402_v7 }
 0x4fc   : > { %v2741_v18 = vpop.f32.mrf.mxu3 }
 0x4fd   : > { %v2855_v47 = vpack.c.bf16 %v2741_v18, %v2741_v18 }
 0x4ff   : > { %v3397_v33 = vunpack.c.l.b16 %v2855_v47 }
 0x504   : > { %v2743_v0 = vpop.f32.mrf.mxu3 }
 0x505   : > { %v2856_v38 = vpack.c.bf16 %v2743_v0, %v2743_v0 }
 0x507   : > { %v3398_v1 = vunpack.c.l.b16 %v2856_v38 }
 0x509   : > { %v3403_v42 = vpack.c.b16 %v3398_v1, %v3397_v33  ;;  %4760 = vmatmul.msk.bf16.gmra.mxu3 %vm2513_vm1, %v5207_v57 }
 0x50b   : > { %4923 = vmatmul.msk.bf16.gmra.mxu2 %vm2513_vm1, %v3403_v42 }
 0x50c   : > { %v2746_v17 = vpop.f32.mrf.mxu3 }
 0x50d   : > { %v2857_v51 = vpack.c.bf16 %v2746_v17, %v2746_v17 }
 0x50f   : > { %v3399_v27 = vunpack.c.l.b16 %v2857_v51  ;;  %v5247_v51 = vld [vmem:[%s6889_s6 + $0x118] sm:$0xff] }
 0x510   : > { %3751 = vmatpush.bf16.msra.mxu2 %v5247_v51 }
 0x514   : > { %v2748_v48 = vpop.f32.mrf.mxu3 }
 0x515   : > { %v2858_v37 = vpack.c.bf16 %v2748_v48, %v2748_v48 }
 0x517   : > { %v3400_v49 = vunpack.c.l.b16 %v2858_v37  ;;  %v5246_v37 = vld [vmem:[%s6889_s6 + $0x110] sm:$0xff] }
 0x518   : > { %3752 = vmatpush.bf16.msra.mxu2 %v5246_v37 }
 0x519   : > { %v3404_v46 = vpack.c.b16 %v3400_v49, %v3399_v27  ;;  %4761 = vmatmul.msk.bf16.gmra.mxu3 %vm2513_vm1, %v5208_v13  ;;  %v5245_v13 = vld [vmem:[%s6889_s6 + $0x108] sm:$0xff] }
 0x51b   : > { %4924 = vmatmul.msk.bf16.gmra.mxu2 %vm2513_vm1, %v3404_v46 }
 0x51c   : > { %v2751_v30 = vpop.f32.mrf.mxu3  ;;  %3753 = vmatpush.bf16.msra.mxu2 %v5245_v13 }
 0x51d   : > { %v2859_v44 = vpack.c.bf16 %v2751_v30, %v2751_v30  ;;  %v5244_v30 = vld [vmem:[%s6889_s6 + $0x100] sm:$0xff] }
 0x51f   : > { %v3495_v5 = vunpack.c.l.b16 %v2859_v44 }
 0x520   : > { %3754 = vmatpush.bf16.msra.mxu2 %v5244_v30 }
 0x524   : > { %v2753_v41 = vpop.f32.mrf.mxu3 }
 0x525   : > { %v2860_v58 = vpack.c.bf16 %v2753_v41, %v2753_v41 }
 0x527   : > { %v3496_v29 = vunpack.c.l.b16 %v2860_v58 }
 0x529   : > { %v3503_v31 = vpack.c.b16 %v3496_v29, %v3495_v5  ;;  %4762 = vmatmul.msk.bf16.gmra.mxu3 %vm2513_vm1, %v5209_v36 }
 0x52b   : > { %4949 = vmatmul.msk.bf16.vlgmr.msrb.gmra.mxu0 %vm2513_vm1, %v3503_v31 }
 0x52c   : > { %v2756_v61 = vpop.f32.mrf.mxu3 }
 0x52d   : > { %v2861_v50 = vpack.c.bf16 %v2756_v61, %v2756_v61 }
 0x52f   : > { %v3497_v14 = vunpack.c.l.b16 %v2861_v50 }
 0x534   : > { %v2758_v59 = vpop.f32.mrf.mxu3 }
 0x535   : > { %v2862_v9 = vpack.c.bf16 %v2758_v59, %v2758_v59 }
 0x537   : > { %v3498_v10 = vunpack.c.l.b16 %v2862_v9 }
 0x539   : > { %v3504_v11 = vpack.c.b16 %v3498_v10, %v3497_v14  ;;  %4763 = vmatmul.msk.bf16.gmra.mxu3 %vm2513_vm1, %v5210_v6 }
 0x53b   : > { %4950 = vmatmul.msk.bf16.gmra.mxu0 %vm2513_vm1, %v3504_v11 }
 0x53c   : > { %v2761_v2 = vpop.f32.mrf.mxu3 }
 0x53d   : > { %v2863_v19 = vpack.c.bf16 %v2761_v2, %v2761_v2 }
 0x53f   : > { %v3499_v45 = vunpack.c.l.b16 %v2863_v19 }
 0x544   : > { %v2763_v34 = vpop.f32.mrf.mxu3 }
 0x545   : > { %v2864_v35 = vpack.c.bf16 %v2763_v34, %v2763_v34 }
 0x547   : > { %v3500_v12 = vunpack.c.l.b16 %v2864_v35 }
 0x549   : > { %v3505_v40 = vpack.c.b16 %v3500_v12, %v3499_v45  ;;  %4764 = vmatmul.msk.bf16.gmra.mxu3 %vm2513_vm1, %v5211_v24 }
 0x54b   : > { %4951 = vmatmul.msk.bf16.gmra.mxu0 %vm2513_vm1, %v3505_v40 }
 0x54c   : > { %v2766_v43 = vpop.f32.mrf.mxu3 }
 0x54d   : > { %v2865_v62 = vpack.c.bf16 %v2766_v43, %v2766_v43 }
 0x54f   : > { %v3501_v60 = vunpack.c.l.b16 %v2865_v62  ;;  %v6737_v62 = vpop.f32.mrf.mxu1 }
 0x554   : > { %v2768_v26 = vpop.f32.mrf.mxu3 }
 0x555   : > { %v2866_v55 = vpack.c.bf16 %v2768_v26, %v2768_v26 }
 0x557   : > { %v3502_v3 = vunpack.c.l.b16 %v2866_v55 }
 0x559   : > { %v3506_v20 = vpack.c.b16 %v3502_v3, %v3501_v60  ;;  %v3246_v3 = vpop.f32.mrf.mxu0 }
 0x55b   : > { %4952 = vmatmul.msk.bf16.gmra.mxu0 %vm2513_vm1, %v3506_v20 }
 0x55c   : > { %v2771_v7 = vpop.f32.mrf.mxu3 }
 0x55d   : > { %v2867_v25 = vpack.c.bf16 %v2771_v7, %v2771_v7  ;;  %v3348_v7 = vpop.f32.mrf.mxu1 }
 0x55f   : > { %v3597_v15 = vunpack.c.l.b16 %v2867_v25 }
 0x564   : > { %v2773_v18 = vpop.f32.mrf.mxu3 }
 0x565   : > { %v2868_v39 = vpack.c.bf16 %v2773_v18, %v2773_v18 }
 0x567   : > { %v3598_v47 = vunpack.c.l.b16 %v2868_v39 }
 0x569   : > { %v3605_v0 = vpack.c.b16 %v3598_v47, %v3597_v15  ;;  %v3248_v15 = vpop.f32.mrf.mxu0 }
 0x56b   : > { %4977 = vmatmul.msk.bf16.vlgmr.msrb.gmra.mxu1 %vm2513_vm1, %v3605_v0 }
 0x56c   : > { %v2776_v38 = vpop.f32.mrf.mxu3 }
 0x56d   : > { %v2869_v57 = vpack.c.bf16 %v2776_v38, %v2776_v38  ;;  %v6740_v38 = vpop.f32.mrf.mxu2 }
 0x56f   : > { %v3599_v1 = vunpack.c.l.b16 %v2869_v57  ;;  %v3350_v57 = vpop.f32.mrf.mxu1 }
 0x574   : > { %v2778_v22 = vpop.f32.mrf.mxu3 }
 0x575   : > { %v2870_v33 = vpack.c.bf16 %v2778_v22, %v2778_v22 }
 0x577   : > { %v3600_v42 = vunpack.c.l.b16 %v2870_v33  ;;  %v3251_v33 = vpop.f32.mrf.mxu0 }
 0x579   : > { %v3606_v17 = vpack.c.b16 %v3600_v42, %v3599_v1  ;;  %v3450_v1 = vpop.f32.mrf.mxu2  ;;  %v3353_v42 = vpop.f32.mrf.mxu1 }
 0x57b   : > { %4978 = vmatmul.msk.bf16.gmra.mxu1 %vm2513_vm1, %v3606_v17 }
 0x57c   : > { %v2781_v48 = vpop.f32.mrf.mxu3 }
 0x57d   : > { %v2871_v27 = vpack.c.bf16 %v2781_v48, %v2781_v48 }
 0x57f   : > { %v3601_v44 = vunpack.c.l.b16 %v2871_v27  ;;  %v3253_v17 = vpop.f32.mrf.mxu0 }
 0x581   : > { %v3452_v51 = vpop.f32.mrf.mxu2  ;;  %v3355_v48 = vpop.f32.mrf.mxu1 }
 0x584   : > { %v2783_v49 = vpop.f32.mrf.mxu3 }
 0x585   : > { %v2872_v46 = vpack.c.bf16 %v2783_v49, %v2783_v49 }
 0x587   : > { %v3602_v41 = vunpack.c.l.b16 %v2872_v46  ;;  %v6743_v37 = vpop.f32.mrf.mxu0 }
 0x589   : > { %v3607_v58 = vpack.c.b16 %v3602_v41, %v3601_v44  ;;  %v3455_v13 = vpop.f32.mrf.mxu2  ;;  %v6745_v27 = vpop.f32.mrf.mxu1 }
 0x58b   : > { %4979 = vmatmul.msk.bf16.gmra.mxu1 %vm2513_vm1, %v3607_v58 }
 0x58c   : > { %v2786_v36 = vpop.f32.mrf.mxu3 }
 0x58d   : > { %v2873_v5 = vpack.c.bf16 %v2786_v36, %v2786_v36 }
 0x58f   : > { %v3603_v61 = vunpack.c.l.b16 %v2873_v5  ;;  %v6747_v49 = vpop.f32.mrf.mxu0 }
 0x591   : > { %v3457_v46 = vpop.f32.mrf.mxu2  ;;  %v6749_v30 = vpop.f32.mrf.mxu1 }
 0x594   : > { %v2788_v29 = vpop.f32.mrf.mxu3 }
 0x595   : > { %v2874_v31 = vpack.c.bf16 %v2788_v29, %v2788_v29 }
 0x597   : > { %v3604_v50 = vunpack.c.l.b16 %v2874_v31  ;;  %v6751_v44 = vpop.f32.mrf.mxu0 }
 0x599   : > { %v3608_v59 = vpack.c.b16 %v3604_v50, %v3603_v61  ;;  %v6753_v41 = vpop.f32.mrf.mxu2  ;;  %v6755_v58 = vpop.f32.mrf.mxu1 }
 0x59b   : > { %4980 = vmatmul.msk.bf16.gmra.mxu1 %vm2513_vm1, %v3608_v59 }
 0x59c   : > { %v2791_v9 = vpop.f32.mrf.mxu3 }
 0x59d   : > { %v2875_v6 = vpack.c.bf16 %v2791_v9, %v2791_v9  ;;  %v3266_v9 = vadd.f32 %v3246_v3, %v6616_v23 }
 0x59f   : > { %v3699_v11 = vunpack.c.l.b16 %v2875_v6  ;;  %v6757_v36 = vpop.f32.mrf.mxu0 }
 0x5a1   : > { %v6759_v5 = vpop.f32.mrf.mxu2  ;;  %v6761_v29 = vpop.f32.mrf.mxu1 }
 0x5a4   : > { %v2793_v14 = vpop.f32.mrf.mxu3 }
 0x5a5   : > { %v2876_v10 = vpack.c.bf16 %v2793_v14, %v2793_v14 }
 0x5a7   : > { %v3700_v8 = vunpack.c.l.b16 %v2876_v10  ;;  %v3368_v10 = vadd.f32 %v3348_v7, %v3266_v9 }
 0x5a8   : > { %v3552_v31 = vpop.f32.mrf.mxu0 }
 0x5a9   : > { %v3707_v2 = vpack.c.b16 %v3700_v8, %v3699_v11  ;;  %v6763_v61 = vpop.f32.mrf.mxu2  ;;  %v3470_v11 = vadd.f32 %v3450_v1, %v3368_v10 }
 0x5ab   : > { %5005 = vmatmul.msk.bf16.vlgmr.msra.gmra.mxu2 %vm2513_vm1, %v3707_v2  ;;  %v3572_v8 = vadd.f32 %v3552_v31, %v3470_v11  ;;  %v3267_v2 = vadd.f32 %v3248_v15, %v6621_v63 }
 0x5ac   : > { %v2796_v54 = vpop.f32.mrf.mxu3 }
 0x5ad   : > { %v2877_v28 = vpack.c.bf16 %v2796_v54, %v2796_v54 }
 0x5af   : > { %v3701_v35 = vunpack.c.l.b16 %v2877_v28  ;;  %v6772_v28 = vld [vmem:[%s6890_s7] ss:$0 sm:$0xff] }
 0x5b0   : > { %v3554_v59 = vpop.f32.mrf.mxu0 }
 0x5b1   : > { %v6766_v6 = vpop.f32.mrf.mxu2 }
 0x5b4   : > { %v2798_v19 = vpop.f32.mrf.mxu3 }
 0x5b5   : > { %v2878_v34 = vpack.c.bf16 %v2798_v19, %v2798_v19 }
 0x5b7   : > { %v3702_v24 = vunpack.c.l.b16 %v2878_v34 }
 0x5b8   : > { %v3557_v19 = vpop.f32.mrf.mxu0 }
 0x5b9   : > { %v3708_v56 = vpack.c.b16 %v3702_v24, %v3701_v35  ;;  %v3369_v35 = vadd.f32 %v3350_v57, %v3267_v2  ;;  %v3269_v57 = vadd.f32 %v3253_v17, %v6643_v4  ;;  %v3270_v4 = vadd.f32 %v6743_v37, %v6647_v16 }
 0x5ba   : > { %v3271_v16 = vadd.f32 %v6747_v49, %v6653_v52  ;;  %v3272_v52 = vadd.f32 %v6751_v44, %v6657_v21 }
 0x5bb   : > { %5006 = vmatmul.msk.bf16.gmra.mxu2 %vm2513_vm1, %v3708_v56  ;;  %v3471_v56 = vadd.f32 %v3452_v51, %v3369_v35 }
 0x5bc   : > { %v2801_v45 = vpop.f32.mrf.mxu3 }
 0x5bd   : > { %v2879_v12 = vpack.c.bf16 %v2801_v45, %v2801_v45  ;;  %v3573_v63 = vadd.f32 %v3554_v59, %v3471_v56 }
 0x5bf   : > { %v3703_v26 = vunpack.c.l.b16 %v2879_v12  ;;  %v6779_v12 = vld [vmem:[%s6891_s8] ss:$0 sm:$0xff] }
 0x5c4   : > { %v2803_v40 = vpop.f32.mrf.mxu3 }
 0x5c5   : > { %v2880_v43 = vpack.c.bf16 %v2803_v40, %v2803_v40 }
 0x5c7   : > { %v3704_v55 = vunpack.c.l.b16 %v2880_v43  ;;  %v6786_v43 = vld [vmem:[%s6892_s9] ss:$0 sm:$0xff] }
 0x5c9   : > { %v3709_v60 = vpack.c.b16 %v3704_v55, %v3703_v26  ;;  %v3268_v26 = vadd.f32 %v3251_v33, %v6631_v32 }
 0x5cb   : > { %5007 = vmatmul.msk.bf16.gmra.mxu2 %vm2513_vm1, %v3709_v60 }
 0x5cc   : > { %v2806_v20 = vpop.f32.mrf.mxu3 }
 0x5cd   : > { %v2881_v25 = vpack.c.bf16 %v2806_v20, %v2806_v20  ;;  %v3370_v20 = vadd.f32 %v3353_v42, %v3268_v26  ;;  %v3371_v42 = vadd.f32 %v3355_v48, %v3269_v57 }
 0x5cf   : > { %v3705_v47 = vunpack.c.l.b16 %v2881_v25  ;;  %v3473_v31 = vadd.f32 %v3457_v46, %v3371_v42 }
 0x5d4   : > { %v2808_v18 = vpop.f32.mrf.mxu3 }
 0x5d5   : > { %v2882_v39 = vpack.c.bf16 %v2808_v18, %v2808_v18  ;;  %v3559_v18 = vpop.f32.mrf.mxu0 }
 0x5d6   : > { %v3575_v9 = vadd.f32 %v3559_v18, %v3473_v31 }
 0x5d7   : > { %v3706_v0 = vunpack.c.l.b16 %v2882_v39  ;;  %v3472_v39 = vadd.f32 %v3455_v13, %v3370_v20 }
 0x5d9   : > { %v3710_v22 = vpack.c.b16 %v3706_v0, %v3705_v47  ;;  %v3574_v32 = vadd.f32 %v3557_v19, %v3472_v39  ;;  %v3068_v39 = vadd.f32 %v6737_v62, %v6612_v53 }
 0x5db   : > { %5008 = vmatmul.msk.bf16.gmra.mxu2 %vm2513_vm1, %v3710_v22  ;;  %v3171_v44 = vadd.f32 %v6740_v38, %v3068_v39 }
 0x5dd   : > { %v3562_v59 = vpop.f32.mrf.mxu0 }
 0x5e8   : > { %v3654_v50 = vpop.f32.mrf.mxu1 }
 0x5e9   : > { %v3674_v54 = vadd.f32 %v3654_v50, %v3572_v8  ;;  %v3372_v8 = vadd.f32 %v6745_v27, %v3270_v4 }
 0x5f0   : > { %v3656_v14 = vpop.f32.mrf.mxu1 }
 0x5f1   : > { %v3675_v55 = vadd.f32 %v3656_v14, %v3573_v63 }
 0x5f8   : > { %v3659_v23 = vpop.f32.mrf.mxu1 }
 0x5f9   : > { %v3676_v22 = vadd.f32 %v3659_v23, %v3574_v32 }
 0x600   : > { %v3661_v47 = vpop.f32.mrf.mxu1 }
 0x601   : > { %v3677_v17 = vadd.f32 %v3661_v47, %v3575_v9 }
 0x608   : > { %v3664_v10 = vpop.f32.mrf.mxu1 }
 0x610   : > { %v3666_v27 = vpop.f32.mrf.mxu1 }
 0x618   : > { %v3669_v18 = vpop.f32.mrf.mxu1 }
 0x62e   : > { %v3756_v34 = vpop.f32.mrf.mxu2 }
 0x62f   : > { %v3776_v24 = vadd.f32 %v3756_v34, %v3674_v54  ;;  %v3474_v54 = vadd.f32 %v6753_v41, %v3372_v8 }
 0x631   : > { %v3788_v45 = vadd.f32 %v6772_v28, %v3776_v24  ;;  %v3576_v34 = vadd.f32 %v3562_v59, %v3474_v54  ;;  %v3564_v24 = vpop.f32.mrf.mxu0 }
 0x633   : > { %v3796_v40 = vmax.f32 %v3788_v45, 0.0  ;;  %v3678_v37 = vadd.f32 %v3664_v10, %v3576_v34  ;;  %v3373_v45 = vadd.f32 %v6749_v30, %v3271_v16 }
 0x635   : > { %v3808_v60 = vmul.f32 %v6779_v12, %v3796_v40  ;;  %v3475_v40 = vadd.f32 %v6759_v5, %v3373_v45 }
 0x636   : > { %v3758_v3 = vpop.f32.mrf.mxu2 }
 0x637   : > { %v3820_v7 = vadd.f32 %v6786_v43, %v3808_v60  ;;  %v3777_v25 = vadd.f32 %v3758_v3, %v3675_v55  ;;  %v3577_v55 = vadd.f32 %v3564_v24, %v3475_v40 }
 0x639   : > { %3828 = vst.msk [vmem:[%s6791_s21] sm:$0xff] %vm2513_vm1, %v3820_v7  ;;  %v3789_v15 = vadd.f32 %v6772_v28, %v3777_v25  ;;  %v3679_v49 = vadd.f32 %v3666_v27, %v3577_v55  ;;  %v3567_v20 = vpop.f32.mrf.mxu0  ;;  %v3374_v7 = vadd.f32 %v6755_v58, %v3272_v52  ;;  %v3273_v58 = vadd.f32 %v6757_v36, %v3171_v44  ;;  %v3671_v36 = vpop.f32.mrf.mxu1 }
 0x63b   : > { %v3797_v0 = vmax.f32 %v3789_v15, 0.0  ;;  %v3476_v15 = vadd.f32 %v6763_v61, %v3374_v7  ;;  %v3375_v53 = vadd.f32 %v6761_v29, %v3273_v58 }
 0x63d   : > { %v3809_v33 = vmul.f32 %v6779_v12, %v3797_v0  ;;  %v3578_v47 = vadd.f32 %v3567_v20, %v3476_v15 }
 0x63e   : > { %v3761_v1 = vpop.f32.mrf.mxu2 }
 0x63f   : > { %v3821_v51 = vadd.f32 %v6786_v43, %v3809_v33  ;;  %v3778_v13 = vadd.f32 %v3761_v1, %v3676_v22  ;;  %v3680_v0 = vadd.f32 %v3669_v18, %v3578_v47  ;;  %v3477_v1 = vadd.f32 %v6766_v6, %v3375_v53 }
 0x641   : > { %3829 = vst.msk [vmem:[%s6791_s21 + $0x8] sm:$0xff] %vm2513_vm1, %v3821_v51  ;;  %v3790_v50 = vadd.f32 %v6772_v28, %v3778_v13  ;;  %v3569_v33 = vpop.f32.mrf.mxu0 }
 0x642   : > { %v3579_v42 = vadd.f32 %v3569_v33, %v3477_v1 }
 0x643   : > { %v3798_v14 = vmax.f32 %v3790_v50, 0.0 }
 0x644   : > { %v3681_v13 = vadd.f32 %v3671_v36, %v3579_v42 }
 0x645   : > { %v3810_v11 = vmul.f32 %v6779_v12, %v3798_v14 }
 0x646   : > { %v3763_v48 = vpop.f32.mrf.mxu2 }
 0x647   : > { %v3822_v2 = vadd.f32 %v6786_v43, %v3810_v11  ;;  %v3779_v46 = vadd.f32 %v3763_v48, %v3677_v17 }
 0x649   : > { %3830 = vst.msk [vmem:[%s6791_s21 + $0x10] sm:$0xff] %vm2513_vm1, %v3822_v2  ;;  %v3791_v19 = vadd.f32 %v6772_v28, %v3779_v46 }
 0x64b   : > { %v3799_v35 = vmax.f32 %v3791_v19, 0.0 }
 0x64d   : > { %v3811_v23 = vmul.f32 %v6779_v12, %v3799_v35 }
 0x64e   : > { %v3766_v56 = vpop.f32.mrf.mxu2 }
 0x64f   : > { %v3823_v63 = vadd.f32 %v6786_v43, %v3811_v23  ;;  %v3780_v41 = vadd.f32 %v3766_v56, %v3678_v37 }
 0x651   : > { %3831 = vst.msk [vmem:[%s6791_s21 + $0x18] sm:$0xff] %vm2513_vm1, %v3823_v63  ;;  %v3792_v26 = vadd.f32 %v6772_v28, %v3780_v41 }
 0x653   : > { %v3800_v60 = vmax.f32 %v3792_v26, 0.0 }
 0x655   : > { %v3812_v3 = vmul.f32 %v6779_v12, %v3800_v60 }
 0x656   : > { %v3768_v30 = vpop.f32.mrf.mxu2 }
 0x657   : > { %v3824_v25 = vadd.f32 %v6786_v43, %v3812_v3  ;;  %v3781_v5 = vadd.f32 %v3768_v30, %v3679_v49 }
 0x659   : > { %3832 = vst.msk [vmem:[%s6791_s21 + $0x20] sm:$0xff] %vm2513_vm1, %v3824_v25  ;;  %v3793_v21 = vadd.f32 %v6772_v28, %v3781_v5 }
 0x65b   : > { %v3801_v32 = vmax.f32 %v3793_v21, 0.0 }
 0x65d   : > { %v3813_v57 = vmul.f32 %v6779_v12, %v3801_v32 }
 0x65e   : > { %v3771_v22 = vpop.f32.mrf.mxu2 }
 0x65f   : > { %v3825_v62 = vadd.f32 %v6786_v43, %v3813_v57  ;;  %v3782_v61 = vadd.f32 %v3771_v22, %v3680_v0 }
 0x661   : > { %3833 = vst.msk [vmem:[%s6791_s21 + $0x28] sm:$0xff] %vm2513_vm1, %v3825_v62  ;;  %v3794_v38 = vadd.f32 %v6772_v28, %v3782_v61 }
 0x663   : > { %v3802_v51 = vmax.f32 %v3794_v38, 0.0 }
 0x665   : > { %v3814_v31 = vmul.f32 %v6779_v12, %v3802_v51 }
 0x666   : > { %v3773_v29 = vpop.f32.mrf.mxu2 }
 0x667   : > { %v3826_v50 = vadd.f32 %v6786_v43, %v3814_v31  ;;  %v3783_v59 = vadd.f32 %v3773_v29, %v3681_v13 }
 0x669   : > { %3834 = vst.msk [vmem:[%s6791_s21 + $0x30] sm:$0xff] %vm2513_vm1, %v3826_v50  ;;  %v3795_v6 = vadd.f32 %v6772_v28, %v3783_v59 }
 0x66b   : > { %v3803_v9 = vmax.f32 %v3795_v6, 0.0 }
 0x66d   : > { %v3815_v14 = vmul.f32 %v6779_v12, %v3803_v9 }
 0x66f   : > { %v3827_v10 = vadd.f32 %v6786_v43, %v3815_v14 }
 0x671   : > { %3835 = vst.msk [vmem:[%s6791_s21 + $0x38] sm:$0xff] %vm2513_vm1, %v3827_v10 }
 0x672   : > { %5349 = shalt.err (!%p5346_p3)
}
 0x673   : > { %s5386_s30 = smov 128   ;;  %s5387_s21 = smov 8  }
 0x674   : > { %5274 = dma.vmem_to_hbm [thread:$0]  (%p5481_p5), %s3850_s29, 1024, %s3852_s22, %s3837_s17, %s5386_s30, %s5386_s30, %s5387_s21  }
 0x675 PF: > { %p5280_p4 = scmp.ge.s32.totalorder %s5384_s16, 2  ;;  %s3866_s26 = sand.u32 1, %s5372_s13  }
 0x676   : > { %s3867_s18 = scalar_lea.sflag [#allocation3], %s3866_s26 }
 0x677   : > { %p5277_p7 = pnand %p5280_p4, %p5485_p6 }
 0x679   : > { %p5278_p8 = pneg %p5277_p7 }
 0x67b   : > { %5367 = dma.done.wait (%p5278_p8), %s3867_s18, 1024  }
 0x67c   : > { %5369 = vsyncadd (%p5278_p8), %s3867_s18, 4294966272  ;;  %s6943_s11 = sld [smem:[#allocation5_spill]]  ;;  %p20_p9 = scmp.ge.s32.totalorder %s5468_s19, 4  }
 0x67d   : > { %s6944_s13 = smov %s5376_s14  ;;  %s6945_s14 = smov %s5380_s15 }
 0x67e   : > { %s6947_s16 = smov %s5468_s19  ;;  %22 = sbr.rel (!%p20_p9) target bundleno = 3 (0x3), region = 103 }
 0x682   : > { %s6946_s15 = smov %s6943_s11 }
 0x683   :  { %3873 = vsyncpa [#allocation3], 1 }
 0x684   :  { %3875 = vsyncpa [#allocation3 + $0x1], 1 }

</bundles_post_ra>
